<compile_context>
chip_gen: v5e
topology: v5e:2x2
jax: 0.10.0
libtpu: 0.0.40
codegen_flags: <defaults>
</compile_context>

<pallas_src>
import math

import jax
import jax.numpy as jnp
from jax.experimental import pallas as pl
from jax.experimental.pallas import tpu as pltpu

_BN_EPS = 1e-5
_GEMM_DTYPE = jnp.bfloat16            # MXU operand dtype (f32 accumulation)
_VMEM_LIMIT = 32 * 1024 * 1024        # explicit scoped-VMEM limit (v5e default is 16 MiB)


def _compiler_params(*sem):
    return pltpu.CompilerParams(dimension_semantics=sem,
                                vmem_limit_bytes=_VMEM_LIMIT)


def _row_band(h):
    """Largest row-band size <= 8 that divides h (tile of the spatial H axis)."""
    for t in (8, 4, 2, 1):
        if h % t == 0:
            return t
    return 1


# ----------------------------- Pallas kernels ------------------------------

def _deconv_kernel(x_ref, w_ref, b_ref, o_ref):
    """ConvTranspose2d(k=2, stride=2) for one (batch, row-band) tile: one GEMM."""
    th, w, cin = x_ref.shape
    x2 = x_ref[...].reshape(th * w, cin)                              # bf16
    y = jnp.dot(x2, w_ref[...], preferred_element_type=jnp.float32) + b_ref[...]
    o_ref[...] = y.reshape(th, w, -1).astype(o_ref.dtype)


def _patch_matmul(band_ref, w_ref):
    """3x3 'SAME' conv taps for one padded row band as a single MXU GEMM.

    The patch matrix is built in VMEM from 9 shifted slices of the halo band,
    so no 9x-expanded im2col ever touches HBM.
    """
    band = band_ref[...]                                              # (th+2, w+2, cs)
    thp, wp, cs = band.shape
    th, w = thp - 2, wp - 2
    patch = jnp.concatenate(
        [band[dy:dy + th, dx:dx + w, :] for dy in range(3) for dx in range(3)],
        axis=-1).reshape(th * w, 9 * cs)
    return jnp.dot(patch, w_ref[...], preferred_element_type=jnp.float32)


def _conv_finish(y, y_ref, st_ref):
    th, w, c = y_ref.shape
    # Per-tile partial BN statistics (sum, sum of squares); reduced across
    # tiles by a tiny glue reduction => BN stays exact under M tiling.
    st_ref[...] = jnp.concatenate(
        [jnp.sum(y, axis=0, keepdims=True),
         jnp.sum(y * y, axis=0, keepdims=True)], axis=0)
    y_ref[...] = y.reshape(th, w, c).astype(y_ref.dtype)


def _conv1_kernel(xu_ref, xc_ref, wu_ref, wc_ref, b_ref, y_ref, st_ref):
    # conv1 over cat([up, crop]) without materializing `cat`: the input-channel
    # contraction is split into two accumulated GEMM streams.
    y = _patch_matmul(xu_ref, wu_ref) + _patch_matmul(xc_ref, wc_ref) + b_ref[...]
    _conv_finish(y, y_ref, st_ref)


def _conv2_kernel(x_ref, w_ref, b_ref, y_ref, st_ref):
    y = _patch_matmul(x_ref, w_ref) + b_ref[...]
    _conv_finish(y, y_ref, st_ref)


def _bn_relu_kernel(y_ref, s_ref, t_ref, o_ref):
    # Lane-dense fused scale/shift + ReLU (second BN pass).
    o_ref[...] = jnp.maximum(y_ref[...] * s_ref[...] + t_ref[...], 0.0)


# --------------------------- pallas_call wrappers ---------------------------

def _deconv(x, w2d, bias2d):
    b, h, w, cin = x.shape
    n4 = w2d.shape[1]
    th = _row_band(h)
    return pl.pallas_call(
        _deconv_kernel,
        out_shape=jax.ShapeDtypeStruct((b, h, w, n4), _GEMM_DTYPE),
        grid=(b, h // th),
        in_specs=[pl.BlockSpec((None, th, w, cin), lambda bi, ri: (bi, ri, 0, 0)),
                  pl.BlockSpec((cin, n4), lambda bi, ri: (0, 0)),
                  pl.BlockSpec((1, n4), lambda bi, ri: (0, 0))],
        out_specs=pl.BlockSpec((None, th, w, n4), lambda bi, ri: (bi, ri, 0, 0)),
        compiler_params=_compiler_params("parallel", "parallel"),
    )(x, w2d, bias2d)


def _conv3x3_bands(bands, weights, bias2d, t, cout):
    """3x3 conv (+bias) over 1 or 2 input streams of halo row-bands.

    Returns (y_pre_bn: (B,t,t,cout) f32, per-tile stats: (B,nb,2,cout) f32).
    """
    b, nb, thp, wp, _ = bands[0].shape
    th, w = thp - 2, wp - 2

    def band_spec(arr):
        blk = (None, None) + tuple(arr.shape[2:])
        return pl.BlockSpec(blk, lambda bi, ri: (bi, ri, 0, 0, 0))

    def full_spec(arr):
        return pl.BlockSpec(tuple(arr.shape), lambda bi, ri: (0,) * arr.ndim)

    kernel = _conv2_kernel if len(bands) == 1 else _conv1_kernel
    return pl.pallas_call(
        kernel,
        out_shape=(jax.ShapeDtypeStruct((b, t, t, cout), jnp.float32),
                   jax.ShapeDtypeStruct((b, nb, 2, cout), jnp.float32)),
        grid=(b, nb),
        in_specs=([band_spec(a) for a in bands]
                  + [full_spec(wm) for wm in weights]
                  + [full_spec(bias2d)]),
        out_specs=(pl.BlockSpec((None, th, w, cout), lambda bi, ri: (bi, ri, 0, 0)),
                   pl.BlockSpec((None, None, 2, cout), lambda bi, ri: (bi, ri, 0, 0))),
        compiler_params=_compiler_params("parallel", "parallel"),
    )(*bands, *weights, bias2d)


def _bn_relu(y, scale, shift):
    """Apply y*scale + shift, ReLU; tiled + lane-dense (rows of lcm(C,128))."""
    b, h, w, c = y.shape
    n = b * h * w * c
    rw = (128 * c) // math.gcd(128, c)        # multiple of 128 lanes and of C
    if n % rw == 0 and (n // rw) % 8 == 0:
        r = n // rw
        tr = next(t for t in (512, 256, 128, 64, 32, 16, 8) if r % t == 0)
        srow = jnp.tile(scale.astype(jnp.float32), rw // c).reshape(1, rw)
        trow = jnp.tile(shift.astype(jnp.float32), rw // c).reshape(1, rw)
        out = pl.pallas_call(
            _bn_relu_kernel,
            out_shape=jax.ShapeDtypeStruct((r, rw), jnp.float32),
            grid=(r // tr,),
            in_specs=[pl.BlockSpec((tr, rw), lambda i: (i, 0)),
                      pl.BlockSpec((1, rw), lambda i: (0, 0)),
                      pl.BlockSpec((1, rw), lambda i: (0, 0))],
            out_specs=pl.BlockSpec((tr, rw), lambda i: (i, 0)),
            compiler_params=_compiler_params("parallel"),
        )(y.reshape(r, rw), srow, trow)
        return out.reshape(b, h, w, c)
    # Fallback for awkward shapes: plain elementwise (still exact).
    return jnp.maximum(y * scale + shift, 0.0)


# ------------------------------ glue helpers -------------------------------

def _bands_3x3(x, th):
    """(B,H,W,C) -> (B, H//th, th+2, W+2, C) halo row-bands ('SAME' 3x3 pad)."""
    xp = jnp.pad(x, ((0, 0), (1, 1), (1, 1), (0, 0)))
    h = x.shape[1]
    nb = h // th
    return jnp.stack([xp[:, i * th:i * th + th + 2] for i in range(nb)], axis=1)


def _w3x3_to_gemm(w_pt):
    # (Cout, Cin, 3, 3) -> (9*Cin, Cout), rows ordered (dy, dx, ci) to match
    # the in-kernel patch construction.
    co, ci = w_pt.shape[0], w_pt.shape[1]
    return jnp.transpose(w_pt, (2, 3, 1, 0)).reshape(9 * ci, co).astype(_GEMM_DTYPE)


def _bn_affine(stats, gamma, beta, n):
    s = jnp.sum(stats.astype(jnp.float32), axis=(0, 1))      # (2, C)
    mean = s[0] / n
    var = s[1] / n - mean * mean                              # biased (training BN)
    scale = gamma * jax.lax.rsqrt(var + _BN_EPS)
    return scale, beta - mean * scale


def up_forward(params, x_nchw, bridge_nchw):
    """Pallas implementation of Up.forward. Inputs/outputs are NCHW."""
    b, cin, h, w = x_nchw.shape
    cout = params["b_up"].shape[0]

    # --- ConvTranspose2d(ins, outs, 2, stride=2): per-pixel GEMM -------------
    x = jnp.transpose(x_nchw, (0, 2, 3, 1)).astype(_GEMM_DTYPE)        # NHWC bf16
    w_up = jnp.transpose(params["w_up"], (0, 2, 3, 1)).reshape(cin, 4 * cout)
    b_up = jnp.tile(params["b_up"], 4).reshape(1, 4 * cout).astype(jnp.float32)
    y_up = _deconv(x, w_up.astype(_GEMM_DTYPE), b_up)                  # (B,H,W,4*Cout)
    # 2x2 interleave of the (kh, kw, co) columns into spatial positions.
    up = jnp.transpose(y_up.reshape(b, h, w, 2, 2, cout),
                       (0, 1, 3, 2, 4, 5)).reshape(b, 2 * h, 2 * w, cout)

    # --- crop(bridge) + conv1 over cat([up, crop]) without building cat -----
    t = 2 * h
    th = _row_band(t)
    bridge = jnp.transpose(bridge_nchw, (0, 2, 3, 1))
    xy1 = (bridge.shape[1] - t) // 2
    crop = bridge[:, xy1:xy1 + t, xy1:xy1 + t, :]

    up_bands = _bands_3x3(up, th)                                      # bf16
    crop_bands = _bands_3x3(crop.astype(_GEMM_DTYPE), th)              # bf16
    w1u = _w3x3_to_gemm(params["w1"][:, :cout])                        # up stream
    w1c = _w3x3_to_gemm(params["w1"][:, cout:])                        # crop stream
    b1 = params["b1"].reshape(1, cout).astype(jnp.float32)
    y1, st1 = _conv3x3_bands([up_bands, crop_bands], [w1u, w1c], b1, t, cout)
    scale1, shift1 = _bn_affine(st1, params["gamma"], params["beta"], b * t * t)
    o1 = _bn_relu(y1, scale1, shift1)                                  # (B,T,T,Cout) f32

    # --- conv2 + BN + ReLU ----------------------------------------------------
    o1_bands = _bands_3x3(o1.astype(_GEMM_DTYPE), th)
    w2 = _w3x3_to_gemm(params["w2"])
    b2 = params["b2"].reshape(1, cout).astype(jnp.float32)
    y2, st2 = _conv3x3_bands([o1_bands], [w2], b2, t, cout)
    scale2, shift2 = _bn_affine(st2, params["gamma"], params["beta"], b * t * t)
    o2 = _bn_relu(y2, scale2, shift2)

    return jnp.transpose(o2, (0, 3, 1, 2))                             # NCHW f32


# --------------------------- pure-JAX reference ----------------------------

def _bn_relu_ref(y, gamma, beta):
    mean = jnp.mean(y, axis=(0, 1, 2), keepdims=True)
    var = jnp.mean(jnp.square(y - mean), axis=(0, 1, 2), keepdims=True)
    return jnp.maximum((y - mean) * jax.lax.rsqrt(var + _BN_EPS) * gamma + beta, 0.0)


def _conv3x3_ref(x_nhwc, w_pt, bias):
    y = jax.lax.conv_general_dilated(
        x_nhwc, jnp.transpose(w_pt, (2, 3, 1, 0)), (1, 1), "SAME",
        dimension_numbers=("NHWC", "HWIO", "NHWC"))
    return y + bias


def up_forward_reference(params, x_nchw, bridge_nchw):
    x = jnp.transpose(x_nchw, (0, 2, 3, 1)).astype(jnp.float32)
    bridge = jnp.transpose(bridge_nchw, (0, 2, 3, 1)).astype(jnp.float32)
    b, h, w, _ = x.shape
    cout = params["b_up"].shape[0]

    up = jnp.einsum("bijc,cokl->bikjlo", x, params["w_up"])
    up = up.reshape(b, 2 * h, 2 * w, cout) + params["b_up"]

    target = 2 * h
    xy1 = (bridge.shape[1] - target) // 2
    crop = bridge[:, xy1:xy1 + target, xy1:xy1 + target, :]
    cat = jnp.concatenate([up, crop], axis=-1)

    o1 = _bn_relu_ref(_conv3x3_ref(cat, params["w1"], params["b1"]),
                      params["gamma"], params["beta"])
    o2 = _bn_relu_ref(_conv3x3_ref(o1, params["w2"], params["b2"]),
                      params["gamma"], params["beta"])
    return jnp.transpose(o2, (0, 3, 1, 2))


# --------------------------------- main -------------------------------------

if __name__ == "__main__":
    ins, outs = 8, 4                  # conv1 takes `ins` channels => bridge has ins-outs
    B, H, W = 2, 16, 16
    bridge_hw = 2 * H + 4             # 36 -> center-crop to 32 is exercised

    key = jax.random.PRNGKey(0)
    k = jax.random.split(key, 8)
    params = {
        "w_up": 0.1 * jax.random.normal(k[0], (ins, outs, 2, 2), jnp.float32),
        "b_up": 0.1 * jax.random.normal(k[1], (outs,), jnp.float32),
        "w1":   0.1 * jax.random.normal(k[2], (outs, ins, 3, 3), jnp.float32),
        "b1":   0.1 * jax.random.normal(k[3], (outs,), jnp.float32),
        "w2":   0.1 * jax.random.normal(k[4], (outs, outs, 3, 3), jnp.float32),
        "b2":   0.1 * jax.random.normal(k[5], (outs,), jnp.float32),
        "gamma": jnp.ones((outs,), jnp.float32),    # BatchNorm2d default init
        "beta":  jnp.zeros((outs,), jnp.float32),
    }
    x = jax.random.normal(k[6], (B, ins, H, W), jnp.float32)
    bridge = jax.random.normal(k[7], (B, ins - outs, bridge_hw, bridge_hw),
                               jnp.float32)

    out = jax.jit(up_forward)(params, x, bridge)
    out = jax.block_until_ready(out)

    assert out.shape == (B, outs, 2 * H, 2 * W), out.shape
    ref = up_forward_reference(params, x, bridge)
    max_err = float(jnp.max(jnp.abs(out - ref)))
    # Tolerance sized for bfloat16 MXU operands (f32 reference, f32 accumulation).
    assert bool(jnp.allclose(out, ref, rtol=3e-2, atol=3e-2)), (
        f"Pallas/reference mismatch, max abs err = {max_err}")

    print("KERNEL_OK")
</pallas_src>

<mosaic_0001>
module attributes {stable_mosaic.version = 11 : i64} {
  func.func @_deconv_kernel(%arg0: i32, %arg1: i32, %arg2: memref<1x8x16x8xbf16, #tpu.memory_space<vmem>>, %arg3: memref<8x16xbf16, #tpu.memory_space<vmem>>, %arg4: memref<1x16xf32, #tpu.memory_space<vmem>>, %arg5: memref<1x8x16x16xbf16, #tpu.memory_space<vmem>>) attributes {dimension_semantics = [#tpu.dimension_semantics<parallel>, #tpu.dimension_semantics<parallel>], iteration_bounds = array<i64: 2, 2>, scalar_prefetch = 0 : i64, scratch_operands = 0 : i64, tpu.core_type = #tpu.core_type<tc>, window_params = [{transform_indices = @transform_0, window_bounds = array<i64: 1, 8, 16, 8>}, {pipeline_mode = #tpu.pipeline_mode<synchronous>, transform_indices = @transform_1, window_bounds = array<i64: 8, 16>}, {pipeline_mode = #tpu.pipeline_mode<synchronous>, transform_indices = @transform_2, window_bounds = array<i64: 1, 16>}, {transform_indices = @transform_3, window_bounds = array<i64: 1, 8, 16, 16>}]} {
    %c0 = arith.constant 0 : index
    %c0_0 = arith.constant 0 : index
    %c0_1 = arith.constant 0 : index
    %c0_2 = arith.constant 0 : index
    %0 = vector.load %arg2[%c0, %c0_0, %c0_1, %c0_2] : memref<1x8x16x8xbf16, #tpu.memory_space<vmem>>, vector<1x8x16x8xbf16>
    %1 = vector.shape_cast %0 : vector<1x8x16x8xbf16> to vector<8x16x8xbf16>
    %2 = vector.shape_cast %1 : vector<8x16x8xbf16> to vector<128x8xbf16>
    %c0_3 = arith.constant 0 : index
    %c0_4 = arith.constant 0 : index
    %3 = vector.load %arg3[%c0_3, %c0_4] : memref<8x16xbf16, #tpu.memory_space<vmem>>, vector<8x16xbf16>
    %cst = arith.constant dense<0.000000e+00> : vector<128x16xf32>
    %4 = tpu.matmul %2, %3, %cst {dimension_numbers = #tpu.dot_dimension_numbers<[1], [0], [0], [1], [0, 0, 1, 1], [], []>} : vector<128x8xbf16>, vector<8x16xbf16>, vector<128x16xf32> -> vector<128x16xf32>
    %c0_5 = arith.constant 0 : index
    %c0_6 = arith.constant 0 : index
    %5 = vector.load %arg4[%c0_5, %c0_6] : memref<1x16xf32, #tpu.memory_space<vmem>>, vector<1x16xf32>
    %6 = vector.broadcast %5 : vector<1x16xf32> to vector<128x16xf32>
    %7 = arith.addf %4, %6 : vector<128x16xf32>
    %8 = vector.shape_cast %7 : vector<128x16xf32> to vector<8x16x16xf32>
    %9 = arith.truncf %8 : vector<8x16x16xf32> to vector<8x16x16xbf16>
    %c0_7 = arith.constant 0 : index
    %c0_8 = arith.constant 0 : index
    %c0_9 = arith.constant 0 : index
    %c0_10 = arith.constant 0 : index
    %10 = vector.load %arg5[%c0_7, %c0_8, %c0_9, %c0_10] : memref<1x8x16x16xbf16, #tpu.memory_space<vmem>>, vector<1x8x16x16xbf16>
    %11 = vector.shape_cast %10 : vector<1x8x16x16xbf16> to vector<8x16x16xbf16>
    %12 = vector.shape_cast %9 : vector<8x16x16xbf16> to vector<1x8x16x16xbf16>
    tpu.vector_store %arg5[%c0_7, %c0_8, %c0_9, %c0_10], %12 {strides = array<i32>} : memref<1x8x16x16xbf16, #tpu.memory_space<vmem>>, vector<1x8x16x16xbf16>,
    return
  }
  func.func @transform_0(%arg0: i32, %arg1: i32) -> (i32, i32, i32, i32) {
    %c0_i32 = arith.constant 0 : i32
    %c0_i32_0 = arith.constant 0 : i32
    %c0_i32_1 = arith.constant 0 : i32
    return %arg0, %arg1, %c0_i32, %c0_i32_0 : i32, i32, i32, i32
  }
  func.func @transform_1(%arg0: i32, %arg1: i32) -> (i32, i32) {
    %c0_i32 = arith.constant 0 : i32
    %c0_i32_0 = arith.constant 0 : i32
    %c0_i32_1 = arith.constant 0 : i32
    return %c0_i32, %c0_i32_0 : i32, i32
  }
  func.func @transform_2(%arg0: i32, %arg1: i32) -> (i32, i32) {
    %c0_i32 = arith.constant 0 : i32
    %c0_i32_0 = arith.constant 0 : i32
    %c0_i32_1 = arith.constant 0 : i32
    return %c0_i32, %c0_i32_0 : i32, i32
  }
  func.func @transform_3(%arg0: i32, %arg1: i32) -> (i32, i32, i32, i32) {
    %c0_i32 = arith.constant 0 : i32
    %c0_i32_0 = arith.constant 0 : i32
    %c0_i32_1 = arith.constant 0 : i32
    return %arg0, %arg1, %c0_i32, %c0_i32_0 : i32, i32, i32, i32
  }
}

module attributes {stable_mosaic.version = 11 : i64} {
  func.func @_conv1_kernel(%arg0: i32, %arg1: i32, %arg2: memref<1x1x10x34x4xbf16, #tpu.memory_space<vmem>>, %arg3: memref<1x1x10x34x4xbf16, #tpu.memory_space<vmem>>, %arg4: memref<36x4xbf16, #tpu.memory_space<vmem>>, %arg5: memref<36x4xbf16, #tpu.memory_space<vmem>>, %arg6: memref<1x4xf32, #tpu.memory_space<vmem>>, %arg7: memref<1x8x32x4xf32, #tpu.memory_space<vmem>>, %arg8: memref<1x1x2x4xf32, #tpu.memory_space<vmem>>) attributes {dimension_semantics = [#tpu.dimension_semantics<parallel>, #tpu.dimension_semantics<parallel>], iteration_bounds = array<i64: 2, 4>, scalar_prefetch = 0 : i64, scratch_operands = 0 : i64, tpu.core_type = #tpu.core_type<tc>, window_params = [{transform_indices = @transform_0, window_bounds = array<i64: 1, 1, 10, 34, 4>}, {transform_indices = @transform_1, window_bounds = array<i64: 1, 1, 10, 34, 4>}, {pipeline_mode = #tpu.pipeline_mode<synchronous>, transform_indices = @transform_2, window_bounds = array<i64: 36, 4>}, {pipeline_mode = #tpu.pipeline_mode<synchronous>, transform_indices = @transform_3, window_bounds = array<i64: 36, 4>}, {pipeline_mode = #tpu.pipeline_mode<synchronous>, transform_indices = @transform_4, window_bounds = array<i64: 1, 4>}, {transform_indices = @transform_5, window_bounds = array<i64: 1, 8, 32, 4>}, {transform_indices = @transform_6, window_bounds = array<i64: 1, 1, 2, 4>}]} {
    %c0 = arith.constant 0 : index
    %c0_0 = arith.constant 0 : index
    %c0_1 = arith.constant 0 : index
    %c0_2 = arith.constant 0 : index
    %c0_3 = arith.constant 0 : index
    %0 = vector.load %arg2[%c0, %c0_0, %c0_1, %c0_2, %c0_3] : memref<1x1x10x34x4xbf16, #tpu.memory_space<vmem>>, vector<1x1x10x34x4xbf16>
    %1 = vector.shape_cast %0 : vector<1x1x10x34x4xbf16> to vector<10x34x4xbf16>
    %2 = vector.extract_strided_slice %1 {offsets = [0, 0, 0], sizes = [8, 32, 4], strides = [1, 1, 1]} : vector<10x34x4xbf16> to vector<8x32x4xbf16>
    %3 = vector.extract_strided_slice %1 {offsets = [0, 1, 0], sizes = [8, 32, 4], strides = [1, 1, 1]} : vector<10x34x4xbf16> to vector<8x32x4xbf16>
    %4 = vector.extract_strided_slice %1 {offsets = [0, 2, 0], sizes = [8, 32, 4], strides = [1, 1, 1]} : vector<10x34x4xbf16> to vector<8x32x4xbf16>
    %5 = vector.extract_strided_slice %1 {offsets = [1, 0, 0], sizes = [8, 32, 4], strides = [1, 1, 1]} : vector<10x34x4xbf16> to vector<8x32x4xbf16>
    %6 = vector.extract_strided_slice %1 {offsets = [1, 1, 0], sizes = [8, 32, 4], strides = [1, 1, 1]} : vector<10x34x4xbf16> to vector<8x32x4xbf16>
    %7 = vector.extract_strided_slice %1 {offsets = [1, 2, 0], sizes = [8, 32, 4], strides = [1, 1, 1]} : vector<10x34x4xbf16> to vector<8x32x4xbf16>
    %8 = vector.extract_strided_slice %1 {offsets = [2, 0, 0], sizes = [8, 32, 4], strides = [1, 1, 1]} : vector<10x34x4xbf16> to vector<8x32x4xbf16>
    %9 = vector.extract_strided_slice %1 {offsets = [2, 1, 0], sizes = [8, 32, 4], strides = [1, 1, 1]} : vector<10x34x4xbf16> to vector<8x32x4xbf16>
    %10 = vector.extract_strided_slice %1 {offsets = [2, 2, 0], sizes = [8, 32, 4], strides = [1, 1, 1]} : vector<10x34x4xbf16> to vector<8x32x4xbf16>
    %11 = tpu.concatenate %2, %3, %4, %5, %6, %7, %8, %9, %10 in 2 : vector<8x32x4xbf16>, vector<8x32x4xbf16>, vector<8x32x4xbf16>, vector<8x32x4xbf16>, vector<8x32x4xbf16>, vector<8x32x4xbf16>, vector<8x32x4xbf16>, vector<8x32x4xbf16>, vector<8x32x4xbf16> -> vector<8x32x36xbf16>
    %12 = vector.shape_cast %11 : vector<8x32x36xbf16> to vector<256x36xbf16>
    %c0_4 = arith.constant 0 : index
    %c0_5 = arith.constant 0 : index
    %13 = vector.load %arg4[%c0_4, %c0_5] : memref<36x4xbf16, #tpu.memory_space<vmem>>, vector<36x4xbf16>
    %cst = arith.constant dense<0.000000e+00> : vector<256x4xf32>
    %14 = tpu.matmul %12, %13, %cst {dimension_numbers = #tpu.dot_dimension_numbers<[1], [0], [0], [1], [0, 0, 1, 1], [], []>} : vector<256x36xbf16>, vector<36x4xbf16>, vector<256x4xf32> -> vector<256x4xf32>
    %c0_6 = arith.constant 0 : index
    %c0_7 = arith.constant 0 : index
    %c0_8 = arith.constant 0 : index
    %c0_9 = arith.constant 0 : index
    %c0_10 = arith.constant 0 : index
    %15 = vector.load %arg3[%c0_6, %c0_7, %c0_8, %c0_9, %c0_10] : memref<1x1x10x34x4xbf16, #tpu.memory_space<vmem>>, vector<1x1x10x34x4xbf16>
    %16 = vector.shape_cast %15 : vector<1x1x10x34x4xbf16> to vector<10x34x4xbf16>
    %17 = vector.extract_strided_slice %16 {offsets = [0, 0, 0], sizes = [8, 32, 4], strides = [1, 1, 1]} : vector<10x34x4xbf16> to vector<8x32x4xbf16>
    %18 = vector.extract_strided_slice %16 {offsets = [0, 1, 0], sizes = [8, 32, 4], strides = [1, 1, 1]} : vector<10x34x4xbf16> to vector<8x32x4xbf16>
    %19 = vector.extract_strided_slice %16 {offsets = [0, 2, 0], sizes = [8, 32, 4], strides = [1, 1, 1]} : vector<10x34x4xbf16> to vector<8x32x4xbf16>
    %20 = vector.extract_strided_slice %16 {offsets = [1, 0, 0], sizes = [8, 32, 4], strides = [1, 1, 1]} : vector<10x34x4xbf16> to vector<8x32x4xbf16>
    %21 = vector.extract_strided_slice %16 {offsets = [1, 1, 0], sizes = [8, 32, 4], strides = [1, 1, 1]} : vector<10x34x4xbf16> to vector<8x32x4xbf16>
    %22 = vector.extract_strided_slice %16 {offsets = [1, 2, 0], sizes = [8, 32, 4], strides = [1, 1, 1]} : vector<10x34x4xbf16> to vector<8x32x4xbf16>
    %23 = vector.extract_strided_slice %16 {offsets = [2, 0, 0], sizes = [8, 32, 4], strides = [1, 1, 1]} : vector<10x34x4xbf16> to vector<8x32x4xbf16>
    %24 = vector.extract_strided_slice %16 {offsets = [2, 1, 0], sizes = [8, 32, 4], strides = [1, 1, 1]} : vector<10x34x4xbf16> to vector<8x32x4xbf16>
    %25 = vector.extract_strided_slice %16 {offsets = [2, 2, 0], sizes = [8, 32, 4], strides = [1, 1, 1]} : vector<10x34x4xbf16> to vector<8x32x4xbf16>
    %26 = tpu.concatenate %17, %18, %19, %20, %21, %22, %23, %24, %25 in 2 : vector<8x32x4xbf16>, vector<8x32x4xbf16>, vector<8x32x4xbf16>, vector<8x32x4xbf16>, vector<8x32x4xbf16>, vector<8x32x4xbf16>, vector<8x32x4xbf16>, vector<8x32x4xbf16>, vector<8x32x4xbf16> -> vector<8x32x36xbf16>
    %27 = vector.shape_cast %26 : vector<8x32x36xbf16> to vector<256x36xbf16>
    %c0_11 = arith.constant 0 : index
    %c0_12 = arith.constant 0 : index
    %28 = vector.load %arg5[%c0_11, %c0_12] : memref<36x4xbf16, #tpu.memory_space<vmem>>, vector<36x4xbf16>
    %cst_13 = arith.constant dense<0.000000e+00> : vector<256x4xf32>
    %29 = tpu.matmul %27, %28, %cst_13 {dimension_numbers = #tpu.dot_dimension_numbers<[1], [0], [0], [1], [0, 0, 1, 1], [], []>} : vector<256x36xbf16>, vector<36x4xbf16>, vector<256x4xf32> -> vector<256x4xf32>
    %30 = arith.addf %14, %29 : vector<256x4xf32>
    %c0_14 = arith.constant 0 : index
    %c0_15 = arith.constant 0 : index
    %31 = vector.load %arg6[%c0_14, %c0_15] : memref<1x4xf32, #tpu.memory_space<vmem>>, vector<1x4xf32>
    %32 = vector.broadcast %31 : vector<1x4xf32> to vector<256x4xf32>
    %33 = arith.addf %30, %32 : vector<256x4xf32>
    %cst_16 = arith.constant dense<0.000000e+00> : vector<4xf32>
    %34 = vector.multi_reduction <add>, %33, %cst_16 [0] : vector<256x4xf32> to vector<4xf32>
    %35 = vector.shape_cast %34 : vector<4xf32> to vector<1x4xf32>
    %36 = arith.mulf %33, %33 : vector<256x4xf32>
    %cst_17 = arith.constant dense<0.000000e+00> : vector<4xf32>
    %37 = vector.multi_reduction <add>, %36, %cst_17 [0] : vector<256x4xf32> to vector<4xf32>
    %38 = vector.shape_cast %37 : vector<4xf32> to vector<1x4xf32>
    %39 = tpu.concatenate %35, %38 in 0 : vector<1x4xf32>, vector<1x4xf32> -> vector<2x4xf32>
    %c0_18 = arith.constant 0 : index
    %c0_19 = arith.constant 0 : index
    %c0_20 = arith.constant 0 : index
    %c0_21 = arith.constant 0 : index
    %40 = vector.load %arg8[%c0_18, %c0_19, %c0_20, %c0_21] : memref<1x1x2x4xf32, #tpu.memory_space<vmem>>, vector<1x1x2x4xf32>
    %41 = vector.shape_cast %40 : vector<1x1x2x4xf32> to vector<2x4xf32>
    %42 = vector.shape_cast %39 : vector<2x4xf32> to vector<1x1x2x4xf32>
    tpu.vector_store %arg8[%c0_18, %c0_19, %c0_20, %c0_21], %42 {strides = array<i32>} : memref<1x1x2x4xf32, #tpu.memory_space<vmem>>, vector<1x1x2x4xf32>,
    %43 = vector.shape_cast %33 : vector<256x4xf32> to vector<8x32x4xf32>
    %c0_22 = arith.constant 0 : index
    %c0_23 = arith.constant 0 : index
    %c0_24 = arith.constant 0 : index
    %c0_25 = arith.constant 0 : index
    %44 = vector.load %arg7[%c0_22, %c0_23, %c0_24, %c0_25] : memref<1x8x32x4xf32, #tpu.memory_space<vmem>>, vector<1x8x32x4xf32>
    %45 = vector.shape_cast %44 : vector<1x8x32x4xf32> to vector<8x32x4xf32>
    %46 = vector.shape_cast %43 : vector<8x32x4xf32> to vector<1x8x32x4xf32>
    tpu.vector_store %arg7[%c0_22, %c0_23, %c0_24, %c0_25], %46 {strides = array<i32>} : memref<1x8x32x4xf32, #tpu.memory_space<vmem>>, vector<1x8x32x4xf32>,
    return
  }
  func.func @transform_0(%arg0: i32, %arg1: i32) -> (i32, i32, i32, i32, i32) {
    %c0_i32 = arith.constant 0 : i32
    %c0_i32_0 = arith.constant 0 : i32
    %c0_i32_1 = arith.constant 0 : i32
    %c0_i32_2 = arith.constant 0 : i32
    return %arg0, %arg1, %c0_i32, %c0_i32_0, %c0_i32_1 : i32, i32, i32, i32, i32
  }
  func.func @transform_1(%arg0: i32, %arg1: i32) -> (i32, i32, i32, i32, i32) {
    %c0_i32 = arith.constant 0 : i32
    %c0_i32_0 = arith.constant 0 : i32
    %c0_i32_1 = arith.constant 0 : i32
    %c0_i32_2 = arith.constant 0 : i32
    return %arg0, %arg1, %c0_i32, %c0_i32_0, %c0_i32_1 : i32, i32, i32, i32, i32
  }
  func.func @transform_2(%arg0: i32, %arg1: i32) -> (i32, i32) {
    %c0_i32 = arith.constant 0 : i32
    %c0_i32_0 = arith.constant 0 : i32
    %c0_i32_1 = arith.constant 0 : i32
    return %c0_i32, %c0_i32_0 : i32, i32
  }
  func.func @transform_3(%arg0: i32, %arg1: i32) -> (i32, i32) {
    %c0_i32 = arith.constant 0 : i32
    %c0_i32_0 = arith.constant 0 : i32
    %c0_i32_1 = arith.constant 0 : i32
    return %c0_i32, %c0_i32_0 : i32, i32
  }
  func.func @transform_4(%arg0: i32, %arg1: i32) -> (i32, i32) {
    %c0_i32 = arith.constant 0 : i32
    %c0_i32_0 = arith.constant 0 : i32
    %c0_i32_1 = arith.constant 0 : i32
    return %c0_i32, %c0_i32_0 : i32, i32
  }
  func.func @transform_5(%arg0: i32, %arg1: i32) -> (i32, i32, i32, i32) {
    %c0_i32 = arith.constant 0 : i32
    %c0_i32_0 = arith.constant 0 : i32
    %c0_i32_1 = arith.constant 0 : i32
    return %arg0, %arg1, %c0_i32, %c0_i32_0 : i32, i32, i32, i32
  }
  func.func @transform_6(%arg0: i32, %arg1: i32) -> (i32, i32, i32, i32) {
    %c0_i32 = arith.constant 0 : i32
    %c0_i32_0 = arith.constant 0 : i32
    %c0_i32_1 = arith.constant 0 : i32
    return %arg0, %arg1, %c0_i32, %c0_i32_0 : i32, i32, i32, i32
  }
}

module attributes {stable_mosaic.version = 11 : i64} {
  func.func @_bn_relu_kernel(%arg0: i32, %arg1: memref<64x128xf32, #tpu.memory_space<vmem>>, %arg2: memref<1x128xf32, #tpu.memory_space<vmem>>, %arg3: memref<1x128xf32, #tpu.memory_space<vmem>>, %arg4: memref<64x128xf32, #tpu.memory_space<vmem>>) attributes {dimension_semantics = [#tpu.dimension_semantics<parallel>], iteration_bounds = array<i64: 1>, scalar_prefetch = 0 : i64, scratch_operands = 0 : i64, tpu.core_type = #tpu.core_type<tc>, window_params = [{transform_indices = @transform_0, window_bounds = array<i64: 64, 128>}, {pipeline_mode = #tpu.pipeline_mode<synchronous>, transform_indices = @transform_1, window_bounds = array<i64: 1, 128>}, {pipeline_mode = #tpu.pipeline_mode<synchronous>, transform_indices = @transform_2, window_bounds = array<i64: 1, 128>}, {transform_indices = @transform_3, window_bounds = array<i64: 64, 128>}]} {
    %c0 = arith.constant 0 : index
    %c0_0 = arith.constant 0 : index
    %0 = vector.load %arg1[%c0, %c0_0] : memref<64x128xf32, #tpu.memory_space<vmem>>, vector<64x128xf32>
    %c0_1 = arith.constant 0 : index
    %c0_2 = arith.constant 0 : index
    %1 = vector.load %arg2[%c0_1, %c0_2] : memref<1x128xf32, #tpu.memory_space<vmem>>, vector<1x128xf32>
    %2 = vector.broadcast %1 : vector<1x128xf32> to vector<64x128xf32>
    %3 = arith.mulf %0, %2 : vector<64x128xf32>
    %c0_3 = arith.constant 0 : index
    %c0_4 = arith.constant 0 : index
    %4 = vector.load %arg3[%c0_3, %c0_4] : memref<1x128xf32, #tpu.memory_space<vmem>>, vector<1x128xf32>
    %5 = vector.broadcast %4 : vector<1x128xf32> to vector<64x128xf32>
    %6 = arith.addf %3, %5 : vector<64x128xf32>
    %cst = arith.constant 0.000000e+00 : f32
    %7 = vector.broadcast %cst : f32 to vector<64x128xf32>
    %8 = arith.maximumf %6, %7 : vector<64x128xf32>
    %c0_5 = arith.constant 0 : index
    %c0_6 = arith.constant 0 : index
    %9 = vector.load %arg4[%c0_5, %c0_6] : memref<64x128xf32, #tpu.memory_space<vmem>>, vector<64x128xf32>
    tpu.vector_store %arg4[%c0_5, %c0_6], %8 {strides = array<i32>} : memref<64x128xf32, #tpu.memory_space<vmem>>, vector<64x128xf32>,
    return
  }
  func.func @transform_0(%arg0: i32) -> (i32, i32) {
    %c0_i32 = arith.constant 0 : i32
    %c0_i32_0 = arith.constant 0 : i32
    return %arg0, %c0_i32 : i32, i32
  }
  func.func @transform_1(%arg0: i32) -> (i32, i32) {
    %c0_i32 = arith.constant 0 : i32
    %c0_i32_0 = arith.constant 0 : i32
    %c0_i32_1 = arith.constant 0 : i32
    return %c0_i32, %c0_i32_0 : i32, i32
  }
  func.func @transform_2(%arg0: i32) -> (i32, i32) {
    %c0_i32 = arith.constant 0 : i32
    %c0_i32_0 = arith.constant 0 : i32
    %c0_i32_1 = arith.constant 0 : i32
    return %c0_i32, %c0_i32_0 : i32, i32
  }
  func.func @transform_3(%arg0: i32) -> (i32, i32) {
    %c0_i32 = arith.constant 0 : i32
    %c0_i32_0 = arith.constant 0 : i32
    return %arg0, %c0_i32 : i32, i32
  }
}

module attributes {stable_mosaic.version = 11 : i64} {
  func.func @_conv2_kernel(%arg0: i32, %arg1: i32, %arg2: memref<1x1x10x34x4xbf16, #tpu.memory_space<vmem>>, %arg3: memref<36x4xbf16, #tpu.memory_space<vmem>>, %arg4: memref<1x4xf32, #tpu.memory_space<vmem>>, %arg5: memref<1x8x32x4xf32, #tpu.memory_space<vmem>>, %arg6: memref<1x1x2x4xf32, #tpu.memory_space<vmem>>) attributes {dimension_semantics = [#tpu.dimension_semantics<parallel>, #tpu.dimension_semantics<parallel>], iteration_bounds = array<i64: 2, 4>, scalar_prefetch = 0 : i64, scratch_operands = 0 : i64, tpu.core_type = #tpu.core_type<tc>, window_params = [{transform_indices = @transform_0, window_bounds = array<i64: 1, 1, 10, 34, 4>}, {pipeline_mode = #tpu.pipeline_mode<synchronous>, transform_indices = @transform_1, window_bounds = array<i64: 36, 4>}, {pipeline_mode = #tpu.pipeline_mode<synchronous>, transform_indices = @transform_2, window_bounds = array<i64: 1, 4>}, {transform_indices = @transform_3, window_bounds = array<i64: 1, 8, 32, 4>}, {transform_indices = @transform_4, window_bounds = array<i64: 1, 1, 2, 4>}]} {
    %c0 = arith.constant 0 : index
    %c0_0 = arith.constant 0 : index
    %c0_1 = arith.constant 0 : index
    %c0_2 = arith.constant 0 : index
    %c0_3 = arith.constant 0 : index
    %0 = vector.load %arg2[%c0, %c0_0, %c0_1, %c0_2, %c0_3] : memref<1x1x10x34x4xbf16, #tpu.memory_space<vmem>>, vector<1x1x10x34x4xbf16>
    %1 = vector.shape_cast %0 : vector<1x1x10x34x4xbf16> to vector<10x34x4xbf16>
    %2 = vector.extract_strided_slice %1 {offsets = [0, 0, 0], sizes = [8, 32, 4], strides = [1, 1, 1]} : vector<10x34x4xbf16> to vector<8x32x4xbf16>
    %3 = vector.extract_strided_slice %1 {offsets = [0, 1, 0], sizes = [8, 32, 4], strides = [1, 1, 1]} : vector<10x34x4xbf16> to vector<8x32x4xbf16>
    %4 = vector.extract_strided_slice %1 {offsets = [0, 2, 0], sizes = [8, 32, 4], strides = [1, 1, 1]} : vector<10x34x4xbf16> to vector<8x32x4xbf16>
    %5 = vector.extract_strided_slice %1 {offsets = [1, 0, 0], sizes = [8, 32, 4], strides = [1, 1, 1]} : vector<10x34x4xbf16> to vector<8x32x4xbf16>
    %6 = vector.extract_strided_slice %1 {offsets = [1, 1, 0], sizes = [8, 32, 4], strides = [1, 1, 1]} : vector<10x34x4xbf16> to vector<8x32x4xbf16>
    %7 = vector.extract_strided_slice %1 {offsets = [1, 2, 0], sizes = [8, 32, 4], strides = [1, 1, 1]} : vector<10x34x4xbf16> to vector<8x32x4xbf16>
    %8 = vector.extract_strided_slice %1 {offsets = [2, 0, 0], sizes = [8, 32, 4], strides = [1, 1, 1]} : vector<10x34x4xbf16> to vector<8x32x4xbf16>
    %9 = vector.extract_strided_slice %1 {offsets = [2, 1, 0], sizes = [8, 32, 4], strides = [1, 1, 1]} : vector<10x34x4xbf16> to vector<8x32x4xbf16>
    %10 = vector.extract_strided_slice %1 {offsets = [2, 2, 0], sizes = [8, 32, 4], strides = [1, 1, 1]} : vector<10x34x4xbf16> to vector<8x32x4xbf16>
    %11 = tpu.concatenate %2, %3, %4, %5, %6, %7, %8, %9, %10 in 2 : vector<8x32x4xbf16>, vector<8x32x4xbf16>, vector<8x32x4xbf16>, vector<8x32x4xbf16>, vector<8x32x4xbf16>, vector<8x32x4xbf16>, vector<8x32x4xbf16>, vector<8x32x4xbf16>, vector<8x32x4xbf16> -> vector<8x32x36xbf16>
    %12 = vector.shape_cast %11 : vector<8x32x36xbf16> to vector<256x36xbf16>
    %c0_4 = arith.constant 0 : index
    %c0_5 = arith.constant 0 : index
    %13 = vector.load %arg3[%c0_4, %c0_5] : memref<36x4xbf16, #tpu.memory_space<vmem>>, vector<36x4xbf16>
    %cst = arith.constant dense<0.000000e+00> : vector<256x4xf32>
    %14 = tpu.matmul %12, %13, %cst {dimension_numbers = #tpu.dot_dimension_numbers<[1], [0], [0], [1], [0, 0, 1, 1], [], []>} : vector<256x36xbf16>, vector<36x4xbf16>, vector<256x4xf32> -> vector<256x4xf32>
    %c0_6 = arith.constant 0 : index
    %c0_7 = arith.constant 0 : index
    %15 = vector.load %arg4[%c0_6, %c0_7] : memref<1x4xf32, #tpu.memory_space<vmem>>, vector<1x4xf32>
    %16 = vector.broadcast %15 : vector<1x4xf32> to vector<256x4xf32>
    %17 = arith.addf %14, %16 : vector<256x4xf32>
    %cst_8 = arith.constant dense<0.000000e+00> : vector<4xf32>
    %18 = vector.multi_reduction <add>, %17, %cst_8 [0] : vector<256x4xf32> to vector<4xf32>
    %19 = vector.shape_cast %18 : vector<4xf32> to vector<1x4xf32>
    %20 = arith.mulf %17, %17 : vector<256x4xf32>
    %cst_9 = arith.constant dense<0.000000e+00> : vector<4xf32>
    %21 = vector.multi_reduction <add>, %20, %cst_9 [0] : vector<256x4xf32> to vector<4xf32>
    %22 = vector.shape_cast %21 : vector<4xf32> to vector<1x4xf32>
    %23 = tpu.concatenate %19, %22 in 0 : vector<1x4xf32>, vector<1x4xf32> -> vector<2x4xf32>
    %c0_10 = arith.constant 0 : index
    %c0_11 = arith.constant 0 : index
    %c0_12 = arith.constant 0 : index
    %c0_13 = arith.constant 0 : index
    %24 = vector.load %arg6[%c0_10, %c0_11, %c0_12, %c0_13] : memref<1x1x2x4xf32, #tpu.memory_space<vmem>>, vector<1x1x2x4xf32>
    %25 = vector.shape_cast %24 : vector<1x1x2x4xf32> to vector<2x4xf32>
    %26 = vector.shape_cast %23 : vector<2x4xf32> to vector<1x1x2x4xf32>
    tpu.vector_store %arg6[%c0_10, %c0_11, %c0_12, %c0_13], %26 {strides = array<i32>} : memref<1x1x2x4xf32, #tpu.memory_space<vmem>>, vector<1x1x2x4xf32>,
    %27 = vector.shape_cast %17 : vector<256x4xf32> to vector<8x32x4xf32>
    %c0_14 = arith.constant 0 : index
    %c0_15 = arith.constant 0 : index
    %c0_16 = arith.constant 0 : index
    %c0_17 = arith.constant 0 : index
    %28 = vector.load %arg5[%c0_14, %c0_15, %c0_16, %c0_17] : memref<1x8x32x4xf32, #tpu.memory_space<vmem>>, vector<1x8x32x4xf32>
    %29 = vector.shape_cast %28 : vector<1x8x32x4xf32> to vector<8x32x4xf32>
    %30 = vector.shape_cast %27 : vector<8x32x4xf32> to vector<1x8x32x4xf32>
    tpu.vector_store %arg5[%c0_14, %c0_15, %c0_16, %c0_17], %30 {strides = array<i32>} : memref<1x8x32x4xf32, #tpu.memory_space<vmem>>, vector<1x8x32x4xf32>,
    return
  }
  func.func @transform_0(%arg0: i32, %arg1: i32) -> (i32, i32, i32, i32, i32) {
    %c0_i32 = arith.constant 0 : i32
    %c0_i32_0 = arith.constant 0 : i32
    %c0_i32_1 = arith.constant 0 : i32
    %c0_i32_2 = arith.constant 0 : i32
    return %arg0, %arg1, %c0_i32, %c0_i32_0, %c0_i32_1 : i32, i32, i32, i32, i32
  }
  func.func @transform_1(%arg0: i32, %arg1: i32) -> (i32, i32) {
    %c0_i32 = arith.constant 0 : i32
    %c0_i32_0 = arith.constant 0 : i32
    %c0_i32_1 = arith.constant 0 : i32
    return %c0_i32, %c0_i32_0 : i32, i32
  }
  func.func @transform_2(%arg0: i32, %arg1: i32) -> (i32, i32) {
    %c0_i32 = arith.constant 0 : i32
    %c0_i32_0 = arith.constant 0 : i32
    %c0_i32_1 = arith.constant 0 : i32
    return %c0_i32, %c0_i32_0 : i32, i32
  }
  func.func @transform_3(%arg0: i32, %arg1: i32) -> (i32, i32, i32, i32) {
    %c0_i32 = arith.constant 0 : i32
    %c0_i32_0 = arith.constant 0 : i32
    %c0_i32_1 = arith.constant 0 : i32
    return %arg0, %arg1, %c0_i32, %c0_i32_0 : i32, i32, i32, i32
  }
  func.func @transform_4(%arg0: i32, %arg1: i32) -> (i32, i32, i32, i32) {
    %c0_i32 = arith.constant 0 : i32
    %c0_i32_0 = arith.constant 0 : i32
    %c0_i32_1 = arith.constant 0 : i32
    return %arg0, %arg1, %c0_i32, %c0_i32_0 : i32, i32, i32, i32
  }
}

</mosaic_0001>

<bundles_post_ra>
// kernel: tile.28
= control target key start
LH: loop header
LB: loop body
LE: loop exit
PB: predicated region body
PF: predicated region fallthrough
CT: control target
= control target key end

     0   :  { %s22_s0 = inlined_call_operand.vmem [shape: f32[4], index: 0, kind: input, shape index: {}]   ;;  %s23_s1 = inlined_call_operand.vmem [shape: f32[4,4], index: 1, kind: output, shape index: {}]  }
   0x1   :  { %v4_v0 = vld [vmem:[%s22_s0] ss:$0 sm:$0xff] }
   0x2   :  { %5 = vst [vmem:[%s23_s1] sm:$0xf] %v4_v0 }

// kernel: tile.29
= control target key start
LH: loop header
LB: loop body
LE: loop exit
PB: predicated region body
PF: predicated region fallthrough
CT: control target
= control target key end

     0   :  { %s37_s8 = smov 4   ;;  %s38_s9 = smov 8   ;;  %vm7_vm0 = vcmask 31744   ;;  %vm13_vm1 = vcmask 130144   ;;  %vm19_vm2 = vcmask 97344   ;;  %vm25_vm3 = vcmask 64544   ;;  %s55_s0 = inlined_call_operand.vmem [shape: f32[4,4], index: 0, kind: input, shape index: {}]   ;;  %s56_s1 = inlined_call_operand.vmem [shape: f32[1,16], index: 1, kind: output, shape index: {}]  }
   0x1   :  { %v4_v0 = vld [vmem:[%s55_s0] sm:$0xf]  ;;  %s36_s0 = smov 12  }
   0x2   :  { %5 = vst [vmem:[#allocation1] sm:$0xf] %v4_v0 }
   0x9   :  { %v10_v1 = vld [vmem:[#allocation1 + $0x3] sm:$0x1]   ;;  %v22_v2 = vld [vmem:[#allocation1 + $0x1] sm:$0x1]   ;;  %v16_v3 = vld [vmem:[#allocation1 + $0x2] sm:$0x1]  }
   0xa   :  { %11 = vrot.lane.b32.xlu0 %v10_v1, %s36_s0  ;;  %23 = vrot.lane.b32.xlu1 %v22_v2, %s37_s8  ;;  %v6_v4 = vld [vmem:[#allocation1] sm:$0x1]  }
   0xb   :  { %8 = vst.msk [vmem:[#allocation0] sm:$0x1] %vm7_vm0, %v6_v4  }
  0x12   :  { %17 = vrot.lane.b32.xlu0 %v16_v3, %s38_s9 }
  0x7c   :  { %v12_v5 = vpop.permute.xlu0 %11   ;;  %v24_v6 = vpop.permute.xlu1 %23  }
  0x7d   :  { %14 = vst.msk [vmem:[#allocation0] sm:$0x1] %vm13_vm1, %v12_v5  }
  0x84   :  { %v18_v7 = vpop.permute.xlu0 %17  }
  0x85   :  { %20 = vst.msk [vmem:[#allocation0] sm:$0x1] %vm19_vm2, %v18_v7  }
  0x86   :  { %26 = vst.msk [vmem:[#allocation0] sm:$0x1] %vm25_vm3, %v24_v6  }
  0x8d   :  { %v29_v8 = vld [vmem:[#allocation0] sm:$0x1] }
  0x8e   :  { %32 = vst [vmem:[%s56_s1] sm:$0x1] %v29_v8 }

// kernel: up_forward.5
= control target key start
LH: loop header
LB: loop body
LE: loop exit
PB: predicated region body
PF: predicated region fallthrough
CT: control target
= control target key end

     0   :  { %s654_s12 = smov 0   ;;  %s656_s13 = smov 0   ;;  %s753_s0 = inlined_call_operand.vmem [shape: bf16[2,16,16,8], index: 0, kind: input, shape index: {}]   ;;  %s754_s1 = inlined_call_operand.vmem [shape: bf16[8,16], index: 1, kind: input, shape index: {}]   ;;  %s755_s2 = inlined_call_operand.vmem [shape: f32[1,16], index: 2, kind: input, shape index: {}]   ;;  %s756_s3 = inlined_call_operand.vmem [shape: bf16[2,16,16,16], index: 3, kind: output, shape index: {}]  }
   0x1   :  { %s658_s14 = smov 0   ;;  %s660_s15 = smov 0  }
   0x2   :  { %s662_s16 = smov 0  }
   0x3 LB: > { %s22_s17 = sadd.s32 1, %s624_s14  ;;  %s25_s18 = sadd.s32 1, %s628_s15  ;;  %s632_s16 = sphi %s662_s16, %s13_s16   ;;  %s628_s15 = sphi %s660_s15, %s760_s15   ;;  %s624_s14 = sphi %s658_s14, %s759_s14   ;;  %s620_s13 = sphi %s656_s13, %s758_s13   ;;  %s616_s12 = sphi %s654_s12, %s757_s12  }
   0x4   : > { %p23_p0 = scmp.ge.s32.totalorder %s22_s17, 2  ;;  %p491_p1 = scmp.ge.s32.totalorder %s632_s16, 1 }
   0x5   : > { %p159_p2 = scmp.lt.s32.totalorder %s632_s16, 5 }
   0x6   : > { %s762_s17 = smov (%p23_p0, %s22_s17), 0  ;;  %s764_s18 = smov (!%p23_p0, %s25_s18), %s628_s15 }
   0x7   : > { %p160_p3 = pnand %p491_p1, %p159_p2  ;;  %p27_p4 = scmp.ge.s32.totalorder %s764_s18, 2 }
   0x8   : > { %s492_s21 = sshll.u32 (!%p160_p3), %s616_s12, 3  ;;  %p194_p5 = scmp.lt.s32.totalorder (!%p160_p3), %s620_s13, 1 }
   0x9   : > { %s766_s18 = smov (%p27_p4, %s764_s18), 0  ;;  %163 = sbr.rel (%p160_p3) target bundleno = 183 (0xb7), region = 32 }
   0xa   : > { %p196_p6 = scmp.lt.s32.totalorder (!%p160_p3), %s492_s21, 15 }
   0xe   : > { %v232_v0 = vld [vmem:[%s754_s1] sm:$0xf]  ;;  %vm302_vm0 = vcmask 1043456   ;;  %s768_s13 = smov (!%p194_p5, %s620_s13), 1  ;;  %s770_s21 = smov (!%p196_p6, %s492_s21), 15  ;;  %vm277_vm1 = vcmask 64512  }
   0xf   : > { %v304_v1 = vsel %vm302_vm0, %v232_v0, 0  ;;  %s494_s22 = sshll.u32 %s768_s13, 5  ;;  %s493_s23 = sshll.u32 %s770_s21, 1  ;;  %v593_v10 = vld [vmem:[%s755_s2] ss:$0 sm:$0xff]  ;;  %vm371_vm2 = vcmask 125952  }
  0x10   : > { %313 = vmatpush.bf16.msra.mxu0 %v304_v1  ;;  %550 = vmatpush.bf16.msra.mxu1 %v304_v1  ;;  %s200_s24 = sadd.s32 %s494_s22, %s493_s23 }
  0x11   : > { %551 = vmatpush.bf16.msra.mxu2 %v304_v1  ;;  %552 = vmatpush.bf16.msra.mxu3 %v304_v1  ;;  %s495_s25 = sshll.u32 %s200_s24, 2 }
  0x12   : > { %s202_s28 = scalar_lea.vmem %s753_s0, %s495_s25  ;;  %s704_s6 = scalar_lea.vmem %s756_s3, %s495_s25 }
  0x13   : > { %v542_v2 = vld [vmem:[%s202_s28] sm:$0xff]  ;;  %v544_v3 = vld [vmem:[%s202_s28 + $0x10] sm:$0xff]  ;;  %v543_v6 = vld [vmem:[%s202_s28 + $0x8] sm:$0xff] }
  0x14   : > { %v546_v4 = vld [vmem:[%s202_s28 + $0x20] sm:$0xff]  ;;  %v548_v5 = vld [vmem:[%s202_s28 + $0x30] sm:$0xff]  ;;  %532 = vmatmul.msk.bf16.vlgmr.msra.gmra.mxu0 %vm277_vm1, %v542_v2  ;;  %534 = vmatmul.msk.bf16.vlgmr.msra.gmra.mxu1 %vm277_vm1, %v544_v3  ;;  %v545_v7 = vld [vmem:[%s202_s28 + $0x18] sm:$0xff] }
  0x15   : > { %536 = vmatmul.msk.bf16.vlgmr.msra.gmra.mxu2 %vm277_vm1, %v546_v4  ;;  %538 = vmatmul.msk.bf16.vlgmr.msra.gmra.mxu3 %vm277_vm1, %v548_v5  ;;  %v547_v8 = vld [vmem:[%s202_s28 + $0x28] sm:$0xff]  ;;  %v549_v9 = vld [vmem:[%s202_s28 + $0x38] sm:$0xff] }
  0x24   : > { %533 = vmatmul.msk.bf16.gmra.mxu0 %vm277_vm1, %v543_v6  ;;  %535 = vmatmul.msk.bf16.gmra.mxu1 %vm277_vm1, %v545_v7 }
  0x25   : > { %537 = vmatmul.msk.bf16.gmra.mxu2 %vm277_vm1, %v547_v8  ;;  %539 = vmatmul.msk.bf16.gmra.mxu3 %vm277_vm1, %v549_v9 }
  0x91   : > { %v315_v11 = vpop.f32.mrf.mxu0  ;;  %v325_v12 = vpop.f32.mrf.mxu1 }
  0x92   : > { %v316_v13 = vadd.f32 %v593_v10, %v315_v11  ;;  %v326_v14 = vadd.f32 %v593_v10, %v325_v12 }
  0x94   : > { %v355_v15 = vpack.c.bf16 %v316_v13, %v316_v13  ;;  %v359_v16 = vpack.c.bf16 %v326_v14, %v326_v14 }
  0x96   : > { %372 = vst.msk [vmem:[%s704_s6] sm:$0xf] %vm371_vm2, %v355_v15 }
  0x97   : > { %376 = vst.msk [vmem:[%s704_s6 + $0x10] sm:$0xf] %vm371_vm2, %v359_v16 }
  0x98   : > { %v335_v17 = vpop.f32.mrf.mxu2  ;;  %v345_v18 = vpop.f32.mrf.mxu3 }
  0x99   : > { %v336_v19 = vadd.f32 %v593_v10, %v335_v17  ;;  %v346_v20 = vadd.f32 %v593_v10, %v345_v18  ;;  %v317_v21 = vpop.f32.mrf.mxu0  ;;  %v327_v22 = vpop.f32.mrf.mxu1 }
  0x9a   : > { %v318_v23 = vadd.f32 %v593_v10, %v317_v21  ;;  %v328_v24 = vadd.f32 %v593_v10, %v327_v22 }
  0x9b   : > { %v363_v25 = vpack.c.bf16 %v336_v19, %v336_v19  ;;  %v367_v26 = vpack.c.bf16 %v346_v20, %v346_v20 }
  0x9c   : > { %v356_v27 = vpack.c.bf16 %v318_v23, %v318_v23  ;;  %v360_v28 = vpack.c.bf16 %v328_v24, %v328_v24 }
  0x9d   : > { %380 = vst.msk [vmem:[%s704_s6 + $0x20] sm:$0xf] %vm371_vm2, %v363_v25 }
  0x9e   : > { %384 = vst.msk [vmem:[%s704_s6 + $0x30] sm:$0xf] %vm371_vm2, %v367_v26 }
  0x9f   : > { %373 = vst.msk [vmem:[%s704_s6 + $0x4] sm:$0xf] %vm371_vm2, %v356_v27 }
  0xa0   : > { %377 = vst.msk [vmem:[%s704_s6 + $0x14] sm:$0xf] %vm371_vm2, %v360_v28  ;;  %v337_v29 = vpop.f32.mrf.mxu2  ;;  %v347_v30 = vpop.f32.mrf.mxu3 }
  0xa1   : > { %v338_v31 = vadd.f32 %v593_v10, %v337_v29  ;;  %v348_v32 = vadd.f32 %v593_v10, %v347_v30  ;;  %v320_v33 = vpop.f32.mrf.mxu0  ;;  %v330_v34 = vpop.f32.mrf.mxu1 }
  0xa2   : > { %v321_v35 = vadd.f32 %v593_v10, %v320_v33  ;;  %v331_v36 = vadd.f32 %v593_v10, %v330_v34 }
  0xa3   : > { %v364_v37 = vpack.c.bf16 %v338_v31, %v338_v31  ;;  %v368_v38 = vpack.c.bf16 %v348_v32, %v348_v32 }
  0xa4   : > { %v357_v39 = vpack.c.bf16 %v321_v35, %v321_v35  ;;  %v361_v40 = vpack.c.bf16 %v331_v36, %v331_v36 }
  0xa5   : > { %381 = vst.msk [vmem:[%s704_s6 + $0x24] sm:$0xf] %vm371_vm2, %v364_v37 }
  0xa6   : > { %385 = vst.msk [vmem:[%s704_s6 + $0x34] sm:$0xf] %vm371_vm2, %v368_v38 }
  0xa7   : > { %374 = vst.msk [vmem:[%s704_s6 + $0x8] sm:$0xf] %vm371_vm2, %v357_v39 }
  0xa8   : > { %378 = vst.msk [vmem:[%s704_s6 + $0x18] sm:$0xf] %vm371_vm2, %v361_v40  ;;  %v340_v41 = vpop.f32.mrf.mxu2  ;;  %v350_v42 = vpop.f32.mrf.mxu3 }
  0xa9   : > { %v341_v43 = vadd.f32 %v593_v10, %v340_v41  ;;  %v351_v44 = vadd.f32 %v593_v10, %v350_v42  ;;  %v322_v45 = vpop.f32.mrf.mxu0  ;;  %v332_v46 = vpop.f32.mrf.mxu1 }
  0xaa   : > { %v323_v47 = vadd.f32 %v593_v10, %v322_v45  ;;  %v333_v48 = vadd.f32 %v593_v10, %v332_v46 }
  0xab   : > { %v365_v49 = vpack.c.bf16 %v341_v43, %v341_v43  ;;  %v369_v50 = vpack.c.bf16 %v351_v44, %v351_v44 }
  0xac   : > { %v358_v51 = vpack.c.bf16 %v323_v47, %v323_v47  ;;  %v362_v52 = vpack.c.bf16 %v333_v48, %v333_v48 }
  0xad   : > { %382 = vst.msk [vmem:[%s704_s6 + $0x28] sm:$0xf] %vm371_vm2, %v365_v49 }
  0xae   : > { %386 = vst.msk [vmem:[%s704_s6 + $0x38] sm:$0xf] %vm371_vm2, %v369_v50 }
  0xaf   : > { %375 = vst.msk [vmem:[%s704_s6 + $0xc] sm:$0xf] %vm371_vm2, %v358_v51 }
  0xb0   : > { %379 = vst.msk [vmem:[%s704_s6 + $0x1c] sm:$0xf] %vm371_vm2, %v362_v52  ;;  %v342_v53 = vpop.f32.mrf.mxu2  ;;  %v352_v54 = vpop.f32.mrf.mxu3 }
  0xb1   : > { %v343_v55 = vadd.f32 %v593_v10, %v342_v53  ;;  %v353_v56 = vadd.f32 %v593_v10, %v352_v54 }
  0xb3   : > { %v366_v57 = vpack.c.bf16 %v343_v55, %v343_v55  ;;  %v370_v58 = vpack.c.bf16 %v353_v56, %v353_v56 }
  0xb5   : > { %383 = vst.msk [vmem:[%s704_s6 + $0x2c] sm:$0xf] %vm371_vm2, %v366_v57 }
  0xb6   : > { %387 = vst.msk [vmem:[%s704_s6 + $0x3c] sm:$0xf] %vm371_vm2, %v370_v58 }
  0xb7 PF: > { %s13_s16 = sadd.s32 1, %s632_s16   ;;  %s757_s12 = smov %s624_s14 }
  0xb8   : > { %p10_p7 = scmp.ge.s32.totalorder %s13_s16, 6   ;;  %s758_s13 = smov %s628_s15 }
  0xb9   : > { %s759_s14 = smov %s762_s17  ;;  %s760_s15 = smov %s766_s18 }
  0xba   :  { %12 = sbr.rel (!%p10_p7) target bundleno = 3 (0x3), region = 62 }

// kernel: tile.33
= control target key start
LH: loop header
LB: loop body
LE: loop exit
PB: predicated region body
PF: predicated region fallthrough
CT: control target
= control target key end

     0   :  { %s40_s0 = inlined_call_operand.vmem [shape: f32[4], index: 0, kind: input, shape index: {}]   ;;  %s41_s1 = inlined_call_operand.vmem [shape: f32[32,4], index: 1, kind: output, shape index: {}]  }
   0x1   :  { %v4_v0 = vld [vmem:[%s40_s0] ss:$0 sm:$0xff] }
   0x2   :  { %5 = vst [vmem:[%s41_s1] sm:$0xff] %v4_v0 }
   0x3   :  { %12 = vst [vmem:[%s41_s1 + $0x8] sm:$0xff] %v4_v0 }
   0x4   :  { %13 = vst [vmem:[%s41_s1 + $0x10] sm:$0xff] %v4_v0 }
   0x5   :  { %14 = vst [vmem:[%s41_s1 + $0x18] sm:$0xff] %v4_v0 }

// kernel: tile.34
= control target key start
LH: loop header
LB: loop body
LE: loop exit
PB: predicated region body
PF: predicated region fallthrough
CT: control target
= control target key end

     0   :  { %s259_s10 = smov 124   ;;  %s260_s11 = smov 116   ;;  %vm3_vm0 = vcmask 31744   ;;  %vm9_vm1 = vcmask 1048544   ;;  %vm15_vm2 = vcmask 1015744   ;;  %vm21_vm3 = vcmask 982944   ;;  %s399_s0 = inlined_call_operand.vmem [shape: f32[32,4], index: 0, kind: input, shape index: {}]   ;;  %s400_s1 = inlined_call_operand.vmem [shape: f32[1,128], index: 1, kind: output, shape index: {}]  }
   0x1   :  { %v197_v0 = vld [vmem:[%s399_s0 + $0x1f] sm:$0x1]   ;;  %v199_v1 = vld [vmem:[%s399_s0 + $0x1d] sm:$0x1]   ;;  %v201_v2 = vld [vmem:[%s399_s0 + $0x1b] sm:$0x1]  }
   0x2   :  { %7 = vrot.lane.b32.xlu0 %v197_v0, %s259_s10  ;;  %19 = vrot.lane.b32.xlu1 %v199_v1, %s260_s11  ;;  %s261_s14 = smov 108   ;;  %v198_v3 = vld [vmem:[%s399_s0 + $0x1e] sm:$0x1]   ;;  %v200_v4 = vld [vmem:[%s399_s0 + $0x1c] sm:$0x1]   ;;  %s262_s19 = smov 120  }
   0x3   :  { %31 = vrot.lane.b32.xlu2 %v201_v2, %s261_s14  ;;  %s263_s20 = smov 112   ;;  %v202_v5 = vld [vmem:[%s399_s0 + $0x1a] sm:$0x1]   ;;  %s264_s23 = smov 104   ;;  %v203_v6 = vld [vmem:[%s399_s0 + $0x19] sm:$0x1]  }
   0x4   :  { %v204_v7 = vld [vmem:[%s399_s0 + $0x18] sm:$0x1]   ;;  %s265_s28 = smov 100   ;;  %s266_s29 = smov 96   ;;  %v205_v8 = vld [vmem:[%s399_s0 + $0x17] sm:$0x1]  }
   0x5   :  { %s267_s3 = smov 92   ;;  %v206_v9 = vld [vmem:[%s399_s0 + $0x16] sm:$0x1]   ;;  %v207_v10 = vld [vmem:[%s399_s0 + $0x15] sm:$0x1]   ;;  %s268_s8 = smov 88  }
   0x6   :  { %s269_s9 = smov 84   ;;  %v208_v11 = vld [vmem:[%s399_s0 + $0x14] sm:$0x1]   ;;  %s270_s12 = smov 80   ;;  %v209_v12 = vld [vmem:[%s399_s0 + $0x13] sm:$0x1]  }
   0x7   :  { %v210_v13 = vld [vmem:[%s399_s0 + $0x12] sm:$0x1]   ;;  %s271_s17 = smov 76   ;;  %s272_s18 = smov 72   ;;  %v211_v14 = vld [vmem:[%s399_s0 + $0x11] sm:$0x1]  }
   0x8   :  { %s273_s21 = smov 68   ;;  %v212_v15 = vld [vmem:[%s399_s0 + $0x10] sm:$0x1]   ;;  %v213_v16 = vld [vmem:[%s399_s0 + $0xf] sm:$0x1]   ;;  %s274_s26 = smov 64  }
   0x9   :  { %s275_s27 = smov 60   ;;  %v214_v17 = vld [vmem:[%s399_s0 + $0xe] sm:$0x1]   ;;  %s276_s30 = smov 56   ;;  %v215_v18 = vld [vmem:[%s399_s0 + $0xd] sm:$0x1]  }
   0xa   :  { %13 = vrot.lane.b32.xlu0 %v198_v3, %s262_s19  ;;  %25 = vrot.lane.b32.xlu1 %v200_v4, %s263_s20  ;;  %v216_v19 = vld [vmem:[%s399_s0 + $0xc] sm:$0x1]   ;;  %s277_s6 = smov 52   ;;  %s278_s7 = smov 48   ;;  %v217_v20 = vld [vmem:[%s399_s0 + $0xb] sm:$0x1]  }
   0xb   :  { %37 = vrot.lane.b32.xlu2 %v202_v5, %s264_s23  ;;  %s279_s10 = smov 44   ;;  %v218_v21 = vld [vmem:[%s399_s0 + $0xa] sm:$0x1]   ;;  %v219_v22 = vld [vmem:[%s399_s0 + $0x9] sm:$0x1]   ;;  %s280_s15 = smov 40  }
   0xc   :  { %s281_s16 = smov 36   ;;  %v220_v23 = vld [vmem:[%s399_s0 + $0x8] sm:$0x1]   ;;  %s282_s19 = smov 32   ;;  %v221_v24 = vld [vmem:[%s399_s0 + $0x7] sm:$0x1]  }
   0xd   :  { %v222_v25 = vld [vmem:[%s399_s0 + $0x6] sm:$0x1]   ;;  %s283_s24 = smov 28   ;;  %s284_s25 = smov 24   ;;  %v223_v26 = vld [vmem:[%s399_s0 + $0x5] sm:$0x1]  }
   0xe   :  { %v224_v27 = vld [vmem:[%s399_s0 + $0x4] sm:$0x1]   ;;  %v225_v28 = vld [vmem:[%s399_s0 + $0x3] sm:$0x1]   ;;  %s286_s4 = smov 16   ;;  %s287_s5 = smov 12  }
   0xf   :  { %v226_v29 = vld [vmem:[%s399_s0 + $0x2] sm:$0x1]   ;;  %v227_v30 = vld [vmem:[%s399_s0 + $0x1] sm:$0x1]   ;;  %s289_s11 = smov 4   ;;  %vm27_vm4 = vcmask 950144  }
  0x10   :  { %v2_v31 = vld [vmem:[%s399_s0] sm:$0x1]   ;;  %vm33_vm5 = vcmask 917344   ;;  %vm39_vm6 = vcmask 884544   ;;  %vm45_vm7 = vcmask 851744   ;;  %vm51_vm8 = vcmask 818944  }
  0x11   :  { %4 = vst.msk [vmem:[#allocation0] sm:$0x1] %vm3_vm0, %v2_v31   ;;  %vm57_vm9 = vcmask 786144   ;;  %vm63_vm10 = vcmask 753344   ;;  %vm69_vm11 = vcmask 720544   ;;  %vm75_vm12 = vcmask 687744  }
  0x12   :  { %43 = vrot.lane.b32.xlu0 %v203_v6, %s265_s28  ;;  %49 = vrot.lane.b32.xlu1 %v204_v7, %s266_s29  ;;  %s285_s28 = smov 20   ;;  %vm81_vm13 = vcmask 654944   ;;  %vm87_vm14 = vcmask 622144   ;;  %vm93_vm15 = vcmask 589344   ;;  %vm99_vm0 = vcmask 556544  }
  0x13   :  { %55 = vrot.lane.b32.xlu2 %v205_v8, %s267_s3 }
  0x1a   :  { %61 = vrot.lane.b32.xlu0 %v206_v9, %s268_s8  ;;  %67 = vrot.lane.b32.xlu1 %v207_v10, %s269_s9  ;;  %s288_s8 = smov 8  }
  0x1b   :  { %73 = vrot.lane.b32.xlu2 %v208_v11, %s270_s12 }
  0x22   :  { %79 = vrot.lane.b32.xlu0 %v209_v12, %s271_s17  ;;  %85 = vrot.lane.b32.xlu1 %v210_v13, %s272_s18 }
  0x23   :  { %91 = vrot.lane.b32.xlu2 %v211_v14, %s273_s21 }
  0x2a   :  { %97 = vrot.lane.b32.xlu0 %v212_v15, %s274_s26  ;;  %103 = vrot.lane.b32.xlu1 %v213_v16, %s275_s27 }
  0x2b   :  { %109 = vrot.lane.b32.xlu2 %v214_v17, %s276_s30 }
  0x32   :  { %115 = vrot.lane.b32.xlu0 %v215_v18, %s277_s6  ;;  %121 = vrot.lane.b32.xlu1 %v216_v19, %s278_s7 }
  0x33   :  { %127 = vrot.lane.b32.xlu2 %v217_v20, %s279_s10 }
  0x3a   :  { %133 = vrot.lane.b32.xlu0 %v218_v21, %s280_s15  ;;  %139 = vrot.lane.b32.xlu1 %v219_v22, %s281_s16 }
  0x3b   :  { %145 = vrot.lane.b32.xlu2 %v220_v23, %s282_s19 }
  0x42   :  { %151 = vrot.lane.b32.xlu0 %v221_v24, %s283_s24  ;;  %157 = vrot.lane.b32.xlu1 %v222_v25, %s284_s25 }
  0x43   :  { %163 = vrot.lane.b32.xlu2 %v223_v26, %s285_s28 }
  0x4a   :  { %169 = vrot.lane.b32.xlu0 %v224_v27, %s286_s4  ;;  %175 = vrot.lane.b32.xlu1 %v225_v28, %s287_s5 }
  0x4b   :  { %181 = vrot.lane.b32.xlu2 %v226_v29, %s288_s8 }
  0x52   :  { %187 = vrot.lane.b32.xlu0 %v227_v30, %s289_s11 }
  0x5d   :  { %v32_v32 = vpop.permute.xlu2 %31  }
  0x65   :  { %v38_v33 = vpop.permute.xlu2 %37  }
  0x6d   :  { %v56_v34 = vpop.permute.xlu2 %55  }
  0x74   :  { %v8_v35 = vpop.permute.xlu0 %7   ;;  %v20_v36 = vpop.permute.xlu1 %19  }
  0x75   :  { %10 = vst.msk [vmem:[#allocation0] sm:$0x1] %vm9_vm1, %v8_v35   ;;  %v74_v37 = vpop.permute.xlu2 %73   ;;  %vm105_vm1 = vcmask 523744  }
  0x7c   :  { %v14_v38 = vpop.permute.xlu0 %13   ;;  %v26_v39 = vpop.permute.xlu1 %25  }
  0x7d   :  { %16 = vst.msk [vmem:[#allocation0] sm:$0x1] %vm15_vm2, %v14_v38   ;;  %v92_v40 = vpop.permute.xlu2 %91   ;;  %vm111_vm2 = vcmask 490944  }
  0x7e   :  { %22 = vst.msk [vmem:[#allocation0] sm:$0x1] %vm21_vm3, %v20_v36   ;;  %vm117_vm3 = vcmask 458144  }
  0x7f   :  { %28 = vst.msk [vmem:[#allocation0] sm:$0x1] %vm27_vm4, %v26_v39   ;;  %vm123_vm4 = vcmask 425344  }
  0x80   :  { %34 = vst.msk [vmem:[#allocation0] sm:$0x1] %vm33_vm5, %v32_v32   ;;  %vm129_vm5 = vcmask 392544  }
  0x81   :  { %40 = vst.msk [vmem:[#allocation0] sm:$0x1] %vm39_vm6, %v38_v33   ;;  %vm135_vm6 = vcmask 359744  }
  0x84   :  { %v44_v41 = vpop.permute.xlu0 %43   ;;  %v50_v42 = vpop.permute.xlu1 %49  }
  0x85   :  { %46 = vst.msk [vmem:[#allocation0] sm:$0x1] %vm45_vm7, %v44_v41   ;;  %v110_v43 = vpop.permute.xlu2 %109   ;;  %vm141_vm7 = vcmask 326944  }
  0x86   :  { %52 = vst.msk [vmem:[#allocation0] sm:$0x1] %vm51_vm8, %v50_v42   ;;  %vm147_vm8 = vcmask 294144  }
  0x87   :  { %58 = vst.msk [vmem:[#allocation0] sm:$0x1] %vm57_vm9, %v56_v34   ;;  %vm153_vm9 = vcmask 261344  }
  0x8c   :  { %v62_v44 = vpop.permute.xlu0 %61   ;;  %v68_v45 = vpop.permute.xlu1 %67  }
  0x8d   :  { %64 = vst.msk [vmem:[#allocation0] sm:$0x1] %vm63_vm10, %v62_v44   ;;  %v128_v46 = vpop.permute.xlu2 %127   ;;  %vm159_vm10 = vcmask 228544  }
  0x8e   :  { %70 = vst.msk [vmem:[#allocation0] sm:$0x1] %vm69_vm11, %v68_v45   ;;  %vm165_vm11 = vcmask 195744  }
  0x8f   :  { %76 = vst.msk [vmem:[#allocation0] sm:$0x1] %vm75_vm12, %v74_v37   ;;  %vm171_vm12 = vcmask 162944  }
  0x94   :  { %v80_v47 = vpop.permute.xlu0 %79   ;;  %v86_v48 = vpop.permute.xlu1 %85  }
  0x95   :  { %82 = vst.msk [vmem:[#allocation0] sm:$0x1] %vm81_vm13, %v80_v47   ;;  %v146_v49 = vpop.permute.xlu2 %145   ;;  %vm177_vm13 = vcmask 130144  }
  0x96   :  { %88 = vst.msk [vmem:[#allocation0] sm:$0x1] %vm87_vm14, %v86_v48   ;;  %vm183_vm14 = vcmask 97344  }
  0x97   :  { %94 = vst.msk [vmem:[#allocation0] sm:$0x1] %vm93_vm15, %v92_v40   ;;  %vm189_vm15 = vcmask 64544  }
  0x9c   :  { %v98_v50 = vpop.permute.xlu0 %97   ;;  %v104_v51 = vpop.permute.xlu1 %103  }
  0x9d   :  { %100 = vst.msk [vmem:[#allocation0] sm:$0x1] %vm99_vm0, %v98_v50   ;;  %v164_v52 = vpop.permute.xlu2 %163  }
  0x9e   :  { %106 = vst.msk [vmem:[#allocation0] sm:$0x1] %vm105_vm1, %v104_v51  }
  0x9f   :  { %112 = vst.msk [vmem:[#allocation0] sm:$0x1] %vm111_vm2, %v110_v43  }
  0xa4   :  { %v116_v53 = vpop.permute.xlu0 %115   ;;  %v122_v54 = vpop.permute.xlu1 %121  }
  0xa5   :  { %118 = vst.msk [vmem:[#allocation0] sm:$0x1] %vm117_vm3, %v116_v53   ;;  %v182_v55 = vpop.permute.xlu2 %181  }
  0xa6   :  { %124 = vst.msk [vmem:[#allocation0] sm:$0x1] %vm123_vm4, %v122_v54  }
  0xa7   :  { %130 = vst.msk [vmem:[#allocation0] sm:$0x1] %vm129_vm5, %v128_v46  }
  0xac   :  { %v134_v56 = vpop.permute.xlu0 %133   ;;  %v140_v57 = vpop.permute.xlu1 %139  }
  0xad   :  { %136 = vst.msk [vmem:[#allocation0] sm:$0x1] %vm135_vm6, %v134_v56  }
  0xae   :  { %142 = vst.msk [vmem:[#allocation0] sm:$0x1] %vm141_vm7, %v140_v57  }
  0xaf   :  { %148 = vst.msk [vmem:[#allocation0] sm:$0x1] %vm147_vm8, %v146_v49  }
  0xb4   :  { %v152_v58 = vpop.permute.xlu0 %151   ;;  %v158_v59 = vpop.permute.xlu1 %157  }
  0xb5   :  { %154 = vst.msk [vmem:[#allocation0] sm:$0x1] %vm153_vm9, %v152_v58  }
  0xb6   :  { %160 = vst.msk [vmem:[#allocation0] sm:$0x1] %vm159_vm10, %v158_v59  }
  0xb7   :  { %166 = vst.msk [vmem:[#allocation0] sm:$0x1] %vm165_vm11, %v164_v52  }
  0xbc   :  { %v170_v60 = vpop.permute.xlu0 %169   ;;  %v176_v61 = vpop.permute.xlu1 %175  }
  0xbd   :  { %172 = vst.msk [vmem:[#allocation0] sm:$0x1] %vm171_vm12, %v170_v60  }
  0xbe   :  { %178 = vst.msk [vmem:[#allocation0] sm:$0x1] %vm177_vm13, %v176_v61  }
  0xbf   :  { %184 = vst.msk [vmem:[#allocation0] sm:$0x1] %vm183_vm14, %v182_v55  }
  0xc4   :  { %v188_v62 = vpop.permute.xlu0 %187  }
  0xc5   :  { %190 = vst.msk [vmem:[#allocation0] sm:$0x1] %vm189_vm15, %v188_v62  }
  0xcc   :  { %v193_v63 = vld [vmem:[#allocation0] sm:$0x1] }
  0xcd   :  { %196 = vst [vmem:[%s400_s1] sm:$0x1] %v193_v63 }

// kernel: up_forward.7
= control target key start
LH: loop header
LB: loop body
LE: loop exit
PB: predicated region body
PF: predicated region fallthrough
CT: control target
= control target key end

     0   :  { %s142_s0 = inlined_call_operand.vmem [shape: f32[64,128], index: 0, kind: input, shape index: {}]   ;;  %s143_s1 = inlined_call_operand.vmem [shape: f32[1,128], index: 1, kind: input, shape index: {}]   ;;  %s144_s2 = inlined_call_operand.vmem [shape: f32[1,128], index: 2, kind: input, shape index: {}]   ;;  %s145_s3 = inlined_call_operand.vmem [shape: f32[64,128], index: 3, kind: output, shape index: {}]  }
   0x1   :  { %v14_v0 = vld [vmem:[%s142_s0] sm:$0xff]  ;;  %v15_v3 = vld [vmem:[%s142_s0 + $0x8] sm:$0xff]  ;;  %v16_v6 = vld [vmem:[%s142_s0 + $0x10] sm:$0xff] }
   0x2   :  { %v66_v1 = vld [vmem:[%s143_s1] ss:$0 sm:$0xff]  ;;  %v17_v7 = vld [vmem:[%s142_s0 + $0x18] sm:$0xff]  ;;  %v19_v12 = vld [vmem:[%s142_s0 + $0x28] sm:$0xff] }
   0x3   :  { %v67_v2 = vld [vmem:[%s144_s2] ss:$0 sm:$0xff]  ;;  %v26_v4 = vmul.f32 %v66_v1, %v14_v0  ;;  %v27_v5 = vmul.f32 %v66_v1, %v15_v3  ;;  %v28_v9 = vmul.f32 %v66_v1, %v16_v6  ;;  %v29_v10 = vmul.f32 %v66_v1, %v17_v7  ;;  %v20_v13 = vld [vmem:[%s142_s0 + $0x30] sm:$0xff]  ;;  %v21_v14 = vld [vmem:[%s142_s0 + $0x38] sm:$0xff] }
   0x4   :  { %v18_v8 = vld [vmem:[%s142_s0 + $0x20] sm:$0xff]  ;;  %v31_v17 = vmul.f32 %v66_v1, %v19_v12  ;;  %v32_v18 = vmul.f32 %v66_v1, %v20_v13  ;;  %v33_v22 = vmul.f32 %v66_v1, %v21_v14 }
   0x5   :  { %v30_v11 = vmul.f32 %v66_v1, %v18_v8  ;;  %v38_v15 = vadd.f32 %v67_v2, %v26_v4  ;;  %v39_v16 = vadd.f32 %v67_v2, %v27_v5  ;;  %v40_v19 = vadd.f32 %v67_v2, %v28_v9 }
   0x6   :  { %v41_v20 = vadd.f32 %v67_v2, %v29_v10  ;;  %v43_v25 = vadd.f32 %v67_v2, %v31_v17  ;;  %v44_v26 = vadd.f32 %v67_v2, %v32_v18  ;;  %v45_v29 = vadd.f32 %v67_v2, %v33_v22 }
   0x7   :  { %v42_v21 = vadd.f32 %v67_v2, %v30_v11  ;;  %v46_v23 = vmax.f32 %v38_v15, 0.0  ;;  %v47_v24 = vmax.f32 %v39_v16, 0.0  ;;  %v48_v27 = vmax.f32 %v40_v19, 0.0 }
   0x8   :  { %v49_v28 = vmax.f32 %v41_v20, 0.0  ;;  %v51_v31 = vmax.f32 %v43_v25, 0.0  ;;  %v52_v32 = vmax.f32 %v44_v26, 0.0  ;;  %v53_v33 = vmax.f32 %v45_v29, 0.0 }
   0x9   :  { %54 = vst [vmem:[%s145_s3] sm:$0xff] %v46_v23  ;;  %v50_v30 = vmax.f32 %v42_v21, 0.0 }
   0xa   :  { %55 = vst [vmem:[%s145_s3 + $0x8] sm:$0xff] %v47_v24 }
   0xb   :  { %56 = vst [vmem:[%s145_s3 + $0x10] sm:$0xff] %v48_v27 }
   0xc   :  { %57 = vst [vmem:[%s145_s3 + $0x18] sm:$0xff] %v49_v28 }
   0xd   :  { %58 = vst [vmem:[%s145_s3 + $0x20] sm:$0xff] %v50_v30 }
   0xe   :  { %59 = vst [vmem:[%s145_s3 + $0x28] sm:$0xff] %v51_v31 }
   0xf   :  { %60 = vst [vmem:[%s145_s3 + $0x30] sm:$0xff] %v52_v32 }
  0x10   :  { %61 = vst [vmem:[%s145_s3 + $0x38] sm:$0xff] %v53_v33 }

// kernel: up_forward.6
= control target key start
LH: loop header
LB: loop body
LE: loop exit
PB: predicated region body
PF: predicated region fallthrough
CT: control target
= control target key end

     0   :  { %s3377_s21 = smov 0   ;;  %s3379_s22 = smov 0   ;;  %s5543_s0 = inlined_call_operand.vmem [shape: bf16[2,4,10,34,4], index: 0, kind: input, shape index: {}]   ;;  %s5544_s1 = inlined_call_operand.vmem [shape: bf16[2,4,10,34,4], index: 1, kind: input, shape index: {}]   ;;  %s5545_s2 = inlined_call_operand.vmem [shape: bf16[36,4], index: 2, kind: input, shape index: {}]   ;;  %s5546_s3 = inlined_call_operand.vmem [shape: bf16[36,4], index: 3, kind: input, shape index: {}]   ;;  %s5547_s4 = inlined_call_operand.vmem [shape: f32[1,4], index: 4, kind: input, shape index: {}]   ;;  %s5548_s5 = inlined_call_operand.vmem [shape: f32[2,32,32,4], index: 5, kind: output, shape index: {0}]   ;;  %s5549_s6 = inlined_call_operand.vmem [shape: f32[2,4,2,4], index: 6, kind: output, shape index: {1}]  }
   0x1   :  { %s3381_s23 = smov 0   ;;  %s3383_s24 = smov 0  }
   0x2   :  { %s3385_s25 = smov 0  }
   0x3 LB: > { %s26_s26 = sadd.s32 1, %s3324_s23  ;;  %s29_s27 = sadd.s32 1, %s3328_s24  ;;  %s3332_s25 = sphi %s3385_s25, %s17_s25   ;;  %s3328_s24 = sphi %s3383_s24, %s5747_s24   ;;  %s3324_s23 = sphi %s3381_s23, %s5746_s23   ;;  %s3320_s22 = sphi %s3379_s22, %s5745_s22   ;;  %s3316_s21 = sphi %s3377_s21, %s5744_s21  }
   0x4   : > { %p27_p0 = scmp.ge.s32.totalorder %s26_s26, 4  ;;  %p2944_p1 = scmp.ge.s32.totalorder %s3332_s25, 1 }
   0x5   : > { %p253_p2 = scmp.lt.s32.totalorder %s3332_s25, 9 }
   0x6   : > { %s5749_s26 = smov (%p27_p0, %s26_s26), 0  ;;  %s5751_s27 = smov (!%p27_p0, %s29_s27), %s3328_s24 }
   0x7   : > { %p254_p3 = pnand %p2944_p1, %p253_p2  ;;  %p31_p4 = scmp.ge.s32.totalorder %s5751_s27, 2 }
   0x9   : > { %s5753_s27 = smov (%p31_p4, %s5751_s27), 0  ;;  %257 = sbr.rel (%p254_p3) target bundleno = 993 (0x3e1), region = 40 }
   0xe   : > { %p309_p5 = scmp.lt.s32.totalorder %s3320_s22, 1  ;;  %p311_p6 = scmp.lt.s32.totalorder %s3316_s21, 3  ;;  %vm501_vm0 = vsmask.f32 7424  ;;  %vm694_vm1 = vcmask 1046528   ;;  %vm2299_vm2 = vcmask 1041408  }
   0xf   : > { %s3334_s12 = smov 4   ;;  %s3335_s13 = smov 8   ;;  %vm1035_vm3 = vcmask 31744   ;;  %vm1101_vm4 = vcmask 97280   ;;  %vm1068_vm5 = vcmask 64512   ;;  %vm1134_vm6 = vcmask 130048  }
  0x10   : > { %s5755_s22 = smov (!%p309_p5, %s3320_s22), 1  ;;  %s3336_s14 = smov 12   ;;  %vm1200_vm7 = vcmask 195584   ;;  %vm1167_vm8 = vcmask 162816   ;;  %vm1233_vm9 = vcmask 228352   ;;  %vm2266_vm10 = vcmask 293888  }
  0x11   : > { %s3413_s28 = scalar_select %p311_p6, %s3316_s21, 3  ;;  %vm1266_vm11 = vcmask 261120   ;;  %vm2737_vm12 = vcmask 1040384   ;;  %vm2739_vm13 = vcmask 25600  }
  0x12   : > { %s3214_s29 = smul.u32 200, %s5755_s22  ;;  %s3337_s15 = smov 16  }
  0x13   : > { %s3213_s30 = smul.u32 50, %s3413_s28  ;;  %s3338_s16 = smov 20  }
  0x14   : > { %s3339_s17 = smov 24   ;;  %s3340_s18 = smov 28  }
  0x15   : > { %s3417_s7 = sadd.s32 %s3214_s29, %s3213_s30  ;;  %s3341_s19 = smov 32  }
  0x16   : > { %s2945_s8 = sshll.u32 %s3417_s7, 2  ;;  %s2949_s7 = sshll.u32 %s5755_s22, 7 }
  0x17   : > { %s3425_s11 = scalar_lea.vmem %s5543_s0, %s2945_s8  ;;  %s4094_s30 = scalar_lea.vmem %s5544_s1, %s2945_s8 }
  0x18   : > { %v3428_v0 = vld [vmem:[%s3425_s11 + $0x28] sm:$0xff]  ;;  %v3431_v1 = vld [vmem:[%s3425_s11 + $0x30] sm:$0xff]  ;;  %v3437_v3 = vld [vmem:[%s3425_s11 + $0x1c] sm:$0xff] }
  0x19   : > { %v3434_v2 = vld [vmem:[%s3425_s11 + $0x14] sm:$0xff]  ;;  %v3440_v4 = vld [vmem:[%s3425_s11] sm:$0xff]  ;;  %v3443_v5 = vld [vmem:[%s3425_s11 + $0x8] sm:$0xff]  ;;  %v543_v6 = vshrl.u32 %v3428_v0, 16  ;;  %v545_v7 = vshll.u32 %v3428_v0, 16  ;;  %v550_v8 = vshll.u32 %v3431_v1, 16 }
  0x1a   : > { %v523_v9 = vshrl.u32 %v3434_v2, 16  ;;  %v361_v10 = vld [vmem:[%s3425_s11 + $0x38] sm:$0x1]  ;;  %v525_v11 = vshll.u32 %v3434_v2, 16  ;;  %v530_v12 = vshll.u32 %v3437_v3, 16  ;;  %v503_v13 = vshrl.u32 %v3440_v4, 16 }
  0x1b   : > { %v505_v14 = vshll.u32 %v3440_v4, 16  ;;  %v356_v15 = vld [vmem:[%s3425_s11 + $0x24] sm:$0x1]  ;;  %v547_v16 = vrot.slane %v545_v7, 1  ;;  %v552_v17 = vrot.slane %v550_v8, 1  ;;  %v510_v18 = vshll.u32 %v3443_v5, 16 }
  0x1c   : > { %v487_v19 = vunpack.c.l.b16 %v361_v10  ;;  %v527_v20 = vrot.slane %v525_v11, 1  ;;  %v532_v21 = vrot.slane %v530_v12, 1  ;;  %v554_v23 = vshrl.u32 %v3431_v1, 16  ;;  %v351_v24 = vld [vmem:[%s3425_s11 + $0x10] sm:$0x1]  ;;  %v3471_v37 = vld [vmem:[%s3425_s11 + $0x58] sm:$0xff] }
  0x1d   : > { %v507_v22 = vrot.slane %v505_v14, 1  ;;  %v548_v25 = vor.u32 %v547_v16, %v543_v6  ;;  %v512_v26 = vrot.slane %v510_v18, 1  ;;  %v486_v28 = vunpack.c.l.b16 %v356_v15  ;;  %v3462_v32 = vld [vmem:[%s3425_s11 + $0x50] sm:$0xff]  ;;  %v3474_v38 = vld [vmem:[%s3425_s11 + $0x44] sm:$0xff]  ;;  %v366_v39 = vld [vmem:[%s3425_s11 + $0x4c] sm:$0x1] }
  0x1e   : > { %v3458_v27 = vpack.c.b16 %v487_v19, %v487_v19  ;;  %v528_v29 = vor.u32 %v527_v20, %v523_v9  ;;  %v534_v31 = vshrl.u32 %v3437_v3, 16  ;;  %v485_v36 = vunpack.c.l.b16 %v351_v24  ;;  %v3492_v51 = vld [vmem:[%s3425_s11 + $0x3c] sm:$0xff]  ;;  %v376_v56 = vld [vmem:[%s3425_s11 + $0x74] sm:$0x1]  ;;  %v3505_v61 = vld [vmem:[%s3425_s11 + $0x6c] sm:$0xff] }
  0x1f   : > { %v508_v30 = vor.u32 %v507_v22, %v503_v13  ;;  %v3465_v33 = vsel %vm501_vm0, %v548_v25, %v552_v17  ;;  %v3468_v35 = vpack.c.b16 %v486_v28, %v486_v28  ;;  %v556_v42 = vor.u32 %v554_v23, %v552_v17  ;;  %v3512_v8 = vld [vmem:[%s3425_s11 + $0x64] sm:$0xff]  ;;  %v371_v13 = vld [vmem:[%s3425_s11 + $0x60] sm:$0x1] }
  0x20   : > { %v558_v34 = vshll.u32 %v3458_v27, 16  ;;  %670 = vrot.lane.b32.xlu2 %v3465_v33, %s3334_s12  ;;  %v3480_v40 = vsel %vm501_vm0, %v528_v29, %v532_v21  ;;  %v514_v43 = vshrl.u32 %v3443_v5, 16  ;;  %v536_v45 = vor.u32 %v534_v31, %v532_v21  ;;  %v3534_v31 = vld [vmem:[%s3425_s11 + $0x8c] sm:$0xff] }
  0x21   : > { %v513_v41 = vsel %vm501_vm0, %v508_v30, %v512_v26  ;;  %666 = vrot.lane.b32.xlu1 %v3480_v40, %s3334_s12  ;;  %v538_v46 = vshll.u32 %v3468_v35, 16  ;;  %v3488_v47 = vpack.c.b16 %v485_v36, %v485_v36  ;;  %v585_v49 = vshll.u32 %v3462_v32, 16 }
  0x22   : > { %662 = vrot.lane.b32.xlu0 %v513_v41, %s3334_s12  ;;  %v560_v44 = vrot.slane %v558_v34, 1  ;;  %v516_v48 = vor.u32 %v514_v43, %v512_v26  ;;  %v488_v50 = vunpack.c.l.b16 %v366_v39  ;;  %v590_v54 = vshll.u32 %v3471_v37, 16  ;;  %v381_v26 = vld [vmem:[%s3425_s11 + $0x88] sm:$0x1] }
  0x23   : > { %v540_v52 = vrot.slane %v538_v46, 1  ;;  %v518_v53 = vshll.u32 %v3488_v47, 16  ;;  %v570_v55 = vshll.u32 %v3474_v38, 16  ;;  %v583_v58 = vshrl.u32 %v3462_v32, 16 }
  0x24   : > { %v3499_v57 = vsel %vm501_vm0, %v556_v42, %v560_v44  ;;  %v587_v59 = vrot.slane %v585_v49, 1  ;;  %v3502_v60 = vpack.c.b16 %v488_v50, %v488_v50  ;;  %v574_v7 = vshrl.u32 %v3474_v38, 16  ;;  %v3544_v42 = vld [vmem:[%s3425_s11 + $0x80] sm:$0xff] }
  0x25   : > { %v3508_v62 = vsel %vm501_vm0, %v536_v45, %v540_v52  ;;  %v520_v63 = vrot.slane %v518_v53, 1  ;;  %v572_v6 = vrot.slane %v570_v55, 1  ;;  %v563_v10 = vshrl.u32 %v3492_v51, 16  ;;  %v3557_v52 = vld [vmem:[%s3425_s11 + $0x94] sm:$0xff] }
  0x26   : > { %v578_v9 = vshll.u32 %v3502_v60, 16  ;;  %v565_v11 = vshll.u32 %v3492_v51, 16  ;;  %v490_v12 = vunpack.c.l.b16 %v376_v56  ;;  %v592_v15 = vrot.slane %v590_v54, 1 }
  0x27   : > { %v521_v14 = vsel %vm501_vm0, %v516_v48, %v520_v63  ;;  %v588_v16 = vor.u32 %v587_v59, %v583_v58  ;;  %v610_v19 = vshll.u32 %v3505_v61, 16  ;;  %v576_v20 = vor.u32 %v574_v7, %v572_v6  ;;  %v3552_v48 = vld [vmem:[%s3425_s11 + $0x78] sm:$0xff] }
  0x28   : > { %672 = vrot.lane.b32.xlu2 %v3499_v57, %s3334_s12  ;;  %v567_v17 = vrot.slane %v565_v11, 1  ;;  %v3521_v18 = vpack.c.b16 %v490_v12, %v490_v12  ;;  %v580_v21 = vrot.slane %v578_v9, 1  ;;  %v605_v22 = vshll.u32 %v3512_v8, 16 }
  0x29   : > { %668 = vrot.lane.b32.xlu1 %v3508_v62, %s3334_s12  ;;  %v489_v23 = vunpack.c.l.b16 %v371_v13  ;;  %v612_v28 = vrot.slane %v610_v19, 1  ;;  %v614_v29 = vshrl.u32 %v3505_v61, 16  ;;  %v3537_v34 = vsel %vm501_vm0, %v588_v16, %v592_v15 }
  0x2a   : > { %664 = vrot.lane.b32.xlu0 %v521_v14, %s3334_s12  ;;  %v568_v24 = vor.u32 %v567_v17, %v563_v10  ;;  %v618_v30 = vshll.u32 %v3521_v18, 16  ;;  %v3540_v36 = vsel %vm501_vm0, %v576_v20, %v580_v21  ;;  %v603_v39 = vshrl.u32 %v3512_v8, 16 }
  0x2b   : > { %v3528_v25 = vpack.c.b16 %v489_v23, %v489_v23  ;;  %v607_v41 = vrot.slane %v605_v22, 1  ;;  %v594_v44 = vshrl.u32 %v3471_v37, 16  ;;  %v491_v46 = vunpack.c.l.b16 %v381_v26 }
  0x2c   : > { %v3547_v43 = vsel %vm501_vm0, %v568_v24, %v572_v6  ;;  %v616_v49 = vor.u32 %v614_v29, %v612_v28  ;;  %v620_v50 = vrot.slane %v618_v30, 1  ;;  %v645_v53 = vshll.u32 %v3534_v31, 16  ;;  %v386_v6 = vld [vmem:[%s3425_s11 + $0x9c] sm:$0x1] }
  0x2d   : > { %v598_v45 = vshll.u32 %v3528_v25, 16  ;;  %v608_v54 = vor.u32 %v607_v41, %v603_v39  ;;  %v630_v55 = vshll.u32 %v3544_v42, 16  ;;  %v596_v56 = vor.u32 %v594_v44, %v592_v15 }
  0x2e   : > { %v3565_v59 = vpack.c.b16 %v491_v46, %v491_v46  ;;  %v625_v63 = vshll.u32 %v3552_v48, 16  ;;  %v3570_v7 = vsel %vm501_vm0, %v616_v49, %v620_v50  ;;  %v643_v9 = vshrl.u32 %v3534_v31, 16 }
  0x2f   : > { %v600_v58 = vrot.slane %v598_v45, 1  ;;  %v647_v10 = vrot.slane %v645_v53, 1  ;;  %v650_v11 = vshll.u32 %v3557_v52, 16  ;;  %v3575_v12 = vsel %vm501_vm0, %v608_v54, %v612_v28 }
  0x30   : > { %678 = vrot.lane.b32.xlu2 %v3537_v34, %s3334_s12  ;;  %v632_v13 = vrot.slane %v630_v55, 1  ;;  %v634_v14 = vshrl.u32 %v3544_v42, 16  ;;  %v623_v15 = vshrl.u32 %v3552_v48, 16  ;;  %v638_v17 = vshll.u32 %v3565_v59, 16 }
  0x31   : > { %676 = vrot.lane.b32.xlu1 %v3540_v36, %s3334_s12  ;;  %v3580_v16 = vsel %vm501_vm0, %v596_v56, %v600_v58  ;;  %v627_v19 = vrot.slane %v625_v63, 1  ;;  %v492_v20 = vunpack.c.l.b16 %v386_v6  ;;  %v648_v21 = vor.u32 %v647_v10, %v643_v9 }
  0x32   : > { %674 = vrot.lane.b32.xlu0 %v3547_v43, %s3334_s12  ;;  %v652_v22 = vrot.slane %v650_v11, 1  ;;  %v636_v23 = vor.u32 %v634_v14, %v632_v13  ;;  %v640_v24 = vrot.slane %v638_v17, 1  ;;  %v654_v41 = vshrl.u32 %v3557_v52, 16 }
  0x33   : > { %v628_v26 = vor.u32 %v627_v19, %v623_v15  ;;  %v3589_v28 = vpack.c.b16 %v492_v20, %v492_v20  ;;  %v696_v45 = vrot.slane %v3443_v5, 1  ;;  %v698_v46 = vrot.slane %v3488_v47, 1 }
  0x34   : > { %v3592_v29 = vsel %vm501_vm0, %v648_v21, %v652_v22  ;;  %v3595_v30 = vsel %vm501_vm0, %v636_v23, %v640_v24  ;;  %v695_v49 = vrot.slane %v3440_v4, 1  ;;  %v656_v50 = vor.u32 %v654_v41, %v652_v22 }
  0x35   : > { %v3598_v39 = vsel %vm501_vm0, %v628_v26, %v632_v13  ;;  %v658_v44 = vshll.u32 %v3589_v28, 16  ;;  %v699_v54 = vsel %vm694_vm1, %v696_v45, %v698_v46  ;;  %v705_v5 = vrot.slane %v3428_v0, 1 }
  0x36   : > { %v697_v55 = vsel %vm694_vm1, %v695_v49, %v696_v45  ;;  %v706_v4 = vrot.slane %v3431_v1, 1  ;;  %v701_v47 = vrot.slane %v3437_v3, 1  ;;  %v703_v58 = vrot.slane %v3468_v35, 1 }
  0x37   : > { %v660_v53 = vrot.slane %v658_v44, 1  ;;  %v700_v63 = vrot.slane %v3434_v2, 1  ;;  %v711_v35 = vrot.slane %v3474_v38, 1  ;;  %v713_v11 = vrot.slane %v3502_v60, 1 }
  0x38   : > { %684 = vrot.lane.b32.xlu2 %v3570_v7, %s3334_s12  ;;  %v3626_v6 = vsel %vm694_vm1, %v705_v5, %v706_v4  ;;  %v3629_v9 = vsel %vm694_vm1, %v701_v47, %v703_v58  ;;  %v710_v13 = vrot.slane %v3492_v51, 1  ;;  %v708_v14 = vrot.slane %v3458_v27, 1  ;;  %v3750_v58 = vld [vmem:[%s3425_s11 + $0xa8] sm:$0xff] }
  0x39   : > { %682 = vrot.lane.b32.xlu1 %v3575_v12, %s3334_s12  ;;  %v3614_v56 = vsel %vm501_vm0, %v656_v50, %v660_v53  ;;  %v3632_v10 = vsel %vm694_vm1, %v700_v63, %v701_v47  ;;  %v3645_v15 = vsel %vm694_vm1, %v711_v35, %v713_v11  ;;  %v720_v27 = vrot.slane %v3512_v8, 1  ;;  %v3753_v63 = vld [vmem:[%s3425_s11 + $0xa0] sm:$0xff] }
  0x3a   : > { %680 = vrot.lane.b32.xlu0 %v3580_v16, %s3334_s12  ;;  %v3648_v17 = vsel %vm694_vm1, %v710_v13, %v711_v35  ;;  %v3651_v19 = vsel %vm694_vm1, %v706_v4, %v708_v14  ;;  %v721_v60 = vrot.slane %v3505_v61, 1  ;;  %v716_v20 = vrot.slane %v3471_v37, 1 }
  0x3b   : > { %v718_v21 = vrot.slane %v3528_v25, 1  ;;  %v715_v22 = vrot.slane %v3462_v32, 1  ;;  %v726_v25 = vrot.slane %v3544_v42, 1  ;;  %v728_v41 = vrot.slane %v3565_v59, 1 }
  0x3c   : > { %v3665_v23 = vsel %vm694_vm1, %v720_v27, %v721_v60  ;;  %v725_v44 = vrot.slane %v3552_v48, 1  ;;  %v723_v45 = vrot.slane %v3521_v18, 1  ;;  %v731_v18 = vrot.slane %v3557_v52, 1 }
  0x3d   : > { %v3668_v24 = vsel %vm694_vm1, %v716_v20, %v718_v21  ;;  %v3671_v26 = vsel %vm694_vm1, %v715_v22, %v716_v20  ;;  %v3684_v46 = vsel %vm694_vm1, %v726_v25, %v728_v41  ;;  %v733_v59 = vrot.slane %v3589_v28, 1 }
  0x3e   : > { %v3687_v49 = vsel %vm694_vm1, %v725_v44, %v726_v25  ;;  %v3690_v50 = vsel %vm694_vm1, %v721_v60, %v723_v45  ;;  %v730_v53 = vrot.slane %v3534_v31, 1  ;;  %v815_v21 = vshll.u32 %v3753_v63, 16  ;;  %v391_v44 = vld [vmem:[%s3425_s11 + $0xb0] sm:$0x1] }
  0x3f   : > { %v813_v45 = vshrl.u32 %v3753_v63, 16 }
  0x40   : > { %690 = vrot.lane.b32.xlu2 %v3592_v29, %s3334_s12 }
  0x41   : > { %688 = vrot.lane.b32.xlu1 %v3595_v30, %s3334_s12 }
  0x42   : > { %686 = vrot.lane.b32.xlu0 %v3598_v39, %s3334_s12 }
  0x48   : > { %737 = vrot.lane.b32.xlu2 %v699_v54, %s3335_s13  ;;  %v3702_v54 = vsel %vm694_vm1, %v731_v18, %v733_v59  ;;  %v820_v59 = vshll.u32 %v3750_v58, 16 }
  0x49   : > { %735 = vrot.lane.b32.xlu1 %v697_v55, %s3335_s13  ;;  %v3705_v55 = vsel %vm694_vm1, %v730_v53, %v731_v18  ;;  %v817_v18 = vrot.slane %v815_v21, 1  ;;  %v810_v53 = vunpack.c.l.b16 %v391_v44 }
  0x4a   : > { %692 = vrot.lane.b32.xlu0 %v3614_v56, %s3334_s12 }
  0x50   : > { %743 = vrot.lane.b32.xlu2 %v3626_v6, %s3335_s13 }
  0x51   : > { %741 = vrot.lane.b32.xlu1 %v3629_v9, %s3335_s13 }
  0x52   : > { %739 = vrot.lane.b32.xlu0 %v3632_v10, %s3335_s13 }
  0x58   : > { %749 = vrot.lane.b32.xlu2 %v3645_v15, %s3335_s13 }
  0x59   : > { %747 = vrot.lane.b32.xlu1 %v3648_v17, %s3335_s13 }
  0x5a   : > { %745 = vrot.lane.b32.xlu0 %v3651_v19, %s3335_s13 }
  0x60   : > { %755 = vrot.lane.b32.xlu2 %v3665_v23, %s3335_s13 }
  0x61   : > { %753 = vrot.lane.b32.xlu1 %v3668_v24, %s3335_s13 }
  0x62   : > { %751 = vrot.lane.b32.xlu0 %v3671_v26, %s3335_s13 }
  0x68   : > { %761 = vrot.lane.b32.xlu2 %v3684_v46, %s3335_s13 }
  0x69   : > { %759 = vrot.lane.b32.xlu1 %v3687_v49, %s3335_s13 }
  0x6a   : > { %757 = vrot.lane.b32.xlu0 %v3690_v50, %s3335_s13 }
  0x70   : > { %777 = vrot.lane.b32.xlu2 %v3434_v2, %s3336_s14 }
  0x71   : > { %765 = vrot.lane.b32.xlu1 %v3702_v54, %s3335_s13 }
  0x72   : > { %763 = vrot.lane.b32.xlu0 %v3705_v55, %s3335_s13 }
  0x78   : > { %783 = vrot.lane.b32.xlu2 %v3431_v1, %s3336_s14 }
  0x79   : > { %781 = vrot.lane.b32.xlu1 %v3428_v0, %s3336_s14 }
  0x7a   : > { %779 = vrot.lane.b32.xlu0 %v3437_v3, %s3336_s14  ;;  %v3719_v28 = vpop.permute.xlu2 %670 }
  0x7b   : > { %5568 = vst [vmem:[#allocation2_spill] sm:$0xff] %v3719_v28 }
  0x80   : > { %789 = vrot.lane.b32.xlu2 %v3462_v32, %s3336_s14 }
  0x81   : > { %787 = vrot.lane.b32.xlu1 %v3474_v38, %s3336_s14 }
  0x82   : > { %785 = vrot.lane.b32.xlu0 %v3492_v51, %s3336_s14  ;;  %v3727_v2 = vpop.permute.xlu2 %672 }
  0x83   : > { %5569 = vst [vmem:[#allocation3_spill] sm:$0xff] %v3727_v2 }
  0x88   : > { %795 = vrot.lane.b32.xlu2 %v3505_v61, %s3336_s14 }
  0x89   : > { %793 = vrot.lane.b32.xlu1 %v3512_v8, %s3336_s14 }
  0x8a   : > { %791 = vrot.lane.b32.xlu0 %v3471_v37, %s3336_s14  ;;  %v3735_v3 = vpop.permute.xlu2 %678 }
  0x90   : > { %801 = vrot.lane.b32.xlu2 %v3534_v31, %s3336_s14 }
  0x91   : > { %799 = vrot.lane.b32.xlu1 %v3544_v42, %s3336_s14 }
  0x92   : > { %797 = vrot.lane.b32.xlu0 %v3552_v48, %s3336_s14  ;;  %v3743_v5 = vpop.permute.xlu2 %684 }
  0x93   : > { %5570 = vst [vmem:[#allocation4_spill] sm:$0xff] %v3743_v5  ;;  %v3745_v4 = vpop.permute.xlu1 %666  ;;  %v824_v5 = vshrl.u32 %v3750_v58, 16 }
  0x94   : > { %v3747_v47 = vpop.permute.xlu0 %662 }
  0x98   : > { %807 = vrot.lane.b32.xlu2 %v3750_v58, %s3336_s14 }
  0x99   : > { %805 = vrot.lane.b32.xlu1 %v3753_v63, %s3336_s14 }
  0x9a   : > { %803 = vrot.lane.b32.xlu0 %v3557_v52, %s3336_s14  ;;  %v3761_v35 = vpop.permute.xlu2 %690 }
  0x9b   : > { %5571 = vst [vmem:[#allocation5_spill] sm:$0xff] %v3761_v35  ;;  %v3763_v11 = vpop.permute.xlu1 %668 }
  0x9c   : > { %5572 = vst [vmem:[#allocation6_spill] sm:$0xff] %v3763_v11  ;;  %v3765_v13 = vpop.permute.xlu0 %664 }
  0xa0   : > { %836 = vrot.lane.b32.xlu2 %v3465_v33, %s3337_s15 }
  0xa1   : > { %834 = vrot.lane.b32.xlu1 %v3508_v62, %s3337_s15 }
  0xa2   : > { %832 = vrot.lane.b32.xlu0 %v3480_v40, %s3337_s15  ;;  %v3773_v14 = vpop.permute.xlu2 %737 }
  0xa3   : > { %v3775_v27 = vpop.permute.xlu1 %676 }
  0xa4   : > { %5573 = vst [vmem:[#allocation7_spill] sm:$0xff] %v3775_v27  ;;  %v3777_v60 = vpop.permute.xlu0 %674  ;;  %v822_v27 = vrot.slane %v820_v59, 1 }
  0xa5   : > { %5574 = vst [vmem:[#allocation8_spill] sm:$0xff] %v3777_v60 }
  0xa8   : > { %842 = vrot.lane.b32.xlu2 %v3540_v36, %s3337_s15 }
  0xa9   : > { %840 = vrot.lane.b32.xlu1 %v3547_v43, %s3337_s15 }
  0xaa   : > { %838 = vrot.lane.b32.xlu0 %v3499_v57, %s3337_s15  ;;  %v3785_v62 = vpop.permute.xlu2 %743 }
  0xab   : > { %5575 = vst [vmem:[#allocation9_spill] sm:$0xff] %v3785_v62  ;;  %v3787_v20 = vpop.permute.xlu1 %682 }
  0xac   : > { %5576 = vst [vmem:[#allocation10_spill] sm:$0xff] %v3787_v20  ;;  %v3789_v40 = vpop.permute.xlu0 %680 }
  0xad   : > { %5577 = vst [vmem:[#allocation11_spill] sm:$0xff] %v3789_v40 }
  0xb0   : > { %848 = vrot.lane.b32.xlu2 %v3575_v12, %s3337_s15 }
  0xb1   : > { %846 = vrot.lane.b32.xlu1 %v3580_v16, %s3337_s15 }
  0xb2   : > { %844 = vrot.lane.b32.xlu0 %v3537_v34, %s3337_s15  ;;  %v3798_v22 = vpop.permute.xlu2 %749 }
  0xb3   : > { %5578 = vst [vmem:[#allocation12_spill] sm:$0xff] %v3798_v22  ;;  %v3800_v25 = vpop.permute.xlu1 %688  ;;  %v818_v22 = vor.u32 %v817_v18, %v813_v45  ;;  %v826_v18 = vor.u32 %v824_v5, %v822_v27 }
  0xb4   : > { %v3802_v41 = vpop.permute.xlu0 %686 }
  0xb5   : > { %5579 = vst [vmem:[#allocation13_spill] sm:$0xff] %v3802_v41  ;;  %v811_v41 = vpack.c.b16 %v810_v53, %v810_v53  ;;  %v3820_v44 = vsel %vm501_vm0, %v818_v22, %v822_v27 }
  0xb7   : > { %v828_v62 = vshll.u32 %v811_v41, 16 }
  0xb8   : > { %854 = vrot.lane.b32.xlu2 %v3595_v30, %s3337_s15 }
  0xb9   : > { %852 = vrot.lane.b32.xlu1 %v3598_v39, %s3337_s15  ;;  %v830_v59 = vrot.slane %v828_v62, 1 }
  0xba   : > { %850 = vrot.lane.b32.xlu0 %v3570_v7, %s3337_s15  ;;  %v3813_v60 = vpop.permute.xlu2 %755 }
  0xbb   : > { %5580 = vst [vmem:[#allocation14_spill] sm:$0xff] %v3813_v60  ;;  %v3815_v2 = vpop.permute.xlu1 %735  ;;  %v3836_v28 = vsel %vm501_vm0, %v826_v18, %v830_v59 }
  0xbc   : > { %v3817_v21 = vpop.permute.xlu0 %692 }
  0xbd   : > { %5581 = vst [vmem:[#allocation15_spill] sm:$0xff] %v3817_v21 }
  0xc0   : > { %860 = vrot.lane.b32.xlu2 %v3820_v44, %s3337_s15 }
  0xc1   : > { %858 = vrot.lane.b32.xlu1 %v3614_v56, %s3337_s15 }
  0xc2   : > { %856 = vrot.lane.b32.xlu0 %v3592_v29, %s3337_s15  ;;  %v3829_v45 = vpop.permute.xlu2 %761 }
  0xc3   : > { %v3831_v53 = vpop.permute.xlu1 %741 }
  0xc4   : > { %5582 = vst [vmem:[#allocation16_spill] sm:$0xff] %v3831_v53  ;;  %v3833_v22 = vpop.permute.xlu0 %739  ;;  %v864_v53 = vrot.slane %v3753_v63, 1 }
  0xc8   : > { %871 = vrot.lane.b32.xlu2 %v3629_v9, %s3338_s16 }
  0xc9   : > { %869 = vrot.lane.b32.xlu1 %v3632_v10, %s3338_s16 }
  0xca   : > { %862 = vrot.lane.b32.xlu0 %v3836_v28, %s3337_s15  ;;  %v3844_v60 = vpop.permute.xlu2 %777 }
  0xcb   : > { %v3846_v5 = vpop.permute.xlu1 %747 }
  0xcc   : > { %5583 = vst [vmem:[#allocation17_spill] sm:$0xff] %v3846_v5  ;;  %v3848_v27 = vpop.permute.xlu0 %745 }
  0xcd   : > { %5584 = vst [vmem:[#allocation18_spill] sm:$0xff] %v3848_v27 }
  0xd0   : > { %877 = vrot.lane.b32.xlu2 %v3648_v17, %s3338_s16 }
  0xd1   : > { %875 = vrot.lane.b32.xlu1 %v3651_v19, %s3338_s16 }
  0xd2   : > { %873 = vrot.lane.b32.xlu0 %v3626_v6, %s3338_s16  ;;  %v3856_v9 = vpop.permute.xlu2 %783 }
  0xd3   : > { %5585 = vst [vmem:[#allocation19_spill] sm:$0xff] %v3856_v9  ;;  %v3858_v10 = vpop.permute.xlu1 %753 }
  0xd4   : > { %5586 = vst [vmem:[#allocation20_spill] sm:$0xff] %v3858_v10  ;;  %v3860_v62 = vpop.permute.xlu0 %751 }
  0xd8   : > { %883 = vrot.lane.b32.xlu2 %v3668_v24, %s3338_s16 }
  0xd9   : > { %881 = vrot.lane.b32.xlu1 %v3671_v26, %s3338_s16 }
  0xda   : > { %879 = vrot.lane.b32.xlu0 %v3645_v15, %s3338_s16  ;;  %v3868_v18 = vpop.permute.xlu2 %789 }
  0xdb   : > { %5587 = vst [vmem:[#allocation21_spill] sm:$0xff] %v3868_v18  ;;  %v3870_v59 = vpop.permute.xlu1 %759 }
  0xdc   : > { %5588 = vst [vmem:[#allocation22_spill] sm:$0xff] %v3870_v59  ;;  %v3872_v5 = vpop.permute.xlu0 %757  ;;  %v865_v59 = vrot.slane %v3750_v58, 1 }
  0xdd   : > { %5589 = vst [vmem:[#allocation23_spill] sm:$0xff] %v3872_v5  ;;  %v867_v5 = vrot.slane %v811_v41, 1 }
  0xe0   : > { %889 = vrot.lane.b32.xlu2 %v3687_v49, %s3338_s16 }
  0xe1   : > { %887 = vrot.lane.b32.xlu1 %v3690_v50, %s3338_s16 }
  0xe2   : > { %885 = vrot.lane.b32.xlu0 %v3665_v23, %s3338_s16  ;;  %v3880_v27 = vpop.permute.xlu2 %795 }
  0xe3   : > { %5590 = vst [vmem:[#allocation24_spill] sm:$0xff] %v3880_v27  ;;  %v3882_v20 = vpop.permute.xlu1 %765  ;;  %v3904_v27 = vsel %vm694_vm1, %v864_v53, %v865_v59 }
  0xe4   : > { %5591 = vst [vmem:[#allocation25_spill] sm:$0xff] %v3882_v20  ;;  %v3884_v9 = vpop.permute.xlu0 %763 }
  0xe5   : > { %5592 = vst [vmem:[#allocation26_spill] sm:$0xff] %v3884_v9  ;;  %v3901_v9 = vsel %vm694_vm1, %v865_v59, %v867_v5  ;;  %v3967_v59 = vld [vmem:[%s3425_s11 + $0xbc] sm:$0xff] }
  0xe8   : > { %895 = vrot.lane.b32.xlu2 %v3702_v54, %s3338_s16 }
  0xe9   : > { %893 = vrot.lane.b32.xlu1 %v3705_v55, %s3338_s16 }
  0xea   : > { %891 = vrot.lane.b32.xlu0 %v3684_v46, %s3338_s16  ;;  %v3892_v18 = vpop.permute.xlu2 %801 }
  0xeb   : > { %5593 = vst [vmem:[#allocation27_spill] sm:$0xff] %v3892_v18  ;;  %v3896_v11 = vpop.permute.xlu1 %781 }
  0xec   : > { %5594 = vst [vmem:[#allocation28_spill] sm:$0xff] %v3896_v11  ;;  %v3898_v20 = vpop.permute.xlu0 %779 }
  0xf0   : > { %911 = vrot.lane.b32.xlu2 %v3428_v0, %s3339_s17 }
  0xf1   : > { %899 = vrot.lane.b32.xlu1 %v3901_v9, %s3338_s16 }
  0xf2   : > { %897 = vrot.lane.b32.xlu0 %v3904_v27, %s3338_s16  ;;  %v3912_v41 = vpop.permute.xlu2 %807 }
  0xf3   : > { %5595 = vst [vmem:[#allocation29_spill] sm:$0xff] %v3912_v41  ;;  %v3914_v18 = vpop.permute.xlu1 %787 }
  0xf4   : > { %5596 = vst [vmem:[#allocation30_spill] sm:$0xff] %v3914_v18  ;;  %v3916_v35 = vpop.permute.xlu0 %785 }
  0xf5   : > { %5597 = vst [vmem:[#allocation31_spill] sm:$0xff] %v3916_v35 }
  0xf8   : > { %917 = vrot.lane.b32.xlu2 %v3474_v38, %s3339_s17 }
  0xf9   : > { %915 = vrot.lane.b32.xlu1 %v3492_v51, %s3339_s17 }
  0xfa   : > { %913 = vrot.lane.b32.xlu0 %v3431_v1, %s3339_s17  ;;  %v3924_v0 = vpop.permute.xlu2 %836 }
  0xfb   : > { %5598 = vst [vmem:[#allocation32_spill] sm:$0xff] %v3924_v0  ;;  %v3926_v53 = vpop.permute.xlu1 %793 }
  0xfc   : > { %v3928_v5 = vpop.permute.xlu0 %791 }
  0xfd   : > { %5599 = vst [vmem:[#allocation33_spill] sm:$0xff] %v3928_v5  ;;  %v3970_v5 = vld [vmem:[%s3425_s11 + $0xb4] sm:$0xff] }
 0x100   : > { %923 = vrot.lane.b32.xlu2 %v3512_v8, %s3339_s17 }
 0x101   : > { %921 = vrot.lane.b32.xlu1 %v3471_v37, %s3339_s17 }
 0x102   : > { %919 = vrot.lane.b32.xlu0 %v3462_v32, %s3339_s17  ;;  %v3936_v38 = vpop.permute.xlu2 %842 }
 0x103   : > { %5600 = vst [vmem:[#allocation34_spill] sm:$0xff] %v3936_v38  ;;  %v3938_v1 = vpop.permute.xlu1 %799 }
 0x104   : > { %5601 = vst [vmem:[#allocation35_spill] sm:$0xff] %v3938_v1  ;;  %v3940_v51 = vpop.permute.xlu0 %797 }
 0x105   : > { %5602 = vst [vmem:[#allocation36_spill] sm:$0xff] %v3940_v51 }
 0x108   : > { %929 = vrot.lane.b32.xlu2 %v3544_v42, %s3339_s17 }
 0x109   : > { %927 = vrot.lane.b32.xlu1 %v3552_v48, %s3339_s17 }
 0x10a   : > { %925 = vrot.lane.b32.xlu0 %v3505_v61, %s3339_s17  ;;  %v3948_v37 = vpop.permute.xlu2 %848 }
 0x10b   : > { %v3950_v32 = vpop.permute.xlu1 %805 }
 0x10c   : > { %5603 = vst [vmem:[#allocation37_spill] sm:$0xff] %v3950_v32  ;;  %v3952_v8 = vpop.permute.xlu0 %803 }
 0x110   : > { %935 = vrot.lane.b32.xlu2 %v3753_v63, %s3339_s17 }
 0x111   : > { %933 = vrot.lane.b32.xlu1 %v3557_v52, %s3339_s17 }
 0x112   : > { %931 = vrot.lane.b32.xlu0 %v3534_v31, %s3339_s17  ;;  %v3960_v42 = vpop.permute.xlu2 %854 }
 0x113   : > { %5604 = vst [vmem:[#allocation38_spill] sm:$0xff] %v3960_v42  ;;  %v3962_v48 = vpop.permute.xlu1 %834  ;;  %v947_v42 = vshrl.u32 %v3970_v5, 16 }
 0x114   : > { %v3964_v61 = vpop.permute.xlu0 %832 }
 0x118   : > { %941 = vrot.lane.b32.xlu2 %v3967_v59, %s3339_s17 }
 0x119   : > { %939 = vrot.lane.b32.xlu1 %v3970_v5, %s3339_s17 }
 0x11a   : > { %937 = vrot.lane.b32.xlu0 %v3750_v58, %s3339_s17  ;;  %v3978_v31 = vpop.permute.xlu2 %860 }
 0x11b   : > { %5605 = vst [vmem:[#allocation39_spill] sm:$0xff] %v3978_v31  ;;  %v3980_v52 = vpop.permute.xlu1 %840 }
 0x11c   : > { %5606 = vst [vmem:[#allocation40_spill] sm:$0xff] %v3980_v52  ;;  %v3982_v63 = vpop.permute.xlu0 %838 }
 0x11d   : > { %5607 = vst [vmem:[#allocation41_spill] sm:$0xff] %v3982_v63  ;;  %v4159_v63 = vld [vmem:[%s4094_s30 + $0x30] sm:$0xff] }
 0x11e   : > { %v1510_v10 = vshrl.u32 %v4159_v63, 16 }
 0x120   : > { %970 = vrot.lane.b32.xlu2 %v3547_v43, %s3340_s18 }
 0x121   : > { %968 = vrot.lane.b32.xlu1 %v3499_v57, %s3340_s18 }
 0x122   : > { %966 = vrot.lane.b32.xlu0 %v3465_v33, %s3340_s18  ;;  %v3990_v38 = vpop.permute.xlu2 %871 }
 0x123   : > { %v3992_v58 = vpop.permute.xlu1 %846 }
 0x124   : > { %5608 = vst [vmem:[#allocation42_spill] sm:$0xff] %v3992_v58  ;;  %v3994_v18 = vpop.permute.xlu0 %844 }
 0x125   : > { %5609 = vst [vmem:[#allocation43_spill] sm:$0xff] %v3994_v18  ;;  %v396_v18 = vld [vmem:[%s3425_s11 + $0xc4] sm:$0x1] }
 0x128   : > { %976 = vrot.lane.b32.xlu2 %v3580_v16, %s3340_s18 }
 0x129   : > { %974 = vrot.lane.b32.xlu1 %v3537_v34, %s3340_s18  ;;  %v949_v34 = vshll.u32 %v3970_v5, 16 }
 0x12a   : > { %972 = vrot.lane.b32.xlu0 %v3540_v36, %s3340_s18  ;;  %v4002_v57 = vpop.permute.xlu2 %877 }
 0x12b   : > { %5610 = vst [vmem:[#allocation44_spill] sm:$0xff] %v4002_v57  ;;  %v4004_v43 = vpop.permute.xlu1 %852  ;;  %v951_v1 = vrot.slane %v949_v34, 1  ;;  %v944_v57 = vunpack.c.l.b16 %v396_v18 }
 0x12c   : > { %5611 = vst [vmem:[#allocation45_spill] sm:$0xff] %v4004_v43  ;;  %v4006_v33 = vpop.permute.xlu0 %850 }
 0x12d   : > { %5612 = vst [vmem:[#allocation46_spill] sm:$0xff] %v4006_v33  ;;  %v1328_v33 = vld [vmem:[%s4094_s30 + $0x60] sm:$0x1] }
 0x130   : > { %982 = vrot.lane.b32.xlu2 %v3598_v39, %s3340_s18  ;;  %v954_v39 = vshll.u32 %v3967_v59, 16 }
 0x131   : > { %980 = vrot.lane.b32.xlu1 %v3570_v7, %s3340_s18  ;;  %v952_v7 = vor.u32 %v951_v1, %v947_v42 }
 0x132   : > { %978 = vrot.lane.b32.xlu0 %v3575_v12, %s3340_s18  ;;  %v4015_v16 = vpop.permute.xlu2 %883  ;;  %v956_v12 = vrot.slane %v954_v39, 1 }
 0x133   : > { %5613 = vst [vmem:[#allocation47_spill] sm:$0xff] %v4015_v16  ;;  %v4017_v36 = vpop.permute.xlu1 %858 }
 0x134   : > { %v4019_v58 = vpop.permute.xlu0 %856  ;;  %v957_v18 = vsel %vm501_vm0, %v952_v7, %v956_v12  ;;  %v999_v7 = vrot.slane %v3967_v59, 1 }
 0x135   : > { %5614 = vst [vmem:[#allocation48_spill] sm:$0xff] %v4019_v58  ;;  %v4032_v58 = vpack.c.b16 %v944_v57, %v944_v57 }
 0x137   : > { %v962_v35 = vshll.u32 %v4032_v58, 16 }
 0x138   : > { %988 = vrot.lane.b32.xlu2 %v3614_v56, %s3340_s18  ;;  %v958_v56 = vshrl.u32 %v3967_v59, 16  ;;  %v1308_v59 = vld [vmem:[%s4094_s30 + $0x10] sm:$0x1] }
 0x139   : > { %986 = vrot.lane.b32.xlu1 %v3592_v29, %s3340_s18  ;;  %v964_v1 = vrot.slane %v962_v35, 1 }
 0x13a   : > { %984 = vrot.lane.b32.xlu0 %v3595_v30, %s3340_s18  ;;  %v4030_v16 = vpop.permute.xlu2 %889  ;;  %v960_v30 = vor.u32 %v958_v56, %v956_v12  ;;  %v998_v12 = vrot.slane %v3970_v5, 1 }
 0x13b   : > { %5615 = vst [vmem:[#allocation49_spill] sm:$0xff] %v4030_v16  ;;  %v4034_v52 = vpop.permute.xlu1 %869 }
 0x13c   : > { %v4036_v34 = vpop.permute.xlu0 %862  ;;  %v965_v39 = vsel %vm501_vm0, %v960_v30, %v964_v1 }
 0x13d   : > { %5616 = vst [vmem:[#allocation50_spill] sm:$0xff] %v4036_v34 }
 0x140   : > { %994 = vrot.lane.b32.xlu2 %v957_v18, %s3340_s18 }
 0x141   : > { %992 = vrot.lane.b32.xlu1 %v3836_v28, %s3340_s18 }
 0x142   : > { %990 = vrot.lane.b32.xlu0 %v3820_v44, %s3340_s18  ;;  %v4046_v29 = vpop.permute.xlu2 %895 }
 0x143   : > { %v4048_v42 = vpop.permute.xlu1 %875 }
 0x144   : > { %5617 = vst [vmem:[#allocation51_spill] sm:$0xff] %v4048_v42  ;;  %v4050_v57 = vpop.permute.xlu0 %873  ;;  %v1318_v42 = vld [vmem:[%s4094_s30 + $0x38] sm:$0x1] }
 0x145   : > { %5618 = vst [vmem:[#allocation52_spill] sm:$0xff] %v4050_v57 }
 0x148   : > { %1005 = vrot.lane.b32.xlu2 %v3651_v19, %s3341_s19  ;;  %v4069_v19 = vsel %vm694_vm1, %v998_v12, %v999_v7  ;;  %v4122_v12 = vld [vmem:[%s4094_s30 + $0x1c] sm:$0xff] }
 0x149   : > { %1003 = vrot.lane.b32.xlu1 %v3626_v6, %s3341_s19 }
 0x14a   : > { %996 = vrot.lane.b32.xlu0 %v965_v39, %s3340_s18  ;;  %v4058_v28 = vpop.permute.xlu2 %911 }
 0x14b   : > { %v4060_v44 = vpop.permute.xlu1 %881 }
 0x14c   : > { %5619 = vst [vmem:[#allocation53_spill] sm:$0xff] %v4060_v44  ;;  %v4062_v35 = vpop.permute.xlu0 %879 }
 0x14d   : > { %5620 = vst [vmem:[#allocation54_spill] sm:$0xff] %v4062_v35 }
 0x150   : > { %1011 = vrot.lane.b32.xlu2 %v3671_v26, %s3341_s19 }
 0x151   : > { %1009 = vrot.lane.b32.xlu1 %v3645_v15, %s3341_s19 }
 0x152   : > { %1007 = vrot.lane.b32.xlu0 %v3648_v17, %s3341_s19  ;;  %v4075_v6 = vpop.permute.xlu2 %917 }
 0x153   : > { %5621 = vst [vmem:[#allocation55_spill] sm:$0xff] %v4075_v6  ;;  %v4077_v18 = vpop.permute.xlu1 %887  ;;  %v1490_v6 = vshrl.u32 %v4122_v12, 16 }
 0x154   : > { %5622 = vst [vmem:[#allocation56_spill] sm:$0xff] %v4077_v18  ;;  %v4079_v56 = vpop.permute.xlu0 %885 }
 0x158   : > { %1017 = vrot.lane.b32.xlu2 %v3690_v50, %s3341_s19  ;;  %v4111_v50 = vld [vmem:[%s4094_s30 + $0x8] sm:$0xff] }
 0x159   : > { %1015 = vrot.lane.b32.xlu1 %v3665_v23, %s3341_s19  ;;  %v4101_v23 = vld [vmem:[%s4094_s30] sm:$0xff]  ;;  %5627 = vst [vmem:[#allocation61_spill] sm:$0xff] %v4111_v50 }
 0x15a   : > { %1013 = vrot.lane.b32.xlu0 %v3668_v24, %s3341_s19  ;;  %v4087_v26 = vpop.permute.xlu2 %923  ;;  %5626 = vst [vmem:[#allocation60_spill] sm:$0xff] %v4101_v23  ;;  %v1313_v24 = vld [vmem:[%s4094_s30 + $0x24] sm:$0x1]  ;;  %v1461_v5 = vshll.u32 %v4101_v23, 16  ;;  %v1459_v44 = vshrl.u32 %v4101_v23, 16 }
 0x15b   : > { %5623 = vst [vmem:[#allocation57_spill] sm:$0xff] %v4087_v26  ;;  %v4096_v15 = vpop.permute.xlu1 %893  ;;  %v4125_v26 = vld [vmem:[%s4094_s30 + $0x14] sm:$0xff] }
 0x15c   : > { %5624 = vst [vmem:[#allocation58_spill] sm:$0xff] %v4096_v15  ;;  %v4098_v17 = vpop.permute.xlu0 %891  ;;  %v1466_v15 = vshll.u32 %v4111_v50, 16  ;;  %v1481_v16 = vshll.u32 %v4125_v26, 16 }
 0x15d   : > { %5625 = vst [vmem:[#allocation59_spill] sm:$0xff] %v4098_v17  ;;  %v1486_v17 = vshll.u32 %v4122_v12, 16 }
 0x160   : > { %1023 = vrot.lane.b32.xlu2 %v3705_v55, %s3341_s19  ;;  %v1443_v55 = vunpack.c.l.b16 %v1313_v24 }
 0x161   : > { %1021 = vrot.lane.b32.xlu1 %v3684_v46, %s3341_s19  ;;  %v1442_v46 = vunpack.c.l.b16 %v1308_v59 }
 0x162   : > { %1019 = vrot.lane.b32.xlu0 %v3687_v49, %s3341_s19  ;;  %v4115_v30 = vpop.permute.xlu2 %929  ;;  %v1463_v49 = vrot.slane %v1461_v5, 1  ;;  %v4129_v35 = vpack.c.b16 %v1443_v55, %v1443_v55  ;;  %v1468_v5 = vrot.slane %v1466_v15, 1  ;;  %v1001_v55 = vrot.slane %v4032_v58, 1 }
 0x163   : > { %5628 = vst [vmem:[#allocation62_spill] sm:$0xff] %v4115_v30  ;;  %v4117_v1 = vpop.permute.xlu1 %899  ;;  %v4135_v43 = vpack.c.b16 %v1442_v46, %v1442_v46  ;;  %v1488_v46 = vrot.slane %v1486_v17, 1  ;;  %v1470_v15 = vshrl.u32 %v4111_v50, 16 }
 0x164   : > { %5629 = vst [vmem:[#allocation63_spill] sm:$0xff] %v4117_v1  ;;  %v4119_v39 = vpop.permute.xlu0 %897  ;;  %v1464_v24 = vor.u32 %v1463_v49, %v1459_v44  ;;  %v1483_v44 = vrot.slane %v1481_v16, 1  ;;  %v1002_v17 = vsel %vm694_vm1, %v999_v7, %v1001_v55  ;;  %v4163_v1 = vld [vmem:[%s4094_s30 + $0x28] sm:$0xff]  ;;  %v1506_v7 = vshll.u32 %v4159_v63, 16 }
 0x165   : > { %5630 = vst [vmem:[#allocation64_spill] sm:$0xff] %v4119_v39  ;;  %v1474_v49 = vshll.u32 %v4135_v43, 16  ;;  %v1444_v39 = vunpack.c.l.b16 %v1318_v42  ;;  %v1492_v30 = vor.u32 %v1490_v6, %v1488_v46  ;;  %v1472_v34 = vor.u32 %v1470_v15, %v1468_v5  ;;  %v1323_v6 = vld [vmem:[%s4094_s30 + $0x4c] sm:$0x1]  ;;  %v4186_v15 = vld [vmem:[%s4094_s30 + $0x58] sm:$0xff] }
 0x166   : > { %v1469_v58 = vsel %vm501_vm0, %v1464_v24, %v1468_v5  ;;  %v4171_v24 = vld [vmem:[%s4094_s30 + $0x44] sm:$0xff]  ;;  %v1501_v5 = vshll.u32 %v4163_v1, 16 }
 0x167   : > { %v1476_v31 = vrot.slane %v1474_v49, 1  ;;  %5634 = vst [vmem:[#allocation68_spill] sm:$0xff] %v4171_v24 }
 0x168   : > { %1029 = vrot.lane.b32.xlu2 %v3901_v9, %s3341_s19 }
 0x169   : > { %1027 = vrot.lane.b32.xlu1 %v3904_v27, %s3341_s19  ;;  %v1494_v27 = vshll.u32 %v4129_v35, 16 }
 0x16a   : > { %1025 = vrot.lane.b32.xlu0 %v3702_v54, %s3341_s19  ;;  %v4141_v59 = vpop.permute.xlu2 %935  ;;  %v1479_v54 = vshrl.u32 %v4125_v26, 16 }
 0x16b   : > { %5631 = vst [vmem:[#allocation65_spill] sm:$0xff] %v4141_v59  ;;  %v4144_v9 = vpop.permute.xlu1 %915  ;;  %v4156_v59 = vld [vmem:[%s4094_s30 + $0x3c] sm:$0xff]  ;;  %v1496_v16 = vrot.slane %v1494_v27, 1  ;;  %v4178_v27 = vpack.c.b16 %v1444_v39, %v1444_v39  ;;  %v1445_v39 = vunpack.c.l.b16 %v1323_v6 }
 0x16c   : > { %5632 = vst [vmem:[#allocation66_spill] sm:$0xff] %v4144_v9  ;;  %v4146_v51 = vpop.permute.xlu0 %913  ;;  %v1484_v18 = vor.u32 %v1483_v44, %v1479_v54  ;;  %v1521_v42 = vshll.u32 %v4156_v59, 16  ;;  %v1519_v32 = vshrl.u32 %v4156_v59, 16 }
 0x16d   : > { %5633 = vst [vmem:[#allocation67_spill] sm:$0xff] %v4156_v59  ;;  %v4189_v49 = vsel %vm501_vm0, %v1492_v30, %v1496_v16  ;;  %v1499_v30 = vshrl.u32 %v4163_v1, 16  ;;  %v1503_v16 = vrot.slane %v1501_v5, 1  ;;  %v1550_v59 = vshrl.u32 %v4186_v15, 16 }
 0x16e   : > { %v1523_v41 = vrot.slane %v1521_v42, 1 }
 0x16f   : > { %v1504_v21 = vor.u32 %v1503_v16, %v1499_v30  ;;  %v4230_v30 = vld [vmem:[%s4094_s30 + $0x78] sm:$0xff]  ;;  %v4233_v16 = vld [vmem:[%s4094_s30 + $0x6c] sm:$0xff] }
 0x170   : > { %1618 = vrot.lane.b32.xlu2 %v1469_v58, %s3334_s12  ;;  %v4192_v58 = vsel %vm501_vm0, %v1484_v18, %v1488_v46  ;;  %v4209_v46 = vpack.c.b16 %v1445_v39, %v1445_v39  ;;  %v1524_v42 = vor.u32 %v1523_v41, %v1519_v32  ;;  %v1570_v11 = vshrl.u32 %v4233_v16, 16 }
 0x171   : > { %1033 = vrot.lane.b32.xlu1 %v1002_v17, %s3341_s19  ;;  %v1477_v17 = vsel %vm501_vm0, %v1472_v34, %v1476_v31  ;;  %v1546_v31 = vshll.u32 %v4186_v15, 16 }
 0x172   : > { %1031 = vrot.lane.b32.xlu0 %v4069_v19, %s3341_s19  ;;  %v4176_v55 = vpop.permute.xlu2 %941  ;;  %v1446_v19 = vunpack.c.l.b16 %v1328_v33  ;;  %v1514_v33 = vshll.u32 %v4178_v27, 16  ;;  %5640 = vst [vmem:[#allocation74_spill] sm:$0xff] %v4209_v46 }
 0x173   : > { %5635 = vst [vmem:[#allocation69_spill] sm:$0xff] %v4176_v55  ;;  %v4181_v54 = vpop.permute.xlu1 %921  ;;  %v4196_v55 = vld [vmem:[%s4094_s30 + $0x50] sm:$0xff]  ;;  %v1548_v39 = vrot.slane %v1546_v31, 1 }
 0x174   : > { %5636 = vst [vmem:[#allocation70_spill] sm:$0xff] %v4181_v54  ;;  %v4183_v44 = vpop.permute.xlu0 %919  ;;  %v1526_v54 = vshll.u32 %v4171_v24, 16  ;;  %v4203_v18 = vpack.c.b16 %v1446_v19, %v1446_v19  ;;  %v1541_v34 = vshll.u32 %v4196_v55, 16  ;;  %v1516_v19 = vrot.slane %v1514_v33, 1 }
 0x175   : > { %5637 = vst [vmem:[#allocation71_spill] sm:$0xff] %v4183_v44  ;;  %v1508_v44 = vrot.slane %v1506_v7, 1  ;;  %v1539_v41 = vshrl.u32 %v4196_v55, 16 }
 0x176   : > { %5638 = vst [vmem:[#allocation72_spill] sm:$0xff] %v4196_v55  ;;  %v1528_v7 = vrot.slane %v1526_v54, 1  ;;  %v1554_v57 = vshll.u32 %v4203_v18, 16  ;;  %v1543_v32 = vrot.slane %v1541_v34, 1  ;;  %v1530_v54 = vshrl.u32 %v4171_v24, 16  ;;  %v4242_v34 = vld [vmem:[%s4094_s30 + $0x64] sm:$0xff] }
 0x177   : > { %5639 = vst [vmem:[#allocation73_spill] sm:$0xff] %v4203_v18  ;;  %v1512_v5 = vor.u32 %v1510_v10, %v1508_v44  ;;  %v1534_v10 = vshll.u32 %v4209_v46, 16  ;;  %v1552_v24 = vor.u32 %v1550_v59, %v1548_v39 }
 0x178   : > { %1624 = vrot.lane.b32.xlu2 %v4189_v49, %s3334_s12  ;;  %v4227_v33 = vsel %vm501_vm0, %v1524_v42, %v1528_v7  ;;  %v1556_v46 = vrot.slane %v1554_v57, 1  ;;  %v1544_v42 = vor.u32 %v1543_v32, %v1539_v41  ;;  %v1532_v18 = vor.u32 %v1530_v54, %v1528_v7 }
 0x179   : > { %1622 = vrot.lane.b32.xlu1 %v4192_v58, %s3334_s12  ;;  %5643 = vst [vmem:[#allocation77_spill] sm:$0xff] %v4227_v33  ;;  %v4236_v31 = vsel %vm501_vm0, %v1512_v5, %v1516_v19  ;;  %v1536_v0 = vrot.slane %v1534_v10, 1  ;;  %v4251_v5 = vld [vmem:[%s4094_s30 + $0x80] sm:$0xff]  ;;  %v1561_v57 = vshll.u32 %v4242_v34, 16  ;;  %v1579_v10 = vshrl.u32 %v4230_v30, 16 }
 0x17a   : > { %1620 = vrot.lane.b32.xlu0 %v1477_v17, %s3334_s12  ;;  %v4214_v6 = vpop.permute.xlu2 %970  ;;  %v1333_v17 = vld [vmem:[%s4094_s30 + $0x74] sm:$0x1]  ;;  %v4265_v41 = vsel %vm501_vm0, %v1552_v24, %v1556_v46  ;;  %v4268_v32 = vsel %vm501_vm0, %v1544_v42, %v1548_v39 }
 0x17b   : > { %5641 = vst [vmem:[#allocation75_spill] sm:$0xff] %v4214_v6  ;;  %v4216_v40 = vpop.permute.xlu1 %927  ;;  %v1447_v6 = vunpack.c.l.b16 %v1333_v17  ;;  %v4271_v54 = vsel %vm501_vm0, %v1532_v18, %v1536_v0  ;;  %v1563_v24 = vrot.slane %v1561_v57, 1 }
 0x17c   : > { %v4218_v9 = vpop.permute.xlu0 %925  ;;  %5647 = vst [vmem:[#allocation81_spill] sm:$0xff] %v4265_v41 }
 0x17d   : > { %5642 = vst [vmem:[#allocation76_spill] sm:$0xff] %v4218_v9  ;;  %v4239_v9 = vsel %vm501_vm0, %v1504_v21, %v1508_v44  ;;  %v1581_v21 = vshll.u32 %v4230_v30, 16  ;;  %v1566_v44 = vshll.u32 %v4233_v16, 16  ;;  %v4257_v19 = vpack.c.b16 %v1447_v6, %v1447_v6 }
 0x17e   : > { %5648 = vst [vmem:[#allocation82_spill] sm:$0xff] %v4268_v32  ;;  %v1586_v6 = vshll.u32 %v4251_v5, 16 }
 0x17f   : > { %5649 = vst [vmem:[#allocation83_spill] sm:$0xff] %v4271_v54 }
 0x180   : > { %1630 = vrot.lane.b32.xlu2 %v4227_v33, %s3334_s12  ;;  %v1568_v33 = vrot.slane %v1566_v44, 1  ;;  %v4284_v18 = vrot.slane %v1586_v6, 1  ;;  %v1650_v6 = vrot.slane %v4101_v23, 1 }
 0x181   : > { %1628 = vrot.lane.b32.xlu1 %v4236_v31, %s3334_s12 }
 0x182   : > { %1626 = vrot.lane.b32.xlu0 %v4239_v9, %s3334_s12  ;;  %v4255_v59 = vpop.permute.xlu2 %976  ;;  %v1572_v39 = vor.u32 %v1570_v11, %v1568_v33 }
 0x183   : > { %5644 = vst [vmem:[#allocation78_spill] sm:$0xff] %v4255_v59  ;;  %v4260_v7 = vpop.permute.xlu1 %933  ;;  %v1583_v59 = vrot.slane %v1581_v21, 1 }
 0x184   : > { %5645 = vst [vmem:[#allocation79_spill] sm:$0xff] %v4260_v7  ;;  %v4262_v17 = vpop.permute.xlu0 %931  ;;  %v1574_v7 = vshll.u32 %v4257_v19, 16 }
 0x185   : > { %5646 = vst [vmem:[#allocation80_spill] sm:$0xff] %v4262_v17  ;;  %v1559_v17 = vshrl.u32 %v4242_v34, 16  ;;  %v1584_v0 = vor.u32 %v1583_v59, %v1579_v10 }
 0x186   : > { %v1576_v42 = vrot.slane %v1574_v7, 1 }
 0x187   : > { %v1564_v21 = vor.u32 %v1563_v24, %v1559_v17 }
 0x188   : > { %1636 = vrot.lane.b32.xlu2 %v4265_v41, %s3334_s12  ;;  %v1303_v41 = vld [vmem:[%s5545_s2 + $0x10] sm:$0x3]  ;;  %v4300_v10 = vsel %vm501_vm0, %v1572_v39, %v1576_v42  ;;  %v3184_v39 = vld [vmem:[%s5545_s2 + $0x8] sm:$0xff] }
 0x189   : > { %1634 = vrot.lane.b32.xlu1 %v4268_v32, %s3334_s12  ;;  %v4297_v32 = vsel %vm501_vm0, %v1584_v0, %v4284_v18  ;;  %v2401_v59 = vunpack.c.l.b16 %v1303_v41  ;;  %v4303_v11 = vsel %vm501_vm0, %v1564_v21, %v1568_v33  ;;  %v1651_v33 = vrot.slane %v4111_v50, 1  ;;  %v3183_v21 = vld [vmem:[%s5545_s2] sm:$0xff] }
 0x18a   : > { %1632 = vrot.lane.b32.xlu0 %v4271_v54, %s3334_s12  ;;  %v4286_v46 = vpop.permute.xlu2 %982  ;;  %v1661_v50 = vrot.slane %v4159_v63, 1 }
 0x18b   : > { %v4288_v44 = vpop.permute.xlu1 %939  ;;  %v2404_v7 = vpack.c.b16 %v2401_v59, %v2401_v59  ;;  %v1652_v42 = vsel %vm694_vm1, %v1650_v6, %v1651_v33 }
 0x18c   : > { %v4290_v57 = vpop.permute.xlu0 %937 }
 0x18d   : > { %v2440_v17 = vsel %vm2299_vm2, %v2404_v7, 0  ;;  %v1655_v7 = vrot.slane %v4125_v26, 1 }
 0x18e   : > { %2447 = vmatpush.bf16.msra.mxu1 %v2440_v17  ;;  %3210 = vmatpush.bf16.msra.mxu3 %v2440_v17  ;;  %v1656_v17 = vrot.slane %v4122_v12, 1 }
 0x190   : > { %1642 = vrot.lane.b32.xlu2 %v4297_v32, %s3334_s12 }
 0x191   : > { %1640 = vrot.lane.b32.xlu1 %v4300_v10, %s3334_s12 }
 0x192   : > { %1638 = vrot.lane.b32.xlu0 %v4303_v11, %s3334_s12  ;;  %v4312_v41 = vpop.permute.xlu2 %988  ;;  %2448 = vmatpush.bf16.msra.mxu1 %v3184_v39 }
 0x193   : > { %5650 = vst [vmem:[#allocation84_spill] sm:$0xff] %v4312_v41  ;;  %v4316_v24 = vpop.permute.xlu1 %968  ;;  %3211 = vmatpush.bf16.msra.mxu3 %v3184_v39  ;;  %v4341_v39 = vsel %vm694_vm1, %v1655_v7, %v1656_v17 }
 0x194   : > { %v4318_v0 = vpop.permute.xlu0 %966 }
 0x196   : > { %2449 = vmatpush.bf16.msra.mxu1 %v3183_v21 }
 0x197   : > { %3212 = vmatpush.bf16.msra.mxu3 %v3183_v21  ;;  %v1660_v21 = vrot.slane %v4163_v1, 1 }
 0x198   : > { %1787 = vrot.lane.b32.xlu2 %v4192_v58, %s3337_s15 }
 0x199   : > { %1732 = vrot.lane.b32.xlu1 %v4125_v26, %s3336_s14  ;;  %v4360_v54 = vsel %vm694_vm1, %v1660_v21, %v1661_v50  ;;  %v3264_v21 = vld [vmem:[%s3425_s11] sm:$0xff] }
 0x19a   : > { %1690 = vrot.lane.b32.xlu0 %v1652_v42, %s3335_s13  ;;  %v4332_v59 = vpop.permute.xlu2 %994  ;;  %v1653_v42 = vrot.slane %v4135_v43, 1 }
 0x19b   : > { %v4336_v6 = vpop.permute.xlu1 %974 }
 0x19c   : > { %5651 = vst [vmem:[#allocation85_spill] sm:$0xff] %v4336_v6  ;;  %v4338_v58 = vpop.permute.xlu0 %972  ;;  %v1654_v41 = vsel %vm694_vm1, %v1651_v33, %v1653_v42  ;;  %v1663_v42 = vrot.slane %v4178_v27, 1 }
 0x1a0   : > { %1921 = vrot.lane.b32.xlu2 %v4239_v9, %s3340_s18 }
 0x1a1   : > { %1866 = vrot.lane.b32.xlu1 %v4163_v1, %s3339_s17 }
 0x1a2   : > { %1824 = vrot.lane.b32.xlu0 %v4341_v39, %s3338_s16  ;;  %v4349_v26 = vpop.permute.xlu2 %1005 }
 0x1a3   : > { %v4354_v23 = vpop.permute.xlu1 %980 }
 0x1a4   : > { %5652 = vst [vmem:[#allocation86_spill] sm:$0xff] %v4354_v23  ;;  %v4356_v7 = vpop.permute.xlu0 %978  ;;  %v1658_v23 = vrot.slane %v4129_v35, 1  ;;  %v1671_v35 = vrot.slane %v4186_v15, 1 }
 0x1a5   : > { %5653 = vst [vmem:[#allocation87_spill] sm:$0xff] %v4356_v7 }
 0x1a6   : > { %v4375_v33 = vsel %vm694_vm1, %v1656_v17, %v1658_v23 }
 0x1a8   : > { %1734 = vrot.lane.b32.xlu2 %v4122_v12, %s3336_s14  ;;  %v1670_v12 = vrot.slane %v4196_v55, 1 }
 0x1a9   : > { %1692 = vrot.lane.b32.xlu1 %v1654_v41, %s3335_s13 }
 0x1aa   : > { %1958 = vrot.lane.b32.xlu0 %v4360_v54, %s3341_s19  ;;  %v4367_v43 = vpop.permute.xlu2 %1011 }
 0x1ab   : > { %5654 = vst [vmem:[#allocation88_spill] sm:$0xff] %v4367_v43  ;;  %v4370_v6 = vpop.permute.xlu1 %986  ;;  %v1037_v43 = vsel %vm1035_vm3, %v3264_v21, %v3747_v47 }
 0x1ac   : > { %v4372_v7 = vpop.permute.xlu0 %984  ;;  %v1070_v55 = vsel %vm1068_vm5, %v1037_v43, %v3815_v2  ;;  %v1675_v2 = vrot.slane %v4242_v34, 1 }
 0x1ad   : > { %v1103_v27 = vsel %vm1101_vm4, %v1070_v55, %v3844_v60  ;;  %v1676_v60 = vrot.slane %v4233_v16, 1 }
 0x1ae   : > { %v1136_v47 = vsel %vm1134_vm6, %v1103_v27, %v3964_v61 }
 0x1b0   : > { %1868 = vrot.lane.b32.xlu2 %v4159_v63, %s3339_s17 }
 0x1b1   : > { %1826 = vrot.lane.b32.xlu1 %v4375_v33, %s3338_s16 }
 0x1b2   : > { %1789 = vrot.lane.b32.xlu0 %v4189_v49, %s3337_s15  ;;  %v4385_v41 = vpop.permute.xlu2 %1017  ;;  %v4396_v49 = vsel %vm694_vm1, %v1670_v12, %v1671_v35  ;;  %v1169_v12 = vsel %vm1167_vm8, %v1136_v47, %v4034_v52 }
 0x1b3   : > { %5655 = vst [vmem:[#allocation89_spill] sm:$0xff] %v4385_v41  ;;  %v993_v23 = vpop.permute.xlu1 %992  ;;  %v4401_v41 = vsel %vm694_vm1, %v1661_v50, %v1663_v42  ;;  %v1202_v61 = vsel %vm1200_vm7, %v1169_v12, %v4058_v28  ;;  %v3265_v42 = vld [vmem:[%s3425_s11 + $0x80] sm:$0xff] }
 0x1b4   : > { %v4388_v17 = vpop.permute.xlu0 %990  ;;  %v1235_v52 = vsel %vm1233_vm9, %v1202_v61, %v4318_v0  ;;  %v1063_v21 = vsel %vm1035_vm3, %v3265_v42, %v3800_v25  ;;  %v4435_v0 = vsel %vm694_vm1, %v1675_v2, %v1676_v60 }
 0x1b5   : > { %v1096_v28 = vsel %vm1068_vm5, %v1063_v21, %v3829_v45 }
 0x1b6   : > { %v1129_v47 = vsel %vm1101_vm4, %v1096_v28, %v3952_v8  ;;  %v3267_v28 = vld [vmem:[%s3425_s11 + $0x50] sm:$0xff] }
 0x1b7   : > { %v1162_v12 = vsel %vm1134_vm6, %v1129_v47, %v4017_v36 }
 0x1b8   : > { %1706 = vrot.lane.b32.xlu2 %v4396_v49, %s3335_s13  ;;  %v1195_v25 = vsel %vm1167_vm8, %v1162_v12, %v4046_v29 }
 0x1b9   : > { %1960 = vrot.lane.b32.xlu1 %v4401_v41, %s3341_s19  ;;  %v1228_v45 = vsel %vm1200_vm7, %v1195_v25, %v4290_v57 }
 0x1ba   : > { %1923 = vrot.lane.b32.xlu0 %v4236_v31, %s3340_s18  ;;  %v4419_v50 = vpop.permute.xlu2 %1023  ;;  %v1261_v8 = vsel %vm1233_vm9, %v1228_v45, %v993_v23 }
 0x1bb   : > { %v1004_v55 = vpop.permute.xlu1 %1003 }
 0x1bc   : > { %v4423_v43 = vpop.permute.xlu0 %996  ;;  %v1268_v27 = vsel %vm1266_vm11, %v1235_v52, %v1004_v55  ;;  %v3266_v52 = vld [vmem:[%s3425_s11 + $0x8] sm:$0xff] }
 0x1bd   : > { %3145 = vmatmul.msk.bf16.vlgmr.msra.gmra.mxu1 %vm2266_vm10, %v1268_v27  ;;  %v1039_v55 = vsel %vm1035_vm3, %v3266_v52, %v3765_v13  ;;  %v5657_v52 = vld [vmem:[#allocation32_spill] sm:$0xff] }
 0x1be   : > { %v1072_v57 = vsel %vm1068_vm5, %v1039_v55, %v3773_v14  ;;  %v5658_v55 = vld [vmem:[#allocation77_spill] sm:$0xff] }
 0x1c0   : > { %1840 = vrot.lane.b32.xlu2 %v4435_v0, %s3338_s16 }
 0x1c1   : > { %1803 = vrot.lane.b32.xlu1 %v4303_v11, %s3337_s15 }
 0x1c2   : > { %1748 = vrot.lane.b32.xlu0 %v4242_v34, %s3336_s14  ;;  %v1030_v2 = vpop.permute.xlu2 %1029  ;;  %v1105_v34 = vsel %vm1101_vm4, %v1072_v57, %v3898_v20  ;;  %v1680_v20 = vrot.slane %v4230_v30, 1  ;;  %v5659_v57 = vld [vmem:[#allocation52_spill] sm:$0xff] }
 0x1c3   : > { %v4452_v61 = vpop.permute.xlu1 %1009  ;;  %v4455_v29 = vsel %vm1266_vm11, %v1261_v8, %v1030_v2  ;;  %v1138_v23 = vsel %vm1134_vm6, %v1105_v34, %v3962_v48  ;;  %v1681_v48 = vrot.slane %v4251_v5, 1 }
 0x1c4   : > { %v1008_v36 = vpop.permute.xlu0 %1007  ;;  %v1171_v42 = vsel %vm1167_vm8, %v1138_v23, %v3990_v38 }
 0x1c5   : > { %v1204_v13 = vsel %vm1200_vm7, %v1171_v42, %v4146_v51  ;;  %v1053_v51 = vsel %vm1035_vm3, %v3267_v28, %v3735_v3 }
 0x1c6   : > { %v1086_v47 = vsel %vm1068_vm5, %v1053_v51, %v3860_v62  ;;  %v3269_v51 = vld [vmem:[%s3425_s11 + $0x58] sm:$0xff] }
 0x1c7   : > { %v1119_v12 = vsel %vm1101_vm4, %v1086_v47, %v3926_v53  ;;  %v5664_v47 = vld [vmem:[#allocation11_spill] sm:$0xff] }
 0x1c8   : > { %1694 = vrot.lane.b32.xlu2 %v4341_v39, %s3335_s13  ;;  %v1237_v39 = vsel %vm1233_vm9, %v1204_v13, %v4316_v24  ;;  %v4497_v24 = vsel %vm694_vm1, %v1680_v20, %v1681_v48  ;;  %v5662_v13 = vld [vmem:[#allocation73_spill] sm:$0xff] }
 0x1c9   : > { %1937 = vrot.lane.b32.xlu1 %v4297_v32, %s3340_s18  ;;  %v1270_v27 = vsel %vm1266_vm11, %v1237_v39, %v4349_v26  ;;  %v1152_v26 = vsel %vm1134_vm6, %v1119_v12, %v3948_v37  ;;  %v1673_v20 = vrot.slane %v5662_v13, 1  ;;  %v1055_v12 = vsel %vm1035_vm3, %v3269_v51, %v5664_v47  ;;  %v5671_v51 = vld [vmem:[#allocation26_spill] sm:$0xff] }
 0x1ca   : > { %1882 = vrot.lane.b32.xlu0 %v4230_v30, %s3339_s17  ;;  %v4476_v14 = vpop.permute.xlu2 %1618  ;;  %v1185_v3 = vsel %vm1167_vm8, %v1152_v26, %v4079_v56  ;;  %v3268_v56 = vld [vmem:[%s3425_s11 + $0x14] sm:$0xff]  ;;  %v5665_v26 = vld [vmem:[#allocation75_spill] sm:$0xff] }
 0x1cb   : > { %v4482_v21 = vpop.permute.xlu1 %1015  ;;  %v1218_v62 = vsel %vm1200_vm7, %v1185_v3, %v4216_v40  ;;  %v5656_v40 = vld [vmem:[#allocation28_spill] sm:$0xff] }
 0x1cc   : > { %v4484_v38 = vpop.permute.xlu0 %1013  ;;  %v1251_v53 = vsel %vm1233_vm9, %v1218_v62, %v4286_v46 }
 0x1cd   : > { %3146 = vmatmul.msk.bf16.gmra.mxu1 %vm2266_vm10, %v1270_v27  ;;  %v5663_v27 = vld [vmem:[#allocation68_spill] sm:$0xff] }
 0x1ce   : > { %v1666_v28 = vrot.slane %v5663_v27, 1 }
 0x1d0   : > { %1791 = vrot.lane.b32.xlu2 %v4239_v9, %s3337_s15 }
 0x1d1   : > { %1736 = vrot.lane.b32.xlu1 %v4163_v1, %s3336_s14  ;;  %v1041_v1 = vsel %vm1035_vm3, %v3268_v56, %v3745_v4  ;;  %v5660_v4 = vld [vmem:[#allocation67_spill] sm:$0xff] }
 0x1d2   : > { %1974 = vrot.lane.b32.xlu0 %v4497_v24, %s3341_s19  ;;  %v4513_v25 = vpop.permute.xlu2 %1624  ;;  %v1074_v8 = vsel %vm1068_vm5, %v1041_v1, %v3833_v22  ;;  %v5661_v22 = vld [vmem:[#allocation66_spill] sm:$0xff]  ;;  %v1665_v39 = vrot.slane %v5660_v4, 1  ;;  %v5666_v56 = vld [vmem:[#allocation15_spill] sm:$0xff] }
 0x1d3   : > { %v1022_v37 = vpop.permute.xlu1 %1021  ;;  %v1107_v2 = vsel %vm1101_vm4, %v1074_v8, %v5656_v40  ;;  %v5667_v8 = vld [vmem:[#allocation20_spill] sm:$0xff] }
 0x1d4   : > { %v1020_v45 = vpop.permute.xlu0 %1019  ;;  %v1140_v46 = vsel %vm1134_vm6, %v1107_v2, %v5657_v52  ;;  %v1088_v40 = vsel %vm1068_vm5, %v1055_v12, %v5667_v8  ;;  %v3271_v52 = vld [vmem:[%s3425_s11 + $0x8c] sm:$0xff]  ;;  %v4572_v12 = vsel %vm694_vm1, %v1671_v35, %v1673_v20  ;;  %v5674_v8 = vld [vmem:[#allocation46_spill] sm:$0xff] }
 0x1d5   : > { %v1284_v9 = vsel %vm1266_vm11, %v1251_v53, %v1020_v45  ;;  %v1173_v34 = vsel %vm1167_vm8, %v1140_v46, %v5659_v57  ;;  %v1338_v45 = vld [vmem:[%s4094_s30 + $0x88] sm:$0x1]  ;;  %v5668_v46 = vld [vmem:[#allocation5_spill] sm:$0xff]  ;;  %v5676_v35 = vld [vmem:[#allocation50_spill] sm:$0xff] }
 0x1d6   : > { %3153 = vmatmul.msk.bf16.vlgmr.msra.gmra.mxu3 %vm2266_vm10, %v1284_v9  ;;  %v1206_v23 = vsel %vm1200_vm7, %v1173_v34, %v5661_v22  ;;  %v3270_v9 = vld [vmem:[%s3425_s11 + $0x94] sm:$0xff]  ;;  %v1065_v57 = vsel %vm1035_vm3, %v3271_v52, %v5668_v46 }
 0x1d7   : > { %v1239_v3 = vsel %vm1233_vm9, %v1206_v23, %v5665_v26  ;;  %v1067_v1 = vsel %vm1035_vm3, %v3270_v9, %v5666_v56  ;;  %v5669_v34 = vld [vmem:[#allocation24_spill] sm:$0xff]  ;;  %v5670_v23 = vld [vmem:[#allocation25_spill] sm:$0xff]  ;;  %v1098_v47 = vsel %vm1068_vm5, %v1065_v57, %v5671_v51  ;;  %v1448_v26 = vunpack.c.l.b16 %v1338_v45  ;;  %v5678_v45 = vld [vmem:[#allocation62_spill] sm:$0xff] }
 0x1d8   : > { %1925 = vrot.lane.b32.xlu2 %v5658_v55, %s3340_s18  ;;  %v1272_v2 = vsel %vm1266_vm11, %v1239_v3, %v1008_v36  ;;  %v1121_v22 = vsel %vm1101_vm4, %v1088_v40, %v5669_v34  ;;  %v1100_v13 = vsel %vm1068_vm5, %v1067_v1, %v5670_v23  ;;  %v4577_v36 = vsel %vm694_vm1, %v1665_v39, %v1666_v28  ;;  %v5672_v3 = vld [vmem:[#allocation29_spill] sm:$0xff]  ;;  %v5677_v46 = vld [vmem:[#allocation56_spill] sm:$0xff]  ;;  %v5679_v34 = vld [vmem:[#allocation63_spill] sm:$0xff] }
 0x1d9   : > { %1870 = vrot.lane.b32.xlu1 %v5660_v4, %s3339_s17  ;;  %v1133_v9 = vsel %vm1101_vm4, %v1100_v13, %v5672_v3  ;;  %v5673_v56 = vld [vmem:[#allocation37_spill] sm:$0xff]  ;;  %v1154_v40 = vsel %vm1134_vm6, %v1121_v22, %v5674_v8  ;;  %v5680_v13 = vld [vmem:[#allocation64_spill] sm:$0xff] }
 0x1da   : > { %1828 = vrot.lane.b32.xlu0 %v4360_v54, %s3338_s16  ;;  %v4538_v42 = vpop.permute.xlu2 %1630  ;;  %v1131_v1 = vsel %vm1101_vm4, %v1098_v47, %v5673_v56  ;;  %v1166_v20 = vsel %vm1134_vm6, %v1133_v9, %v5676_v35  ;;  %v1187_v39 = vsel %vm1167_vm8, %v1154_v40, %v5677_v46  ;;  %v5681_v51 = vld [vmem:[#allocation69_spill] sm:$0xff]  ;;  %v1678_v56 = vrot.slane %v4257_v19, 1 }
 0x1db   : > { %v4548_v62 = vpop.permute.xlu1 %1027  ;;  %v1220_v57 = vsel %vm1200_vm7, %v1187_v39, %v5678_v45  ;;  %v1199_v23 = vsel %vm1167_vm8, %v1166_v20, %v5679_v34  ;;  %v3272_v19 = vld [vmem:[%s3425_s11 + $0x1c] sm:$0xff] }
 0x1dc   : > { %v4550_v53 = vpop.permute.xlu0 %1025  ;;  %v1232_v47 = vsel %vm1200_vm7, %v1199_v23, %v5681_v51  ;;  %v1253_v40 = vsel %vm1233_vm9, %v1220_v57, %v4372_v7  ;;  %v5683_v7 = vld [vmem:[#allocation16_spill] sm:$0xff]  ;;  %v5684_v57 = vld [vmem:[#allocation19_spill] sm:$0xff]  ;;  %v5685_v23 = vld [vmem:[#allocation41_spill] sm:$0xff] }
 0x1dd   : > { %3147 = vmatmul.msk.bf16.gmra.mxu1 %vm2266_vm10, %v1272_v2  ;;  %v5675_v2 = vld [vmem:[#allocation39_spill] sm:$0xff]  ;;  %v1286_v20 = vsel %vm1266_vm11, %v1253_v40, %v1022_v37  ;;  %v1590_v37 = vshrl.u32 %v4251_v5, 16 }
 0x1de   : > { %v1164_v52 = vsel %vm1134_vm6, %v1131_v1, %v5675_v2  ;;  %v1456_v1 = vpack.c.b16 %v1448_v26, %v1448_v26  ;;  %v1265_v2 = vsel %vm1233_vm9, %v1232_v47, %v4423_v43  ;;  %v5682_v26 = vld [vmem:[#allocation6_spill] sm:$0xff]  ;;  %v4632_v43 = vsel %vm694_vm1, %v1676_v60, %v1678_v56  ;;  %v5687_v60 = vld [vmem:[#allocation55_spill] sm:$0xff] }
 0x1df   : > { %v1197_v22 = vsel %vm1167_vm8, %v1164_v52, %v5680_v13  ;;  %v1592_v56 = vor.u32 %v1590_v37, %v4284_v18 }
 0x1e0   : > { %1750 = vrot.lane.b32.xlu2 %v4233_v16, %s3336_s14  ;;  %v1230_v3 = vsel %vm1200_vm7, %v1197_v22, %v4288_v44  ;;  %v1594_v45 = vshll.u32 %v1456_v1, 16  ;;  %v5686_v22 = vld [vmem:[#allocation51_spill] sm:$0xff]  ;;  %v1683_v16 = vrot.slane %v1456_v1, 1  ;;  %v2250_v1 = vld [vmem:[%s5546_s3 + $0x10] sm:$0x3] }
 0x1e1   : > { %1708 = vrot.lane.b32.xlu1 %v4572_v12, %s3335_s13  ;;  %v1263_v8 = vsel %vm1233_vm9, %v1230_v3, %v4332_v59  ;;  %v1043_v59 = vsel %vm1035_vm3, %v3272_v19, %v5682_v26  ;;  %v5688_v19 = vld [vmem:[#allocation10_spill] sm:$0xff] }
 0x1e2   : > { %1962 = vrot.lane.b32.xlu0 %v4577_v36, %s3341_s19  ;;  %v4607_v9 = vpop.permute.xlu2 %1636  ;;  %v1076_v39 = vsel %vm1068_vm5, %v1043_v59, %v5683_v7  ;;  %v4670_v18 = vsel %vm694_vm1, %v1681_v48, %v1683_v16  ;;  %v5689_v59 = vld [vmem:[#allocation14_spill] sm:$0xff]  ;;  %v5692_v48 = vld [vmem:[#allocation49_spill] sm:$0xff] }
 0x1e3   : > { %v1034_v52 = vpop.permute.xlu1 %1033  ;;  %v1109_v34 = vsel %vm1101_vm4, %v1076_v39, %v5684_v57  ;;  %v5690_v39 = vld [vmem:[#allocation36_spill] sm:$0xff]  ;;  %v5691_v57 = vld [vmem:[#allocation45_spill] sm:$0xff] }
 0x1e4   : > { %v1032_v35 = vpop.permute.xlu0 %1031  ;;  %v4621_v46 = vsel %vm1266_vm11, %v1265_v2, %v1034_v52  ;;  %v1142_v13 = vsel %vm1134_vm6, %v1109_v34, %v5685_v23 }
 0x1e5   : > { %v4618_v44 = vsel %vm1266_vm11, %v1263_v8, %v1032_v35  ;;  %v1175_v51 = vsel %vm1167_vm8, %v1142_v13, %v5686_v22  ;;  %v1596_v8 = vrot.slane %v1594_v45, 1  ;;  %v5693_v22 = vld [vmem:[#allocation80_spill] sm:$0xff] }
 0x1e6   : > { %3154 = vmatmul.msk.bf16.gmra.mxu3 %vm2266_vm10, %v1286_v20  ;;  %v1208_v47 = vsel %vm1200_vm7, %v1175_v51, %v5687_v60  ;;  %v3273_v20 = vld [vmem:[%s3425_s11 + $0x64] sm:$0xff] }
 0x1e7   : > { %v1241_v40 = vsel %vm1233_vm9, %v1208_v47, %v4338_v58  ;;  %v1057_v26 = vsel %vm1035_vm3, %v3273_v20, %v5688_v19  ;;  %v2260_v58 = vunpack.c.l.b16 %v2250_v1  ;;  %v5695_v20 = vld [vmem:[#allocation9_spill] sm:$0xff]  ;;  %v5696_v19 = vld [vmem:[#allocation31_spill] sm:$0xff] }
 0x1e8   : > { %1884 = vrot.lane.b32.xlu2 %v4251_v5, %s3339_s17  ;;  %v1274_v35 = vsel %vm1266_vm11, %v1241_v40, %v4452_v61  ;;  %v1090_v7 = vsel %vm1068_vm5, %v1057_v26, %v5689_v59  ;;  %v4675_v61 = vsel %vm501_vm0, %v1592_v56, %v1596_v8  ;;  %v3206_v8 = vld [vmem:[%s5546_s3 + $0x8] sm:$0xff]  ;;  %v3205_v59 = vld [vmem:[%s5546_s3] sm:$0xff] }
 0x1e9   : > { %1842 = vrot.lane.b32.xlu1 %v4632_v43, %s3338_s16  ;;  %v1123_v37 = vsel %vm1101_vm4, %v1090_v7, %v5690_v39  ;;  %v2263_v45 = vpack.c.b16 %v2260_v58, %v2260_v58  ;;  %v3274_v40 = vld [vmem:[%s3425_s11 + $0x28] sm:$0xff]  ;;  %v5697_v58 = vld [vmem:[#allocation40_spill] sm:$0xff] }
 0x1ea   : > { %1805 = vrot.lane.b32.xlu0 %v4300_v10, %s3337_s15  ;;  %v4649_v3 = vpop.permute.xlu2 %1642  ;;  %v1156_v34 = vsel %vm1134_vm6, %v1123_v37, %v5691_v57  ;;  %v5698_v7 = vld [vmem:[#allocation44_spill] sm:$0xff]  ;;  %v5699_v37 = vld [vmem:[#allocation74_spill] sm:$0xff]  ;;  %v5700_v57 = vld [vmem:[#allocation71_spill] sm:$0xff] }
 0x1eb   : > { %v4654_v2 = vpop.permute.xlu1 %1622  ;;  %v1189_v23 = vsel %vm1167_vm8, %v1156_v34, %v5692_v48  ;;  %v2301_v13 = vsel %vm2299_vm2, %v2263_v45, 0  ;;  %v1668_v45 = vrot.slane %v5699_v37, 1  ;;  %v5709_v37 = vld [vmem:[#allocation79_spill] sm:$0xff] }
 0x1ec   : > { %v4656_v52 = vpop.permute.xlu0 %1620  ;;  %v1222_v51 = vsel %vm1200_vm7, %v1189_v23, %v5693_v22  ;;  %2308 = vmatpush.bf16.msra.mxu0 %v2301_v13  ;;  %3207 = vmatpush.bf16.msra.mxu2 %v2301_v13  ;;  %v5701_v23 = vld [vmem:[#allocation85_spill] sm:$0xff] }
 0x1ed   : > { %3148 = vmatmul.msk.bf16.gmra.mxu1 %vm2266_vm10, %v1274_v35  ;;  %v1255_v60 = vsel %vm1233_vm9, %v1222_v51, %v4370_v6  ;;  %v5694_v35 = vld [vmem:[#allocation2_spill] sm:$0xff] }
 0x1ee   : > { %v1045_v1 = vsel %vm1035_vm3, %v3274_v40, %v5694_v35  ;;  %v4746_v40 = vsel %vm694_vm1, %v1666_v28, %v1668_v45  ;;  %v4749_v35 = vld [vmem:[%s4094_s30 + $0x8c] sm:$0xff] }
 0x1ef   : > { %v1078_v6 = vsel %vm1068_vm5, %v1045_v1, %v5695_v20  ;;  %v5704_v1 = vld [vmem:[#allocation23_spill] sm:$0xff] }
 0x1f0   : > { %1976 = vrot.lane.b32.xlu2 %v4670_v18, %s3341_s19  ;;  %2309 = vmatpush.bf16.msra.mxu0 %v3206_v8  ;;  %v1111_v26 = vsel %vm1101_vm4, %v1078_v6, %v5696_v19  ;;  %v5705_v6 = vld [vmem:[#allocation35_spill] sm:$0xff] }
 0x1f1   : > { %1696 = vrot.lane.b32.xlu1 %v4375_v33, %s3335_s13  ;;  %v1288_v33 = vsel %vm1266_vm11, %v1255_v60, %v4419_v50  ;;  %3208 = vmatpush.bf16.msra.mxu2 %v3206_v8  ;;  %v1144_v50 = vsel %vm1134_vm6, %v1111_v26, %v5697_v58  ;;  %v3275_v60 = vld [vmem:[%s3425_s11 + $0x6c] sm:$0xff]  ;;  %v5706_v26 = vld [vmem:[#allocation38_spill] sm:$0xff] }
 0x1f2   : > { %1939 = vrot.lane.b32.xlu0 %v4675_v61, %s3340_s18  ;;  %v4692_v16 = vpop.permute.xlu2 %1787  ;;  %v1177_v39 = vsel %vm1167_vm8, %v1144_v50, %v5698_v7  ;;  %v5707_v50 = vld [vmem:[#allocation59_spill] sm:$0xff]  ;;  %v4766_v7 = vld [vmem:[%s4094_s30 + $0x94] sm:$0xff] }
 0x1f3   : > { %v4696_v47 = vpop.permute.xlu1 %1628  ;;  %v1210_v34 = vsel %vm1200_vm7, %v1177_v39, %v5700_v57  ;;  %v5708_v28 = vld [vmem:[#allocation83_spill] sm:$0xff]  ;;  %v1601_v39 = vshll.u32 %v4749_v35, 16 }
 0x1f4   : > { %v4698_v56 = vpop.permute.xlu0 %1626  ;;  %2310 = vmatpush.bf16.msra.mxu0 %v3205_v59  ;;  %v1243_v13 = vsel %vm1233_vm9, %v1210_v34, %v5701_v23  ;;  %v5710_v34 = vld [vmem:[#allocation84_spill] sm:$0xff] }
 0x1f5   : > { %3209 = vmatpush.bf16.msra.mxu2 %v3205_v59 }
 0x1f6   : > { %3155 = vmatmul.msk.bf16.gmra.mxu3 %vm2266_vm10, %v1288_v33  ;;  %v5703_v33 = vld [vmem:[#allocation4_spill] sm:$0xff] }
 0x1f7   : > { %v1059_v8 = vsel %vm1035_vm3, %v3275_v60, %v5703_v33  ;;  %v3276_v60 = vld [vmem:[%s3425_s11 + $0x30] sm:$0xff]  ;;  %v5711_v33 = vld [vmem:[#allocation3_spill] sm:$0xff] }
 0x1f8   : > { %1830 = vrot.lane.b32.xlu2 %v4401_v41, %s3338_s16  ;;  %v1092_v20 = vsel %vm1068_vm5, %v1059_v8, %v5704_v1  ;;  %v1047_v8 = vsel %vm1035_vm3, %v3276_v60, %v5711_v33  ;;  %v1599_v1 = vshrl.u32 %v4749_v35, 16  ;;  %v5717_v33 = vld [vmem:[#allocation78_spill] sm:$0xff] }
 0x1f9   : > { %1793 = vrot.lane.b32.xlu1 %v4236_v31, %s3337_s15  ;;  %v5702_v31 = vld [vmem:[#allocation88_spill] sm:$0xff]  ;;  %v1125_v19 = vsel %vm1101_vm4, %v1092_v20, %v5705_v6  ;;  %v1603_v20 = vrot.slane %v1601_v39, 1  ;;  %v1606_v6 = vshll.u32 %v4766_v7, 16 }
 0x1fa   : > { %1738 = vrot.lane.b32.xlu0 %v4159_v63, %s3336_s14  ;;  %v4729_v48 = vpop.permute.xlu2 %1921  ;;  %v1276_v63 = vsel %vm1266_vm11, %v1243_v13, %v5702_v31  ;;  %v1158_v58 = vsel %vm1134_vm6, %v1125_v19, %v5706_v26  ;;  %v5712_v19 = vld [vmem:[#allocation18_spill] sm:$0xff] }
 0x1fb   : > { %v4733_v22 = vpop.permute.xlu1 %1634  ;;  %v1191_v59 = vsel %vm1167_vm8, %v1158_v58, %v5707_v50  ;;  %v1080_v26 = vsel %vm1068_vm5, %v1047_v8, %v5712_v19  ;;  %v5713_v58 = vld [vmem:[#allocation30_spill] sm:$0xff]  ;;  %v1604_v39 = vor.u32 %v1603_v20, %v1599_v1  ;;  %v5719_v1 = vld [vmem:[#allocation60_spill] sm:$0xff] }
 0x1fc   : > { %v4735_v51 = vpop.permute.xlu0 %1632  ;;  %v1224_v45 = vsel %vm1200_vm7, %v1191_v59, %v5709_v37  ;;  %v1113_v50 = vsel %vm1101_vm4, %v1080_v26, %v5713_v58  ;;  %v5714_v59 = vld [vmem:[#allocation34_spill] sm:$0xff]  ;;  %v5718_v58 = vld [vmem:[#allocation13_spill] sm:$0xff]  ;;  %v1991_v20 = vsel %vm1035_vm3, %v5719_v1, %v4476_v14 }
 0x1fd   : > { %3149 = vmatmul.msk.bf16.gmra.mxu1 %vm2266_vm10, %v1276_v63  ;;  %v1257_v23 = vsel %vm1233_vm9, %v1224_v45, %v5710_v34  ;;  %v5715_v37 = vld [vmem:[#allocation54_spill] sm:$0xff]  ;;  %v4801_v34 = vrot.slane %v1606_v6, 1 }
 0x1fe   : > { %v1290_v63 = vsel %vm1266_vm11, %v1257_v23, %v4550_v53  ;;  %v1146_v53 = vsel %vm1134_vm6, %v1113_v50, %v5714_v59  ;;  %v5716_v23 = vld [vmem:[#allocation70_spill] sm:$0xff] }
 0x1ff   : > { %v1179_v45 = vsel %vm1167_vm8, %v1146_v53, %v5715_v37  ;;  %v4820_v6 = vsel %vm501_vm0, %v1604_v39, %v4801_v34  ;;  %v5720_v59 = vld [vmem:[#allocation22_spill] sm:$0xff] }
 0x200   : > { %1964 = vrot.lane.b32.xlu2 %v4746_v40, %s3341_s19  ;;  %v5723_v14 = vld [vmem:[#allocation58_spill] sm:$0xff] }
 0x201   : > { %1927 = vrot.lane.b32.xlu1 %v5708_v28, %s3340_s18 }
 0x202   : > { %1872 = vrot.lane.b32.xlu0 %v5663_v27, %s3339_s17  ;;  %v4771_v57 = vpop.permute.xlu2 %1734 }
 0x203   : > { %v4775_v13 = vpop.permute.xlu1 %1640 }
 0x204   : > { %v4777_v31 = vpop.permute.xlu0 %1638 }
 0x206   : > { %3156 = vmatmul.msk.bf16.gmra.mxu3 %vm2266_vm10, %v1290_v63  ;;  %v1212_v63 = vsel %vm1200_vm7, %v1179_v45, %v5716_v23  ;;  %v5722_v23 = vld [vmem:[#allocation48_spill] sm:$0xff] }
 0x208   : > { %1807 = vrot.lane.b32.xlu2 %v4297_v32, %s3337_s15  ;;  %v1245_v32 = vsel %vm1233_vm9, %v1212_v63, %v5717_v33 }
 0x209   : > { %1752 = vrot.lane.b32.xlu1 %v4230_v30, %s3336_s14  ;;  %v1278_v26 = vsel %vm1266_vm11, %v1245_v32, %v4484_v38  ;;  %v3277_v30 = vld [vmem:[%s3425_s11 + $0x78] sm:$0xff]  ;;  %v5721_v38 = vld [vmem:[#allocation27_spill] sm:$0xff] }
 0x20a   : > { %1710 = vrot.lane.b32.xlu0 %v4435_v0, %s3335_s13  ;;  %v4805_v60 = vpop.permute.xlu2 %1868  ;;  %v1061_v50 = vsel %vm1035_vm3, %v3277_v30, %v5718_v58  ;;  %v5724_v32 = vld [vmem:[#allocation65_spill] sm:$0xff]  ;;  %v1685_v30 = vrot.slane %v4749_v35, 1  ;;  %v1686_v58 = vrot.slane %v4766_v7, 1 }
 0x20b   : > { %v1733_v8 = vpop.permute.xlu1 %1732  ;;  %v1094_v53 = vsel %vm1068_vm5, %v1061_v50, %v5720_v59 }
 0x20c   : > { %v1691_v19 = vpop.permute.xlu0 %1690  ;;  %v1127_v45 = vsel %vm1101_vm4, %v1094_v53, %v5721_v38  ;;  %v3278_v53 = vld [vmem:[%s3425_s11 + $0x3c] sm:$0xff] }
 0x20d   : > { %3150 = vmatmul.msk.bf16.gmra.mxu1 %vm2266_vm10, %v1278_v26  ;;  %v2023_v37 = vsel %vm1068_vm5, %v1991_v20, %v1691_v19  ;;  %v1160_v63 = vsel %vm1134_vm6, %v1127_v45, %v5722_v23  ;;  %v5726_v23 = vld [vmem:[#allocation17_spill] sm:$0xff] }
 0x20e   : > { %v1193_v33 = vsel %vm1167_vm8, %v1160_v63, %v5723_v14  ;;  %v2055_v39 = vsel %vm1101_vm4, %v2023_v37, %v1733_v8  ;;  %v5725_v37 = vld [vmem:[#allocation8_spill] sm:$0xff] }
 0x20f   : > { %v1226_v19 = vsel %vm1200_vm7, %v1193_v33, %v5724_v32  ;;  %v2087_v20 = vsel %vm1134_vm6, %v2055_v39, %v4692_v16  ;;  %v1049_v38 = vsel %vm1035_vm3, %v3278_v53, %v5725_v37  ;;  %v5727_v16 = vld [vmem:[#allocation21_spill] sm:$0xff] }
 0x210   : > { %1941 = vrot.lane.b32.xlu2 %v4820_v6, %s3340_s18  ;;  %v1259_v50 = vsel %vm1233_vm9, %v1226_v19, %v4388_v17  ;;  %v1082_v63 = vsel %vm1068_vm5, %v1049_v38, %v5726_v23  ;;  %v4860_v17 = vsel %vm694_vm1, %v1685_v30, %v1686_v58  ;;  %v5729_v32 = vld [vmem:[#allocation53_spill] sm:$0xff]  ;;  %v5733_v23 = vld [vmem:[#allocation72_spill] sm:$0xff] }
 0x211   : > { %1886 = vrot.lane.b32.xlu1 %v4749_v35, %s3339_s17  ;;  %v1292_v59 = vsel %vm1266_vm11, %v1259_v50, %v4548_v62  ;;  %v1115_v14 = vsel %vm1101_vm4, %v1082_v63, %v5727_v16  ;;  %v5728_v62 = vld [vmem:[#allocation43_spill] sm:$0xff]  ;;  %v5730_v30 = vld [vmem:[#allocation57_spill] sm:$0xff] }
 0x212   : > { %1844 = vrot.lane.b32.xlu0 %v4497_v24, %s3338_s16  ;;  %v4840_v26 = vpop.permute.xlu2 %1706  ;;  %v1148_v33 = vsel %vm1134_vm6, %v1115_v14, %v5728_v62  ;;  %v5732_v38 = vld [vmem:[#allocation61_spill] sm:$0xff] }
 0x213   : > { %v1867_v1 = vpop.permute.xlu1 %1866  ;;  %v1181_v19 = vsel %vm1167_vm8, %v1148_v33, %v5729_v32  ;;  %v1343_v14 = vld [vmem:[%s4094_s30 + $0x9c] sm:$0x1]  ;;  %v5734_v33 = vld [vmem:[#allocation7_spill] sm:$0xff] }
 0x214   : > { %v1825_v8 = vpop.permute.xlu0 %1824  ;;  %v1214_v50 = vsel %vm1200_vm7, %v1181_v19, %v5730_v30  ;;  %v5735_v19 = vld [vmem:[#allocation12_spill] sm:$0xff]  ;;  %v1449_v30 = vunpack.c.l.b16 %v1343_v14 }
 0x215   : > { %v2119_v45 = vsel %vm1167_vm8, %v2087_v20, %v1825_v8  ;;  %v5731_v20 = vld [vmem:[#allocation87_spill] sm:$0xff] }
 0x216   : > { %3157 = vmatmul.msk.bf16.gmra.mxu3 %vm2266_vm10, %v1292_v59  ;;  %v2151_v39 = vsel %vm1200_vm7, %v2119_v45, %v1867_v1  ;;  %v1247_v1 = vsel %vm1233_vm9, %v1214_v50, %v5731_v20  ;;  %v1993_v45 = vsel %vm1035_vm3, %v5732_v38, %v4656_v52  ;;  %v3279_v52 = vld [vmem:[%s3425_s11 + $0x44] sm:$0xff]  ;;  %v5736_v50 = vld [vmem:[#allocation33_spill] sm:$0xff]  ;;  %s2947_s11 = sshll.u32 %s3316_s21, 3 }
 0x217   : > { %v2183_v53 = vsel %vm1233_vm9, %v2151_v39, %v4729_v48  ;;  %v1051_v39 = vsel %vm1035_vm3, %v3279_v52, %v5734_v33  ;;  %v5742_v33 = vld [vmem:[#allocation89_spill] sm:$0xff]  ;;  %p330_p7 = scmp.lt.s32.totalorder %s2947_s11, 31 }
 0x218   : > { %1740 = vrot.lane.b32.xlu2 %v5660_v4, %s3336_s14 }
 0x219   : > { %1978 = vrot.lane.b32.xlu1 %v4860_v17, %s3341_s19  ;;  %s5757_s11 = smov (!%p330_p7, %s2947_s11), 31 }
 0x21a   : > { %1698 = vrot.lane.b32.xlu0 %v4360_v54, %s3335_s13  ;;  %v4877_v8 = vpop.permute.xlu2 %1840  ;;  %v1280_v54 = vsel %vm1266_vm11, %v1247_v1, %v4482_v21  ;;  %v5737_v1 = vld [vmem:[#allocation42_spill] sm:$0xff]  ;;  %s2948_s21 = sshll.u32 %s5757_s11, 2 }
 0x21b   : > { %v1693_v59 = vpop.permute.xlu1 %1692  ;;  %s334_s8 = sadd.s32 %s2949_s7, %s2948_s21 }
 0x21c   : > { %v1959_v4 = vpop.permute.xlu0 %1958  ;;  %v2025_v63 = vsel %vm1068_vm5, %v1993_v45, %v1693_v59  ;;  %v1457_v45 = vpack.c.b16 %v1449_v30, %v1449_v30  ;;  %s2950_s9 = sshll.u32 %s334_s8, 3 }
 0x21d   : > { %v2215_v37 = vsel %vm1266_vm11, %v2183_v53, %v1959_v4  ;;  %3151 = vmatmul.msk.bf16.gmra.mxu1 %vm2266_vm10, %v1280_v54  ;;  %v2057_v62 = vsel %vm1101_vm4, %v2025_v63, %v4771_v57  ;;  %v5738_v4 = vld [vmem:[#allocation47_spill] sm:$0xff]  ;;  %v5741_v63 = vld [vmem:[#allocation86_spill] sm:$0xff]  ;;  %s5147_s21 = scalar_lea.vmem %s5548_s5, %s2950_s9 }
 0x21e   : > { %3121 = vmatmul.msk.bf16.vlgmr.msra.gmra.mxu0 %vm2266_vm10, %v2215_v37  ;;  %v5740_v37 = vld [vmem:[#allocation76_spill] sm:$0xff] }
 0x220   : > { %1874 = vrot.lane.b32.xlu2 %v5733_v23, %s3339_s17 }
 0x221   : > { %1832 = vrot.lane.b32.xlu1 %v4577_v36, %s3338_s16 }
 0x222   : > { %1795 = vrot.lane.b32.xlu0 %v5658_v55, %s3337_s15  ;;  %v4898_v21 = vpop.permute.xlu2 %1694  ;;  %v1084_v55 = vsel %vm1068_vm5, %v1051_v39, %v5735_v19  ;;  %v1610_v19 = vshrl.u32 %v4766_v7, 16 }
 0x223   : > { %v1827_v48 = vpop.permute.xlu1 %1826  ;;  %v1117_v20 = vsel %vm1101_vm4, %v1084_v55, %v5736_v50  ;;  %v1614_v55 = vshll.u32 %v1457_v45, 16 }
 0x224   : > { %v1790_v16 = vpop.permute.xlu0 %1789  ;;  %v1150_v59 = vsel %vm1134_vm6, %v1117_v20, %v5737_v1  ;;  %v1612_v30 = vor.u32 %v1610_v19, %v4801_v34  ;;  %v1688_v34 = vrot.slane %v1457_v45, 1 }
 0x225   : > { %v2089_v32 = vsel %vm1134_vm6, %v2057_v62, %v1790_v16  ;;  %v1183_v53 = vsel %vm1167_vm8, %v1150_v59, %v5738_v4  ;;  %v1616_v50 = vrot.slane %v1614_v55, 1 }
 0x226   : > { %3158 = vmatmul.msk.bf16.gmra.mxu3 %vm2266_vm10, %v4455_v29  ;;  %v2121_v57 = vsel %vm1167_vm8, %v2089_v32, %v1827_v48  ;;  %v5739_v29 = vld [vmem:[#allocation82_spill] sm:$0xff]  ;;  %v1216_v54 = vsel %vm1200_vm7, %v1183_v53, %v5740_v37 }
 0x227   : > { %v1249_v48 = vsel %vm1233_vm9, %v1216_v54, %v5741_v63  ;;  %v2153_v14 = vsel %vm1200_vm7, %v2121_v57, %v4805_v60  ;;  %v4947_v59 = vsel %vm501_vm0, %v1612_v30, %v1616_v50  ;;  %v2007_v57 = vsel %vm1035_vm3, %v5733_v23, %v4733_v22 }
 0x228   : > { %1712 = vrot.lane.b32.xlu2 %v4632_v43, %s3335_s13  ;;  %v1282_v39 = vsel %vm1266_vm11, %v1249_v48, %v5742_v33  ;;  %v2039_v4 = vsel %vm1068_vm5, %v2007_v57, %v4840_v26  ;;  %v4965_v26 = vsel %vm694_vm1, %v1686_v58, %v1688_v34 }
 0x229   : > { %1966 = vrot.lane.b32.xlu1 %v4396_v49, %s3341_s19 }
 0x22a   : > { %1929 = vrot.lane.b32.xlu0 %v5739_v29, %s3340_s18  ;;  %v1792_v38 = vpop.permute.xlu2 %1791 }
 0x22b   : > { %v1961_v16 = vpop.permute.xlu1 %1960 }
 0x22c   : > { %v1924_v62 = vpop.permute.xlu0 %1923 }
 0x22d   : > { %v2185_v52 = vsel %vm1233_vm9, %v2153_v14, %v1924_v62  ;;  %3152 = vmatmul.msk.bf16.gmra.mxu1 %vm2266_vm10, %v1282_v39 }
 0x22e   : > { %v2217_v32 = vsel %vm1266_vm11, %v2185_v52, %v1961_v16  ;;  %v5743_v16 = vld [vmem:[#allocation81_spill] sm:$0xff] }
 0x22f   : > { %3122 = vmatmul.msk.bf16.gmra.mxu0 %vm2266_vm10, %v2217_v32  ;;  %v5006_v32 = vld [vmem:[%s4094_s30 + $0xa8] sm:$0xff] }
 0x230   : > { %1846 = vrot.lane.b32.xlu2 %v4670_v18, %s3338_s16 }
 0x231   : > { %1809 = vrot.lane.b32.xlu1 %v4675_v61, %s3337_s15 }
 0x232   : > { %1754 = vrot.lane.b32.xlu0 %v4251_v5, %s3336_s14  ;;  %v1926_v60 = vpop.permute.xlu2 %1925 }
 0x233   : > { %v1804_v20 = vpop.permute.xlu1 %1803 }
 0x234   : > { %v1749_v1 = vpop.permute.xlu0 %1748 }
 0x235   : > { %v2071_v5 = vsel %vm1101_vm4, %v2039_v4, %v1749_v1  ;;  %v5015_v1 = vld [vmem:[%s4094_s30 + $0x58] sm:$0xff] }
 0x236   : > { %3159 = vmatmul.msk.bf16.gmra.mxu3 %vm2266_vm10, %v4618_v44  ;;  %v2103_v22 = vsel %vm1134_vm6, %v2071_v5, %v1804_v20  ;;  %v2009_v57 = vsel %vm1035_vm3, %v5015_v1, %v4607_v9  ;;  %v1820_v5 = vrot.slane %v5006_v32, 1 }
 0x238   : > { %1700 = vrot.lane.b32.xlu2 %v4401_v41, %s3335_s13  ;;  %v2135_v41 = vsel %vm1167_vm8, %v2103_v22, %v4877_v8 }
 0x239   : > { %1943 = vrot.lane.b32.xlu1 %v4947_v59, %s3340_s18 }
 0x23a   : > { %1888 = vrot.lane.b32.xlu0 %v4766_v7, %s3339_s17  ;;  %v1751_v44 = vpop.permute.xlu2 %1750 }
 0x23b   : > { %v1938_v53 = vpop.permute.xlu1 %1937 }
 0x23c   : > { %v1883_v37 = vpop.permute.xlu0 %1882 }
 0x23d   : > { %v2167_v23 = vsel %vm1200_vm7, %v2135_v41, %v1883_v37 }
 0x23e   : > { %v2199_v58 = vsel %vm1233_vm9, %v2167_v23, %v1938_v53 }
 0x240   : > { %1797 = vrot.lane.b32.xlu2 %v5708_v28, %s3337_s15  ;;  %v3280_v28 = vld [vmem:[%s4094_s30 + $0x14] sm:$0xff] }
 0x241   : > { %1742 = vrot.lane.b32.xlu1 %v5663_v27, %s3336_s14  ;;  %v1995_v27 = vsel %vm1035_vm3, %v3280_v28, %v4654_v2 }
 0x242   : > { %1980 = vrot.lane.b32.xlu0 %v4965_v26, %s3341_s19  ;;  %v1885_v54 = vpop.permute.xlu2 %1884  ;;  %v2027_v8 = vsel %vm1068_vm5, %v1995_v27, %v4898_v21  ;;  %v4996_v21 = vld [vmem:[%s4094_s30 + $0xa0] sm:$0xff] }
 0x243   : > { %v1737_v45 = vpop.permute.xlu1 %1736  ;;  %v1819_v4 = vrot.slane %v4996_v21, 1 }
 0x244   : > { %v1975_v63 = vpop.permute.xlu0 %1974  ;;  %v2059_v14 = vsel %vm1101_vm4, %v2027_v8, %v1737_v45 }
 0x245   : > { %v2231_v48 = vsel %vm1266_vm11, %v2199_v58, %v1975_v63  ;;  %v2091_v2 = vsel %vm1134_vm6, %v2059_v14, %v1792_v38  ;;  %v1770_v38 = vshll.u32 %v4996_v21, 16  ;;  %v5034_v45 = vsel %vm694_vm1, %v1819_v4, %v1820_v5 }
 0x246   : > { %3129 = vmatmul.msk.bf16.vlgmr.msra.gmra.mxu2 %vm2266_vm10, %v2231_v48  ;;  %3160 = vmatmul.msk.bf16.gmra.mxu3 %vm2266_vm10, %v4621_v46 }
 0x247   : > { %v1772_v20 = vrot.slane %v1770_v38, 1 }
 0x248   : > { %1931 = vrot.lane.b32.xlu2 %v5743_v16, %s3340_s18 }
 0x249   : > { %1876 = vrot.lane.b32.xlu1 %v4186_v15, %s3339_s17 }
 0x24a   : > { %1834 = vrot.lane.b32.xlu0 %v4746_v40, %s3338_s16  ;;  %v1977_v46 = vpop.permute.xlu2 %1976 }
 0x24b   : > { %v1871_v62 = vpop.permute.xlu1 %1870 }
 0x24c   : > { %v1829_v52 = vpop.permute.xlu0 %1828 }
 0x24d   : > { %v2123_v33 = vsel %vm1167_vm8, %v2091_v2, %v1829_v52 }
 0x24e   : > { %v2155_v39 = vsel %vm1200_vm7, %v2123_v33, %v1871_v62 }
 0x24f   : > { %v2187_v30 = vsel %vm1233_vm9, %v2155_v39, %v1926_v60 }
 0x250   : > { %1756 = vrot.lane.b32.xlu2 %v4749_v35, %s3336_s14  ;;  %v1768_v35 = vshrl.u32 %v4996_v21, 16 }
 0x251   : > { %1714 = vrot.lane.b32.xlu1 %v4497_v24, %s3335_s13  ;;  %v1775_v24 = vshll.u32 %v5006_v32, 16 }
 0x252   : > { %1968 = vrot.lane.b32.xlu0 %v4572_v12, %s3341_s19  ;;  %v1831_v15 = vpop.permute.xlu2 %1830  ;;  %v1773_v53 = vor.u32 %v1772_v20, %v1768_v35 }
 0x253   : > { %v1709_v19 = vpop.permute.xlu1 %1708  ;;  %v1777_v37 = vrot.slane %v1775_v24, 1 }
 0x254   : > { %v1963_v55 = vpop.permute.xlu0 %1962  ;;  %v2041_v60 = vsel %vm1068_vm5, %v2009_v57, %v1709_v19 }
 0x255   : > { %v2219_v50 = vsel %vm1266_vm11, %v2187_v30, %v1963_v55  ;;  %v2073_v41 = vsel %vm1101_vm4, %v2041_v60, %v1751_v44  ;;  %v5037_v63 = vsel %vm501_vm0, %v1773_v53, %v1777_v37  ;;  %v1348_v30 = vld [vmem:[%s4094_s30 + $0xb0] sm:$0x1] }
 0x256   : > { %3123 = vmatmul.msk.bf16.gmra.mxu0 %vm2266_vm10, %v2219_v50  ;;  %v1765_v24 = vunpack.c.l.b16 %v1348_v30  ;;  %v3203_v30 = vld [vmem:[%s4094_s30 + $0xb4] sm:$0xff] }
 0x258   : > { %1890 = vrot.lane.b32.xlu2 %v4996_v21, %s3339_s17 }
 0x259   : > { %1848 = vrot.lane.b32.xlu1 %v4860_v17, %s3338_s16 }
 0x25a   : > { %1811 = vrot.lane.b32.xlu0 %v4820_v6, %s3337_s15  ;;  %v1965_v34 = vpop.permute.xlu2 %1964 }
 0x25b   : > { %v1843_v22 = vpop.permute.xlu1 %1842 }
 0x25c   : > { %v1806_v9 = vpop.permute.xlu0 %1805 }
 0x25d   : > { %v2105_v23 = vsel %vm1134_vm6, %v2073_v41, %v1806_v9 }
 0x25e   : > { %v2137_v58 = vsel %vm1167_vm8, %v2105_v23, %v1843_v22 }
 0x25f   : > { %v2169_v28 = vsel %vm1200_vm7, %v2137_v58, %v1885_v54  ;;  %v3283_v54 = vld [vmem:[%s4094_s30 + $0x1c] sm:$0xff] }
 0x260   : > { %1982 = vrot.lane.b32.xlu2 %v5034_v45, %s3341_s19  ;;  %v1997_v52 = vsel %vm1035_vm3, %v3283_v54, %v4513_v25 }
 0x261   : > { %1702 = vrot.lane.b32.xlu1 %v4577_v36, %s3335_s13  ;;  %v3282_v36 = vld [vmem:[%s4094_s30 + $0x50] sm:$0xff] }
 0x262   : > { %1945 = vrot.lane.b32.xlu0 %v5037_v63, %s3340_s18  ;;  %v1808_v44 = vpop.permute.xlu2 %1807 }
 0x263   : > { %v1697_v48 = vpop.permute.xlu1 %1696 }
 0x264   : > { %v1940_v27 = vpop.permute.xlu0 %1939  ;;  %v2029_v33 = vsel %vm1068_vm5, %v1997_v52, %v1697_v48 }
 0x265   : > { %v2201_v8 = vsel %vm1233_vm9, %v2169_v28, %v1940_v27 }
 0x266   : > { %v2233_v14 = vsel %vm1266_vm11, %v2201_v8, %v1977_v46 }
 0x267   : > { %3130 = vmatmul.msk.bf16.gmra.mxu2 %vm2266_vm10, %v2233_v14 }
 0x268   : > { %1836 = vrot.lane.b32.xlu2 %v4396_v49, %s3338_s16 }
 0x269   : > { %1799 = vrot.lane.b32.xlu1 %v5739_v29, %s3337_s15  ;;  %v3284_v29 = vld [vmem:[%s4094_s30 + $0x64] sm:$0xff] }
 0x26a   : > { %1744 = vrot.lane.b32.xlu0 %v3282_v36, %s3336_s14  ;;  %v1942_v62 = vpop.permute.xlu2 %1941  ;;  %v2011_v60 = vsel %vm1035_vm3, %v3284_v29, %v4777_v31  ;;  %v3285_v36 = vld [vmem:[%s4094_s30 + $0x28] sm:$0xff] }
 0x26b   : > { %v1794_v2 = vpop.permute.xlu1 %1793 }
 0x26c   : > { %v1739_v46 = vpop.permute.xlu0 %1738 }
 0x26d   : > { %v2061_v39 = vsel %vm1101_vm4, %v2029_v33, %v1739_v46 }
 0x26e   : > { %v2093_v49 = vsel %vm1134_vm6, %v2061_v39, %v1794_v2  ;;  %v2451_v2 = vpop.f32.mrf.mxu1 }
 0x26f   : > { %v2125_v25 = vsel %vm1167_vm8, %v2093_v49, %v1831_v15 }
 0x270   : > { %1970 = vrot.lane.b32.xlu2 %v4435_v0, %s3341_s19  ;;  %v1766_v0 = vpack.c.b16 %v1765_v24, %v1765_v24 }
 0x271   : > { %1933 = vrot.lane.b32.xlu1 %v4303_v11, %s3340_s18 }
 0x272   : > { %1878 = vrot.lane.b32.xlu0 %v3284_v29, %s3339_s17  ;;  %v1741_v38 = vpop.permute.xlu2 %1740  ;;  %v1783_v53 = vshll.u32 %v1766_v0, 16 }
 0x273   : > { %v1928_v19 = vpop.permute.xlu1 %1927 }
 0x274   : > { %v1873_v55 = vpop.permute.xlu0 %1872  ;;  %v1785_v22 = vrot.slane %v1783_v53, 1 }
 0x275   : > { %v2157_v50 = vsel %vm1200_vm7, %v2125_v25, %v1873_v55 }
 0x276   : > { %v2189_v35 = vsel %vm1233_vm9, %v2157_v50, %v1928_v19  ;;  %v2453_v50 = vpop.f32.mrf.mxu1 }
 0x277   : > { %v2221_v20 = vsel %vm1266_vm11, %v2189_v35, %v1965_v34  ;;  %v1779_v34 = vshrl.u32 %v5006_v32, 16  ;;  %v5165_v35 = vld [vmem:[%s4094_s30 + $0xbc] sm:$0xff] }
 0x278   : > { %3124 = vmatmul.msk.bf16.gmra.mxu0 %vm2266_vm10, %v2221_v20  ;;  %1758 = vrot.lane.b32.xlu2 %v4766_v7, %s3336_s14  ;;  %v1904_v20 = vshll.u32 %v3203_v30, 16 }
 0x279   : > { %1716 = vrot.lane.b32.xlu1 %v4670_v18, %s3335_s13  ;;  %v1781_v31 = vor.u32 %v1779_v34, %v1777_v37 }
 0x27a   : > { %1644 = vrot.lane.b32.xlu0 %v4675_v61, %s3334_s12  ;;  %v1875_v11 = vpop.permute.xlu2 %1874  ;;  %v1822_v61 = vrot.slane %v1766_v0, 1  ;;  %v1906_v34 = vrot.slane %v1904_v20, 1 }
 0x27b   : > { %v1753_v15 = vpop.permute.xlu1 %1752  ;;  %v5101_v28 = vsel %vm501_vm0, %v1781_v31, %v1785_v22 }
 0x27c   : > { %v1711_v57 = vpop.permute.xlu0 %1710  ;;  %v5098_v48 = vsel %vm694_vm1, %v1820_v5, %v1822_v61 }
 0x27d   : > { %v2043_v4 = vsel %vm1068_vm5, %v2011_v60, %v1711_v57  ;;  %v1902_v57 = vshrl.u32 %v3203_v30, 16 }
 0x27e   : > { %v2075_v18 = vsel %vm1101_vm4, %v2043_v4, %v1753_v15  ;;  %v2456_v31 = vpop.f32.mrf.mxu1 }
 0x27f   : > { %v2107_v23 = vsel %vm1134_vm6, %v2075_v18, %v1808_v44 }
 0x280   : > { %1892 = vrot.lane.b32.xlu2 %v5006_v32, %s3339_s17 }
 0x281   : > { %1850 = vrot.lane.b32.xlu1 %v4965_v26, %s3338_s16 }
 0x282   : > { %1813 = vrot.lane.b32.xlu0 %v4947_v59, %s3337_s15  ;;  %v5091_v7 = vpop.permute.xlu2 %1712 }
 0x283   : > { %v1887_v9 = vpop.permute.xlu1 %1886 }
 0x284   : > { %v1845_v41 = vpop.permute.xlu0 %1844 }
 0x285   : > { %v2139_v58 = vsel %vm1167_vm8, %v2107_v23, %v1845_v41 }
 0x286   : > { %v2171_v27 = vsel %vm1200_vm7, %v2139_v58, %v1887_v9 }
 0x287   : > { %v2203_v8 = vsel %vm1233_vm9, %v2171_v27, %v1942_v62 }
 0x288   : > { %1984 = vrot.lane.b32.xlu2 %v5098_v48, %s3341_s19 }
 0x289   : > { %1704 = vrot.lane.b32.xlu1 %v4746_v40, %s3335_s13  ;;  %v1999_v40 = vsel %vm1035_vm3, %v3285_v36, %v4698_v56 }
 0x28a   : > { %1947 = vrot.lane.b32.xlu0 %v5101_v28, %s3340_s18  ;;  %v5111_v37 = vpop.permute.xlu2 %1846 }
 0x28b   : > { %v1979_v44 = vpop.permute.xlu1 %1978 }
 0x28c   : > { %v1699_v5 = vpop.permute.xlu0 %1698  ;;  %v2235_v14 = vsel %vm1266_vm11, %v2203_v8, %v1979_v44  ;;  %v1953_v44 = vrot.slane %v3203_v30, 1 }
 0x28d   : > { %3131 = vmatmul.msk.bf16.gmra.mxu2 %vm2266_vm10, %v2235_v14  ;;  %v2031_v54 = vsel %vm1068_vm5, %v1999_v40, %v1699_v5  ;;  %v1954_v5 = vrot.slane %v5165_v35, 1 }
 0x28e   : > { %v2063_v56 = vsel %vm1101_vm4, %v2031_v54, %v1741_v38 }
 0x290   : > { %1838 = vrot.lane.b32.xlu2 %v4572_v12, %s3338_s16 }
 0x291   : > { %1801 = vrot.lane.b32.xlu1 %v5743_v16, %s3337_s15  ;;  %v5141_v16 = vld [vmem:[%s5547_s4] ss:$0 sm:$0xff] }
 0x292   : > { %1746 = vrot.lane.b32.xlu0 %v5015_v1, %s3336_s14  ;;  %v5127_v46 = vpop.permute.xlu2 %1700  ;;  %v3286_v1 = vld [vmem:[%s4094_s30 + $0x6c] sm:$0xff] }
 0x293   : > { %v1833_v62 = vpop.permute.xlu1 %1832 }
 0x294   : > { %v1796_v52 = vpop.permute.xlu0 %1795 }
 0x295   : > { %v2095_v33 = vsel %vm1134_vm6, %v2063_v56, %v1796_v52  ;;  %v1955_v52 = vsel %vm694_vm1, %v1953_v44, %v1954_v5  ;;  %v3288_v44 = vld [vmem:[%s4094_s30 + $0x78] sm:$0xff] }
 0x296   : > { %v2127_v12 = vsel %vm1167_vm8, %v2095_v33, %v1833_v62 }
 0x297   : > { %v2159_v38 = vsel %vm1200_vm7, %v2127_v12, %v1875_v11 }
 0x298   : > { %1972 = vrot.lane.b32.xlu2 %v4632_v43, %s3341_s19 }
 0x299   : > { %1935 = vrot.lane.b32.xlu1 %v4300_v10, %s3340_s18 }
 0x29a   : > { %1880 = vrot.lane.b32.xlu0 %v3286_v1, %s3339_s17  ;;  %v5150_v19 = vpop.permute.xlu2 %1797 }
 0x29b   : > { %v2312_v39 = vpop.f32.mrf.mxu0  ;;  %v1967_v29 = vpop.permute.xlu1 %1966 }
 0x29c   : > { %v2452_v49 = vadd.f32 %v2451_v2, %v2312_v39  ;;  %v1930_v43 = vpop.permute.xlu0 %1929  ;;  %v1353_v2 = vld [vmem:[%s4094_s30 + $0xc4] sm:$0x1] }
 0x29d   : > { %v2191_v10 = vsel %vm1233_vm9, %v2159_v38, %v1930_v43 }
 0x29e   : > { %v2535_v25 = vadd.f32 %v5141_v16, %v2452_v49  ;;  %v2223_v55 = vsel %vm1266_vm11, %v2191_v10, %v1967_v29  ;;  %v1899_v49 = vunpack.c.l.b16 %v1353_v2  ;;  %v2458_v29 = vpop.f32.mrf.mxu1 }
 0x29f   : > { %3125 = vmatmul.msk.bf16.gmra.mxu0 %vm2266_vm10, %v2223_v55 }
 0x2a0   : > { %2741 = vst.msk [vmem:[%s5147_s21] sm:$0xff] %vm1035_vm3, %v2535_v25  ;;  %1760 = vrot.lane.b32.xlu2 %v4996_v21, %s3336_s14  ;;  %v2636_v4 = vmul.f32 %v2535_v25, %v2535_v25  ;;  %v2567_v53 = vsel %vm1035_vm3, %v2535_v25, 0.0 }
 0x2a1   : > { %1718 = vrot.lane.b32.xlu1 %v4860_v17, %s3335_s13  ;;  %v2013_v17 = vsel %vm1035_vm3, %v3286_v1, %v4775_v13  ;;  %v1907_v13 = vor.u32 %v1906_v34, %v1902_v57 }
 0x2a2   : > { %1646 = vrot.lane.b32.xlu0 %v4820_v6, %s3334_s12  ;;  %v5167_v60 = vpop.permute.xlu2 %1931  ;;  %v1909_v6 = vshll.u32 %v5165_v35, 16  ;;  %v2045_v22 = vsel %vm1068_vm5, %v2013_v17, %v5091_v7  ;;  %v2668_v41 = vsel %vm1035_vm3, %v2636_v4, 0.0 }
 0x2a3   : > { %v2314_v24 = vpop.f32.mrf.mxu0  ;;  %v1810_v0 = vpop.permute.xlu1 %1809 }
 0x2a4   : > { %v2454_v11 = vadd.f32 %v2453_v50, %v2314_v24  ;;  %v1755_v15 = vpop.permute.xlu0 %1754  ;;  %v1911_v58 = vrot.slane %v1909_v6, 1  ;;  %v1900_v50 = vpack.c.b16 %v1899_v49, %v1899_v49 }
 0x2a5   : > { %v2077_v7 = vsel %vm1101_vm4, %v2045_v22, %v1755_v15  ;;  %v3287_v15 = vld [vmem:[%s4094_s30 + $0x30] sm:$0xff] }
 0x2a6   : > { %v2536_v21 = vadd.f32 %v5141_v16, %v2454_v11  ;;  %v1912_v62 = vsel %vm501_vm0, %v1907_v13, %v1911_v58  ;;  %v1913_v11 = vshrl.u32 %v5165_v35, 16  ;;  %v2001_v57 = vsel %vm1035_vm3, %v3287_v15, %v4696_v47 }
 0x2a7   : > { %v2033_v34 = vsel %vm1068_vm5, %v2001_v57, %v5127_v46 }
 0x2a8   : > { %v2568_v18 = vsel %vm1035_vm3, %v2536_v21, 0.0  ;;  %v2637_v61 = vmul.f32 %v2536_v21, %v2536_v21  ;;  %2742 = vst.msk [vmem:[%s5147_s21 + $0x8] sm:$0xff] %vm1035_vm3, %v2536_v21  ;;  %1894 = vrot.lane.b32.xlu2 %v3203_v30, %s3339_s17  ;;  %v1915_v17 = vor.u32 %v1913_v11, %v1911_v58 }
 0x2a9   : > { %v2569_v9 = vadd.f32 %v2568_v18, %v2567_v53  ;;  %1852 = vrot.lane.b32.xlu1 %v5034_v45, %s3338_s16 }
 0x2aa   : > { %v2669_v23 = vsel %vm1035_vm3, %v2637_v61, 0.0  ;;  %1815 = vrot.lane.b32.xlu0 %v5037_v63, %s3337_s15  ;;  %v5188_v54 = vpop.permute.xlu2 %1756  ;;  %v2109_v63 = vsel %vm1134_vm6, %v2077_v7, %v1810_v0  ;;  %v1917_v0 = vshll.u32 %v1900_v50, 16 }
 0x2ab   : > { %v2670_v27 = vadd.f32 %v2669_v23, %v2668_v41  ;;  %v1944_v8 = vpop.permute.xlu1 %1943  ;;  %v2141_v12 = vsel %vm1167_vm8, %v2109_v63, %v5111_v37  ;;  %v1956_v41 = vrot.slane %v1900_v50, 1 }
 0x2ac   : > { %v2317_v14 = vpop.f32.mrf.mxu0  ;;  %v1889_v40 = vpop.permute.xlu0 %1888  ;;  %v1919_v47 = vrot.slane %v1917_v0, 1  ;;  %v3289_v0 = vld [vmem:[%s4094_s30 + $0x3c] sm:$0xff] }
 0x2ad   : > { %v2457_v36 = vadd.f32 %v2456_v31, %v2317_v14  ;;  %v2173_v39 = vsel %vm1200_vm7, %v2141_v12, %v1889_v40  ;;  %v1957_v7 = vsel %vm694_vm1, %v1954_v5, %v1956_v41  ;;  %v2461_v5 = vpop.f32.mrf.mxu1  ;;  %v2003_v15 = vsel %vm1035_vm3, %v3289_v0, %v4538_v42 }
 0x2ae   : > { %v1920_v46 = vsel %vm501_vm0, %v1915_v17, %v1919_v47 }
 0x2af   : > { %v2537_v45 = vadd.f32 %v5141_v16, %v2457_v36 }
 0x2b0   : > { %1648 = vrot.lane.b32.xlu2 %v4947_v59, %s3334_s12  ;;  %v2205_v59 = vsel %vm1233_vm9, %v2173_v39, %v1944_v8  ;;  %v2015_v8 = vsel %vm1035_vm3, %v3288_v44, %v4649_v3  ;;  %s2951_s12 = sshll.u32 %s5755_s22, 2 }
 0x2b1   : > { %v2570_v56 = vsel %vm1035_vm3, %v2537_v45, 0.0  ;;  %v2638_v33 = vmul.f32 %v2537_v45, %v2537_v45  ;;  %2743 = vst.msk [vmem:[%s5147_s21 + $0x10] sm:$0xff] %vm1035_vm3, %v2537_v45  ;;  %1986 = vrot.lane.b32.xlu1 %v1955_v52, %s3341_s19 }
 0x2b2   : > { %v2571_v1 = vadd.f32 %v2570_v56, %v2569_v9  ;;  %1949 = vrot.lane.b32.xlu0 %v1912_v62, %s3340_s18  ;;  %v1891_v20 = vpop.permute.xlu2 %1890 }
 0x2b3   : > { %v2671_v38 = vsel %vm1035_vm3, %v2638_v33, 0.0  ;;  %v1743_v10 = vpop.permute.xlu1 %1742 }
 0x2b4   : > { %v2672_v43 = vadd.f32 %v2671_v38, %v2670_v27  ;;  %v2319_v25 = vpop.f32.mrf.mxu0  ;;  %v1981_v55 = vpop.permute.xlu0 %1980  ;;  %v2065_v53 = vsel %vm1101_vm4, %v2033_v34, %v1743_v10 }
 0x2b5   : > { %v2459_v37 = vadd.f32 %v2458_v29, %v2319_v25  ;;  %v2237_v30 = vsel %vm1266_vm11, %v2205_v59, %v1981_v55  ;;  %v2491_v27 = vpop.f32.mrf.mxu3 }
 0x2b6   : > { %3132 = vmatmul.msk.bf16.gmra.mxu2 %vm2266_vm10, %v2237_v30  ;;  %v2463_v30 = vpop.f32.mrf.mxu1 }
 0x2b7   : > { %v2538_v24 = vadd.f32 %v5141_v16, %v2459_v37 }
 0x2b8   : > { %1817 = vrot.lane.b32.xlu2 %v5101_v28, %s3337_s15  ;;  %v2097_v28 = vsel %vm1134_vm6, %v2065_v53, %v5150_v19 }
 0x2b9   : > { %v2572_v4 = vsel %vm1035_vm3, %v2538_v24, 0.0  ;;  %v2639_v21 = vmul.f32 %v2538_v24, %v2538_v24  ;;  %2744 = vst.msk [vmem:[%s5147_s21 + $0x18] sm:$0xff] %vm1035_vm3, %v2538_v24  ;;  %1762 = vrot.lane.b32.xlu1 %v5006_v32, %s3336_s14 }
 0x2ba   : > { %v2573_v6 = vadd.f32 %v2572_v4, %v2571_v1  ;;  %1720 = vrot.lane.b32.xlu0 %v4965_v26, %s3335_s13  ;;  %v1983_v9 = vpop.permute.xlu2 %1982  ;;  %s343_s13 = sadd.s32 %s2951_s12, %s3413_s28 }
 0x2bb   : > { %v2673_v18 = vsel %vm1035_vm3, %v2639_v21, 0.0  ;;  %v1877_v31 = vpop.permute.xlu1 %1876  ;;  %s2952_s14 = sshll.u32 %s343_s13, 1 }
 0x2bc   : > { %v2674_v61 = vadd.f32 %v2673_v18, %v2672_v43  ;;  %v1835_v22 = vpop.permute.xlu0 %1834 }
 0x2bd   : > { %v2129_v26 = vsel %vm1167_vm8, %v2097_v28, %v1835_v22  ;;  %v2493_v62 = vpop.f32.mrf.mxu3 }
 0x2be   : > { %v2161_v32 = vsel %vm1200_vm7, %v2129_v26, %v1877_v31  ;;  %v2466_v44 = vpop.f32.mrf.mxu1 }
 0x2bf   : > { %v2193_v19 = vsel %vm1233_vm9, %v2161_v32, %v5167_v60 }
 0x2c0   : > { %1951 = vrot.lane.b32.xlu2 %v1920_v46, %s3340_s18 }
 0x2c1   : > { %1896 = vrot.lane.b32.xlu1 %v5165_v35, %s3339_s17  ;;  %s345_s17 = scalar_lea.vmem %s5549_s6, %s2952_s14 }
 0x2c2   : > { %1854 = vrot.lane.b32.xlu0 %v5098_v48, %s3338_s16  ;;  %v1837_v60 = vpop.permute.xlu2 %1836 }
 0x2c3   : > { %v1715_v23 = vpop.permute.xlu1 %1714 }
 0x2c4   : > { %v1969_v13 = vpop.permute.xlu0 %1968  ;;  %v2047_v36 = vsel %vm1068_vm5, %v2015_v8, %v1715_v23 }
 0x2c5   : > { %v2225_v58 = vsel %vm1266_vm11, %v2193_v19, %v1969_v13  ;;  %v2079_v35 = vsel %vm1101_vm4, %v2047_v36, %v5188_v54  ;;  %v2496_v26 = vpop.f32.mrf.mxu3 }
 0x2c6   : > { %3126 = vmatmul.msk.bf16.gmra.mxu0 %vm2266_vm10, %v2225_v58 }
 0x2c9   : > { %v2352_v48 = vpop.f32.mrf.mxu2 }
 0x2ca   : > { %v2492_v14 = vadd.f32 %v2491_v27, %v2352_v48  ;;  %1988 = vrot.lane.b32.xlu0 %v1957_v7, %s3341_s19  ;;  %v1971_v49 = vpop.permute.xlu2 %1970  ;;  %v3290_v7 = vld [vmem:[%s4094_s30 + $0x80] sm:$0xff] }
 0x2cb   : > { %v1849_v63 = vpop.permute.xlu1 %1848 }
 0x2cc   : > { %v5252_v40 = vadd.f32 %v5141_v16, %v2492_v14  ;;  %v1812_v45 = vpop.permute.xlu0 %1811 }
 0x2cd   : > { %v2111_v3 = vsel %vm1134_vm6, %v2079_v35, %v1812_v45  ;;  %v2498_v8 = vpop.f32.mrf.mxu3 }
 0x2ce   : > { %2757 = vst.msk [vmem:[%s5147_s21 + $0x80] sm:$0xff] %vm1035_vm3, %v5252_v40  ;;  %v2143_v2 = vsel %vm1167_vm8, %v2111_v3, %v1849_v63 }
 0x2cf   : > { %v2175_v54 = vsel %vm1200_vm7, %v2143_v2, %v1891_v20 }
 0x2d1   : > { %v2354_v52 = vpop.f32.mrf.mxu2 }
 0x2d2   : > { %v2494_v56 = vadd.f32 %v2493_v62, %v2354_v52  ;;  %v1759_v34 = vpop.permute.xlu2 %1758 }
 0x2d3   : > { %v2322_v33 = vpop.f32.mrf.mxu0  ;;  %v1703_v39 = vpop.permute.xlu1 %1702 }
 0x2d4   : > { %v5262_v12 = vadd.f32 %v5141_v16, %v2494_v56  ;;  %v2462_v1 = vadd.f32 %v2461_v5, %v2322_v33  ;;  %v1946_v29 = vpop.permute.xlu0 %1945  ;;  %v2035_v4 = vsel %vm1068_vm5, %v2003_v15, %v1703_v39 }
 0x2d5   : > { %v2207_v43 = vsel %vm1233_vm9, %v2175_v54, %v1946_v29 }
 0x2d6   : > { %2758 = vst.msk [vmem:[%s5147_s21 + $0x88] sm:$0xff] %vm1035_vm3, %v5262_v12  ;;  %v2539_v38 = vadd.f32 %v5141_v16, %v2462_v1  ;;  %v2239_v10 = vsel %vm1266_vm11, %v2207_v43, %v1983_v9 }
 0x2d7   : > { %3133 = vmatmul.msk.bf16.gmra.mxu2 %vm2266_vm10, %v2239_v10 }
 0x2d8   : > { %v2574_v25 = vsel %vm1035_vm3, %v2539_v38, 0.0  ;;  %v2640_v37 = vmul.f32 %v2539_v38, %v2539_v38  ;;  %2745 = vst.msk [vmem:[%s5147_s21 + $0x20] sm:$0xff] %vm1035_vm3, %v2539_v38 }
 0x2d9   : > { %v2575_v55 = vadd.f32 %v2574_v25, %v2573_v6 }
 0x2da   : > { %v2675_v59 = vsel %vm1035_vm3, %v2640_v37, 0.0  ;;  %v1893_v41 = vpop.permute.xlu2 %1892 }
 0x2db   : > { %v2676_v50 = vadd.f32 %v2675_v59, %v2674_v61  ;;  %v2324_v20 = vpop.f32.mrf.mxu0  ;;  %v1800_v11 = vpop.permute.xlu1 %1799 }
 0x2dc   : > { %v2464_v24 = vadd.f32 %v2463_v30, %v2324_v20  ;;  %v1745_v57 = vpop.permute.xlu0 %1744 }
 0x2dd   : > { %v2067_v6 = vsel %vm1101_vm4, %v2035_v4, %v1745_v57  ;;  %v3291_v4 = vld [vmem:[%s4094_s30 + $0x44] sm:$0xff] }
 0x2de   : > { %v2540_v21 = vadd.f32 %v5141_v16, %v2464_v24  ;;  %v2099_v61 = vsel %vm1134_vm6, %v2067_v6, %v1800_v11 }
 0x2df   : > { %v2131_v22 = vsel %vm1167_vm8, %v2099_v61, %v1837_v60 }
 0x2e0   : > { %v2576_v17 = vsel %vm1035_vm3, %v2540_v21, 0.0  ;;  %v2641_v47 = vmul.f32 %v2540_v21, %v2540_v21  ;;  %2746 = vst.msk [vmem:[%s5147_s21 + $0x28] sm:$0xff] %vm1035_vm3, %v2540_v21  ;;  %v2005_v21 = vsel %vm1035_vm3, %v3291_v4, %v4735_v51 }
 0x2e1   : > { %v2577_v53 = vadd.f32 %v2576_v17, %v2575_v55 }
 0x2e2   : > { %v2677_v18 = vsel %vm1035_vm3, %v2641_v47, 0.0  ;;  %v1985_v60 = vpop.permute.xlu2 %1984 }
 0x2e3   : > { %v2678_v42 = vadd.f32 %v2677_v18, %v2676_v50  ;;  %v1934_v31 = vpop.permute.xlu1 %1933 }
 0x2e4   : > { %v1879_v28 = vpop.permute.xlu0 %1878 }
 0x2e5   : > { %v2163_v46 = vsel %vm1200_vm7, %v2131_v22, %v1879_v28  ;;  %v2501_v28 = vpop.f32.mrf.mxu3 }
 0x2e6   : > { %v2195_v9 = vsel %vm1233_vm9, %v2163_v46, %v1934_v31 }
 0x2e7   : > { %v2227_v32 = vsel %vm1266_vm11, %v2195_v9, %v1971_v49  ;;  %v2468_v49 = vpop.f32.mrf.mxu1 }
 0x2e8   : > { %3127 = vmatmul.msk.bf16.gmra.mxu0 %vm2266_vm10, %v2227_v32 }
 0x2ea   : > { %v2357_v23 = vpop.f32.mrf.mxu2  ;;  %v1839_v43 = vpop.permute.xlu2 %1838 }
 0x2eb   : > { %v2497_v19 = vadd.f32 %v2496_v26, %v2357_v23  ;;  %v1717_v13 = vpop.permute.xlu1 %1716 }
 0x2ec   : > { %v1645_v27 = vpop.permute.xlu0 %1644 }
 0x2ed   : > { %v5293_v58 = vadd.f32 %v5141_v16, %v2497_v19  ;;  %v2017_v48 = vsel %vm1035_vm3, %v3290_v7, %v1645_v27  ;;  %v3292_v27 = vld [vmem:[%s4094_s30 + $0x8c] sm:$0xff] }
 0x2ee   : > { %v2049_v36 = vsel %vm1068_vm5, %v2017_v48, %v1717_v13  ;;  %v2503_v48 = vpop.f32.mrf.mxu3 }
 0x2ef   : > { %2759 = vst.msk [vmem:[%s5147_s21 + $0x90] sm:$0xff] %vm1035_vm3, %v5293_v58  ;;  %v2081_v62 = vsel %vm1101_vm4, %v2049_v36, %v1759_v34  ;;  %v2471_v13 = vpop.f32.mrf.mxu1 }
 0x2f2   : > { %v2359_v14 = vpop.f32.mrf.mxu2 }
 0x2f3   : > { %v2499_v63 = vadd.f32 %v2498_v8, %v2359_v14  ;;  %v1851_v45 = vpop.permute.xlu1 %1850 }
 0x2f4   : > { %v1814_v3 = vpop.permute.xlu0 %1813 }
 0x2f5   : > { %v5302_v35 = vadd.f32 %v5141_v16, %v2499_v63  ;;  %v2327_v5 = vpop.f32.mrf.mxu0  ;;  %v2113_v2 = vsel %vm1134_vm6, %v2081_v62, %v1814_v3 }
 0x2f6   : > { %v2467_v52 = vadd.f32 %v2466_v44, %v2327_v5  ;;  %v2145_v33 = vsel %vm1167_vm8, %v2113_v2, %v1851_v45 }
 0x2f7   : > { %2760 = vst.msk [vmem:[%s5147_s21 + $0x98] sm:$0xff] %vm1035_vm3, %v5302_v35  ;;  %v2177_v10 = vsel %vm1200_vm7, %v2145_v33, %v1893_v41 }
 0x2f8   : > { %v2541_v56 = vadd.f32 %v5141_v16, %v2467_v52 }
 0x2fa   : > { %v2578_v1 = vsel %vm1035_vm3, %v2541_v56, 0.0  ;;  %v2642_v39 = vmul.f32 %v2541_v56, %v2541_v56  ;;  %2747 = vst.msk [vmem:[%s5147_s21 + $0x30] sm:$0xff] %vm1035_vm3, %v2541_v56 }
 0x2fb   : > { %v2579_v54 = vadd.f32 %v2578_v1, %v2577_v53  ;;  %v1705_v38 = vpop.permute.xlu1 %1704  ;;  %v1973_v53 = vpop.permute.xlu2 %1972 }
 0x2fc   : > { %v2679_v29 = vsel %vm1035_vm3, %v2642_v39, 0.0  ;;  %v1948_v37 = vpop.permute.xlu0 %1947  ;;  %v2037_v17 = vsel %vm1068_vm5, %v2005_v21, %v1705_v38 }
 0x2fd   : > { %v2680_v25 = vadd.f32 %v2679_v29, %v2678_v42  ;;  %v2329_v55 = vpop.f32.mrf.mxu0  ;;  %v2209_v59 = vsel %vm1233_vm9, %v2177_v10, %v1948_v37 }
 0x2fe   : > { %v2469_v30 = vadd.f32 %v2468_v49, %v2329_v55  ;;  %v2241_v50 = vsel %vm1266_vm11, %v2209_v59, %v1985_v60  ;;  %v2473_v49 = vpop.f32.mrf.mxu1 }
 0x2ff   : > { %3134 = vmatmul.msk.bf16.gmra.mxu2 %vm2266_vm10, %v2241_v50 }
 0x300   : > { %v2542_v20 = vadd.f32 %v5141_v16, %v2469_v30 }
 0x302   : > { %v2580_v24 = vsel %vm1035_vm3, %v2542_v20, 0.0  ;;  %v2643_v11 = vmul.f32 %v2542_v20, %v2542_v20  ;;  %2748 = vst.msk [vmem:[%s5147_s21 + $0x38] sm:$0xff] %vm1035_vm3, %v2542_v20 }
 0x303   : > { %v2581_v0 = vadd.f32 %v2580_v24, %v2579_v54  ;;  %v1802_v57 = vpop.permute.xlu1 %1801  ;;  %v1761_v9 = vpop.permute.xlu2 %1760 }
 0x304   : > { %v2681_v15 = vsel %vm1035_vm3, %v2643_v11, 0.0  ;;  %v1747_v6 = vpop.permute.xlu0 %1746 }
 0x305   : > { %v2682_v34 = vadd.f32 %v2681_v15, %v2680_v25  ;;  %v2069_v47 = vsel %vm1101_vm4, %v2037_v17, %v1747_v6 }
 0x306   : > { %v2101_v18 = vsel %vm1134_vm6, %v2069_v47, %v1802_v57  ;;  %v3293_v57 = vld [vmem:[%s4094_s30 + $0x94] sm:$0xff] }
 0x307   : > { %v2133_v42 = vsel %vm1167_vm8, %v2101_v18, %v1839_v43 }
 0x30b   : > { %v1936_v61 = vpop.permute.xlu1 %1935  ;;  %v1895_v60 = vpop.permute.xlu2 %1894 }
 0x30c   : > { %v1881_v31 = vpop.permute.xlu0 %1880 }
 0x30d   : > { %v2165_v22 = vsel %vm1200_vm7, %v2133_v42, %v1881_v31  ;;  %v2506_v31 = vpop.f32.mrf.mxu3 }
 0x30e   : > { %v2197_v51 = vsel %vm1233_vm9, %v2165_v22, %v1936_v61 }
 0x30f   : > { %v2229_v46 = vsel %vm1266_vm11, %v2197_v51, %v1973_v53 }
 0x310   : > { %3128 = vmatmul.msk.bf16.gmra.mxu0 %vm2266_vm10, %v2229_v46  ;;  %v2362_v26 = vpop.f32.mrf.mxu2 }
 0x311   : > { %v2502_v32 = vadd.f32 %v2501_v28, %v2362_v26 }
 0x313   : > { %v5336_v41 = vadd.f32 %v5141_v16, %v2502_v32  ;;  %v1719_v23 = vpop.permute.xlu1 %1718  ;;  %v1649_v59 = vpop.permute.xlu2 %1648 }
 0x314   : > { %v1647_v19 = vpop.permute.xlu0 %1646  ;;  %v2021_v4 = vsel %vm1035_vm3, %v3293_v57, %v1649_v59 }
 0x315   : > { %2761 = vst.msk [vmem:[%s5147_s21 + $0xa0] sm:$0xff] %vm1035_vm3, %v5336_v41  ;;  %v2019_v7 = vsel %vm1035_vm3, %v3292_v27, %v1647_v19  ;;  %v2476_v19 = vpop.f32.mrf.mxu1 }
 0x316   : > { %v2051_v14 = vsel %vm1068_vm5, %v2019_v7, %v1719_v23 }
 0x317   : > { %v2083_v62 = vsel %vm1101_vm4, %v2051_v14, %v1761_v9 }
 0x318   : > { %v2364_v44 = vpop.f32.mrf.mxu2 }
 0x319   : > { %v2504_v8 = vadd.f32 %v2503_v48, %v2364_v44 }
 0x31b   : > { %v5345_v36 = vadd.f32 %v5141_v16, %v2504_v8  ;;  %v1853_v45 = vpop.permute.xlu1 %1852  ;;  %v1818_v17 = vpop.permute.xlu2 %1817 }
 0x31c   : > { %v2332_v63 = vpop.f32.mrf.mxu0  ;;  %v1816_v5 = vpop.permute.xlu0 %1815 }
 0x31d   : > { %v2472_v3 = vadd.f32 %v2471_v13, %v2332_v63  ;;  %2762 = vst.msk [vmem:[%s5147_s21 + $0xa8] sm:$0xff] %vm1035_vm3, %v5345_v36  ;;  %v2115_v2 = vsel %vm1134_vm6, %v2083_v62, %v1816_v5  ;;  %v2508_v13 = vpop.f32.mrf.mxu3  ;;  %v2478_v5 = vpop.f32.mrf.mxu1 }
 0x31e   : > { %v2147_v39 = vsel %vm1167_vm8, %v2115_v2, %v1853_v45 }
 0x31f   : > { %v2543_v52 = vadd.f32 %v5141_v16, %v2472_v3  ;;  %v2179_v10 = vsel %vm1200_vm7, %v2147_v39, %v1895_v60 }
 0x321   : > { %v2582_v56 = vsel %vm1035_vm3, %v2543_v52, 0.0  ;;  %v2644_v33 = vmul.f32 %v2543_v52, %v2543_v52  ;;  %2749 = vst.msk [vmem:[%s5147_s21 + $0x40] sm:$0xff] %vm1035_vm3, %v2543_v52 }
 0x322   : > { %v2583_v1 = vadd.f32 %v2582_v56, %v2581_v0 }
 0x323   : > { %v2683_v54 = vsel %vm1035_vm3, %v2644_v33, 0.0  ;;  %v1987_v43 = vpop.permute.xlu1 %1986  ;;  %v1952_v28 = vpop.permute.xlu2 %1951 }
 0x324   : > { %v2684_v29 = vadd.f32 %v2683_v54, %v2682_v34  ;;  %v2334_v38 = vpop.f32.mrf.mxu0  ;;  %v1950_v37 = vpop.permute.xlu0 %1949 }
 0x325   : > { %v2474_v25 = vadd.f32 %v2473_v49, %v2334_v38  ;;  %v2211_v55 = vsel %vm1233_vm9, %v2179_v10, %v1950_v37 }
 0x326   : > { %v2243_v50 = vsel %vm1266_vm11, %v2211_v55, %v1987_v43  ;;  %v2481_v55 = vpop.f32.mrf.mxu1 }
 0x327   : > { %v2544_v30 = vadd.f32 %v5141_v16, %v2474_v25  ;;  %3135 = vmatmul.msk.bf16.gmra.mxu2 %vm2266_vm10, %v2243_v50 }
 0x329   : > { %v2584_v20 = vsel %vm1035_vm3, %v2544_v30, 0.0  ;;  %v2645_v24 = vmul.f32 %v2544_v30, %v2544_v30  ;;  %2750 = vst.msk [vmem:[%s5147_s21 + $0x48] sm:$0xff] %vm1035_vm3, %v2544_v30 }
 0x32a   : > { %v2585_v11 = vadd.f32 %v2584_v20, %v2583_v1 }
 0x32b   : > { %v2685_v0 = vsel %vm1035_vm3, %v2645_v24, 0.0  ;;  %v1763_v34 = vpop.permute.xlu1 %1762 }
 0x32c   : > { %v2686_v15 = vadd.f32 %v2685_v0, %v2684_v29  ;;  %v1721_v21 = vpop.permute.xlu0 %1720  ;;  %v2511_v29 = vpop.f32.mrf.mxu3 }
 0x32d   : > { %v2053_v6 = vsel %vm1068_vm5, %v2021_v4, %v1721_v21 }
 0x32e   : > { %v2085_v47 = vsel %vm1101_vm4, %v2053_v6, %v1763_v34 }
 0x32f   : > { %v2117_v18 = vsel %vm1134_vm6, %v2085_v47, %v1818_v17 }
 0x333   : > { %v1897_v42 = vpop.permute.xlu1 %1896 }
 0x334   : > { %v1855_v53 = vpop.permute.xlu0 %1854  ;;  %v2513_v25 = vpop.f32.mrf.mxu3 }
 0x335   : > { %v2149_v61 = vsel %vm1167_vm8, %v2117_v18, %v1855_v53 }
 0x336   : > { %v2181_v22 = vsel %vm1200_vm7, %v2149_v61, %v1897_v42 }
 0x337   : > { %v2213_v26 = vsel %vm1233_vm9, %v2181_v22, %v1952_v28 }
 0x339   : > { %v2367_v51 = vpop.f32.mrf.mxu2 }
 0x33a   : > { %v2507_v46 = vadd.f32 %v2506_v31, %v2367_v51 }
 0x33c   : > { %v5376_v9 = vadd.f32 %v5141_v16, %v2507_v46  ;;  %v1989_v32 = vpop.permute.xlu0 %1988  ;;  %v2516_v34 = vpop.f32.mrf.mxu3 }
 0x33d   : > { %v2245_v23 = vsel %vm1266_vm11, %v2213_v26, %v1989_v32 }
 0x33e   : > { %2763 = vst.msk [vmem:[%s5147_s21 + $0xb0] sm:$0xff] %vm1035_vm3, %v5376_v9  ;;  %3136 = vmatmul.msk.bf16.gmra.mxu2 %vm2266_vm10, %v2245_v23 }
 0x341   : > { %v2369_v27 = vpop.f32.mrf.mxu2 }
 0x342   : > { %v2509_v7 = vadd.f32 %v2508_v13, %v2369_v27 }
 0x343   : > { %v2337_v48 = vpop.f32.mrf.mxu0 }
 0x344   : > { %v5384_v44 = vadd.f32 %v5141_v16, %v2509_v7  ;;  %v2477_v8 = vadd.f32 %v2476_v19, %v2337_v48  ;;  %v2518_v53 = vpop.f32.mrf.mxu3 }
 0x346   : > { %2764 = vst.msk [vmem:[%s5147_s21 + $0xb8] sm:$0xff] %vm1035_vm3, %v5384_v44  ;;  %v2545_v14 = vadd.f32 %v5141_v16, %v2477_v8 }
 0x348   : > { %v2586_v60 = vsel %vm1035_vm3, %v2545_v14, 0.0  ;;  %v2646_v63 = vmul.f32 %v2545_v14, %v2545_v14  ;;  %2751 = vst.msk [vmem:[%s5147_s21 + $0x50] sm:$0xff] %vm1035_vm3, %v2545_v14 }
 0x349   : > { %v2587_v45 = vadd.f32 %v2586_v60, %v2585_v11 }
 0x34a   : > { %v2687_v3 = vsel %vm1035_vm3, %v2646_v63, 0.0 }
 0x34b   : > { %v2688_v62 = vadd.f32 %v2687_v3, %v2686_v15  ;;  %v2339_v52 = vpop.f32.mrf.mxu0  ;;  %v2483_v15 = vpop.f32.mrf.mxu1 }
 0x34c   : > { %v2479_v2 = vadd.f32 %v2478_v5, %v2339_v52 }
 0x34e   : > { %v2546_v56 = vadd.f32 %v5141_v16, %v2479_v2 }
 0x350   : > { %v2588_v33 = vsel %vm1035_vm3, %v2546_v56, 0.0  ;;  %v2647_v1 = vmul.f32 %v2546_v56, %v2546_v56  ;;  %2752 = vst.msk [vmem:[%s5147_s21 + $0x58] sm:$0xff] %vm1035_vm3, %v2546_v56 }
 0x351   : > { %v2589_v39 = vadd.f32 %v2588_v33, %v2587_v45 }
 0x352   : > { %v2689_v49 = vsel %vm1035_vm3, %v2647_v1, 0.0  ;;  %v2598_v1 = vsel %vm1035_vm3, %v5252_v40, 0.0 }
 0x353   : > { %v2690_v54 = vadd.f32 %v2689_v49, %v2688_v62  ;;  %v2486_v61 = vpop.f32.mrf.mxu1  ;;  %v2652_v62 = vmul.f32 %v5252_v40, %v5252_v40  ;;  %v2602_v40 = vsel %vm1035_vm3, %v5293_v58, 0.0 }
 0x35a   : > { %v2372_v38 = vpop.f32.mrf.mxu2 }
 0x35b   : > { %v2512_v43 = vadd.f32 %v2511_v29, %v2372_v38  ;;  %v2488_v13 = vpop.f32.mrf.mxu1  ;;  %v2699_v38 = vsel %vm1035_vm3, %v2652_v62, 0.0 }
 0x35d   : > { %v5400_v10 = vadd.f32 %v5141_v16, %v2512_v43  ;;  %v2600_v43 = vsel %vm1035_vm3, %v5262_v12, 0.0 }
 0x35f   : > { %2765 = vst.msk [vmem:[%s5147_s21 + $0xc0] sm:$0xff] %vm1035_vm3, %v5400_v10 }
 0x362   : > { %v2374_v37 = vpop.f32.mrf.mxu2 }
 0x363   : > { %v2514_v59 = vadd.f32 %v2513_v25, %v2374_v37  ;;  %v2654_v25 = vmul.f32 %v5293_v58, %v5293_v58  ;;  %v2606_v58 = vsel %vm1035_vm3, %v5336_v41, 0.0 }
 0x365   : > { %v5406_v30 = vadd.f32 %v5141_v16, %v2514_v59  ;;  %v2342_v50 = vpop.f32.mrf.mxu0 }
 0x366   : > { %v2482_v20 = vadd.f32 %v2481_v55, %v2342_v50  ;;  %v2655_v50 = vmul.f32 %v5302_v35, %v5302_v35 }
 0x367   : > { %2766 = vst.msk [vmem:[%s5147_s21 + $0xc8] sm:$0xff] %vm1035_vm3, %v5406_v30 }
 0x368   : > { %v2547_v24 = vadd.f32 %v5141_v16, %v2482_v20 }
 0x36a   : > { %v2590_v11 = vsel %vm1035_vm3, %v2547_v24, 0.0  ;;  %2753 = vst.msk [vmem:[%s5147_s21 + $0x60] sm:$0xff] %vm1035_vm3, %v2547_v24  ;;  %v2648_v51 = vmul.f32 %v2547_v24, %v2547_v24 }
 0x36b   : > { %v2591_v0 = vadd.f32 %v2590_v11, %v2589_v39  ;;  %v2653_v39 = vmul.f32 %v5262_v12, %v5262_v12  ;;  %v2703_v11 = vsel %vm1035_vm3, %v2654_v25, 0.0  ;;  %v2604_v12 = vsel %vm1035_vm3, %v5302_v35, 0.0 }
 0x36c   : > { %v2691_v32 = vsel %vm1035_vm3, %v2648_v51, 0.0  ;;  %v2608_v35 = vsel %vm1035_vm3, %v5345_v36, 0.0 }
 0x36d   : > { %v2344_v57 = vpop.f32.mrf.mxu0  ;;  %v2692_v14 = vadd.f32 %v2691_v32, %v2690_v54  ;;  %v2701_v59 = vsel %vm1035_vm3, %v2653_v39, 0.0  ;;  %v2660_v32 = vmul.f32 %v5400_v10, %v5400_v10 }
 0x36e   : > { %v2484_v4 = vadd.f32 %v2483_v15, %v2344_v57 }
 0x370   : > { %v2548_v21 = vadd.f32 %v5141_v16, %v2484_v4  ;;  %v2705_v4 = vsel %vm1035_vm3, %v2655_v50, 0.0 }
 0x372   : > { %2754 = vst.msk [vmem:[%s5147_s21 + $0x68] sm:$0xff] %vm1035_vm3, %v2548_v21  ;;  %v2649_v26 = vmul.f32 %v2548_v21, %v2548_v21  ;;  %v2592_v23 = vsel %vm1035_vm3, %v2548_v21, 0.0  ;;  %v2657_v21 = vmul.f32 %v5345_v36, %v5345_v36  ;;  %v2612_v36 = vsel %vm1035_vm3, %v5384_v44, 0.0 }
 0x373   : > { %v2593_v60 = vadd.f32 %v2592_v23, %v2591_v0  ;;  %v2656_v0 = vmul.f32 %v5336_v41, %v5336_v41  ;;  %v2610_v41 = vsel %vm1035_vm3, %v5376_v9, 0.0 }
 0x374   : > { %v2693_v7 = vsel %vm1035_vm3, %v2649_v26, 0.0 }
 0x375   : > { %v2694_v3 = vadd.f32 %v2693_v7, %v2692_v14  ;;  %v2614_v7 = vsel %vm1035_vm3, %v5400_v10, 0.0 }
 0x382   : > { %v2377_v6 = vpop.f32.mrf.mxu2 }
 0x383   : > { %v2517_v17 = vadd.f32 %v2516_v34, %v2377_v6 }
 0x385   : > { %v5419_v47 = vadd.f32 %v5141_v16, %v2517_v17  ;;  %v2707_v17 = vsel %vm1035_vm3, %v2656_v0, 0.0 }
 0x387   : > { %2767 = vst.msk [vmem:[%s5147_s21 + $0xd0] sm:$0xff] %vm1035_vm3, %v5419_v47  ;;  %v2618_v10 = vsel %vm1035_vm3, %v5419_v47, 0.0 }
 0x38a   : > { %v2379_v18 = vpop.f32.mrf.mxu2 }
 0x38b   : > { %v2519_v42 = vadd.f32 %v2518_v53, %v2379_v18  ;;  %v2658_v53 = vmul.f32 %v5376_v9, %v5376_v9 }
 0x38d   : > { %v5425_v31 = vadd.f32 %v5141_v16, %v2519_v42  ;;  %v2347_v22 = vpop.f32.mrf.mxu0  ;;  %v2521_v42 = vpop.f32.mrf.mxu3  ;;  %v2711_v26 = vsel %vm1035_vm3, %v2658_v53, 0.0 }
 0x38e   : > { %v2487_v28 = vadd.f32 %v2486_v61, %v2347_v22  ;;  %v2709_v22 = vsel %vm1035_vm3, %v2657_v21, 0.0 }
 0x38f   : > { %2768 = vst.msk [vmem:[%s5147_s21 + $0xd8] sm:$0xff] %vm1035_vm3, %v5425_v31 }
 0x390   : > { %v2549_v46 = vadd.f32 %v5141_v16, %v2487_v28  ;;  %v2659_v28 = vmul.f32 %v5384_v44, %v5384_v44 }
 0x392   : > { %2755 = vst.msk [vmem:[%s5147_s21 + $0x70] sm:$0xff] %vm1035_vm3, %v2549_v46  ;;  %v2650_v19 = vmul.f32 %v2549_v46, %v2549_v46  ;;  %v2594_v48 = vsel %vm1035_vm3, %v2549_v46, 0.0  ;;  %v2713_v9 = vsel %vm1035_vm3, %v2659_v28, 0.0 }
 0x393   : > { %v2595_v5 = vadd.f32 %v2594_v48, %v2593_v60  ;;  %v2661_v48 = vmul.f32 %v5406_v30, %v5406_v30  ;;  %v2715_v60 = vsel %vm1035_vm3, %v2660_v32, 0.0 }
 0x394   : > { %v2695_v63 = vsel %vm1035_vm3, %v2650_v19, 0.0 }
 0x395   : > { %v2349_v27 = vpop.f32.mrf.mxu0  ;;  %v2696_v56 = vadd.f32 %v2695_v63, %v2694_v3  ;;  %v2616_v63 = vsel %vm1035_vm3, %v5406_v30, 0.0  ;;  %v2662_v30 = vmul.f32 %v5419_v47, %v5419_v47 }
 0x396   : > { %v2489_v8 = vadd.f32 %v2488_v13, %v2349_v27 }
 0x398   : > { %v2550_v45 = vadd.f32 %v5141_v16, %v2489_v8 }
 0x39a   : > { %v2596_v52 = vsel %vm1035_vm3, %v2550_v45, 0.0  ;;  %v2651_v2 = vmul.f32 %v2550_v45, %v2550_v45  ;;  %2756 = vst.msk [vmem:[%s5147_s21 + $0x78] sm:$0xff] %vm1035_vm3, %v2550_v45 }
 0x39b   : > { %v2597_v33 = vadd.f32 %v2596_v52, %v2595_v5  ;;  %v2717_v5 = vsel %vm1035_vm3, %v2661_v48, 0.0 }
 0x39c   : > { %v2697_v49 = vsel %vm1035_vm3, %v2651_v2, 0.0  ;;  %v2523_v2 = vpop.f32.mrf.mxu3 }
 0x39d   : > { %v2599_v54 = vadd.f32 %v2598_v1, %v2597_v33  ;;  %v2698_v29 = vadd.f32 %v2697_v49, %v2696_v56  ;;  %v2719_v49 = vsel %vm1035_vm3, %v2662_v30, 0.0 }
 0x39f   : > { %v2601_v37 = vadd.f32 %v2600_v43, %v2599_v54  ;;  %v2700_v55 = vadd.f32 %v2699_v38, %v2698_v29  ;;  %v2663_v54 = vmul.f32 %v5425_v31, %v5425_v31  ;;  %v2620_v43 = vsel %vm1035_vm3, %v5425_v31, 0.0 }
 0x3a1   : > { %v2603_v20 = vadd.f32 %v2602_v40, %v2601_v37  ;;  %v2702_v24 = vadd.f32 %v2701_v59, %v2700_v55  ;;  %v2721_v55 = vsel %vm1035_vm3, %v2663_v54, 0.0 }
 0x3a3   : > { %v2605_v15 = vadd.f32 %v2604_v12, %v2603_v20  ;;  %v2704_v57 = vadd.f32 %v2703_v11, %v2702_v24 }
 0x3a4   : > { %v2526_v39 = vpop.f32.mrf.mxu3 }
 0x3a5   : > { %v2607_v34 = vadd.f32 %v2606_v58, %v2605_v15  ;;  %v2706_v6 = vadd.f32 %v2705_v4, %v2704_v57 }
 0x3a7   : > { %v2609_v18 = vadd.f32 %v2608_v35, %v2607_v34  ;;  %v2708_v61 = vadd.f32 %v2707_v17, %v2706_v6 }
 0x3a9   : > { %v2710_v51 = vadd.f32 %v2709_v22, %v2708_v61  ;;  %v2611_v46 = vadd.f32 %v2610_v41, %v2609_v18 }
 0x3aa   : > { %v2382_v23 = vpop.f32.mrf.mxu2 }
 0x3ab   : > { %v2522_v19 = vadd.f32 %v2521_v42, %v2382_v23  ;;  %v2613_v13 = vadd.f32 %v2612_v36, %v2611_v46  ;;  %v2712_v27 = vadd.f32 %v2711_v26, %v2710_v51 }
 0x3ac   : > { %v2528_v0 = vpop.f32.mrf.mxu3 }
 0x3ad   : > { %v2563_v8 = vadd.f32 %v5141_v16, %v2522_v19  ;;  %v2615_v44 = vadd.f32 %v2614_v7, %v2613_v13  ;;  %v2714_v14 = vadd.f32 %v2713_v9, %v2712_v27 }
 0x3af   : > { %v2617_v45 = vadd.f32 %v2616_v63, %v2615_v44  ;;  %v2716_v3 = vadd.f32 %v2715_v60, %v2714_v14  ;;  %2769 = vst.msk [vmem:[%s5147_s21 + $0xe0] sm:$0xff] %vm1035_vm3, %v2563_v8  ;;  %v2664_v59 = vmul.f32 %v2563_v8, %v2563_v8  ;;  %v2622_v47 = vsel %vm1035_vm3, %v2563_v8, 0.0 }
 0x3b1   : > { %v2619_v62 = vadd.f32 %v2618_v10, %v2617_v45  ;;  %v2718_v52 = vadd.f32 %v2717_v5, %v2716_v3  ;;  %v2723_v11 = vsel %vm1035_vm3, %v2664_v59, 0.0 }
 0x3b2   : > { %v2384_v56 = vpop.f32.mrf.mxu2 }
 0x3b3   : > { %v2524_v33 = vadd.f32 %v2523_v2, %v2384_v56  ;;  %v2720_v29 = vadd.f32 %v2719_v49, %v2718_v52  ;;  %v2621_v37 = vadd.f32 %v2620_v43, %v2619_v62 }
 0x3b5   : > { %v2564_v1 = vadd.f32 %v5141_v16, %v2524_v33  ;;  %v2722_v50 = vadd.f32 %v2721_v55, %v2720_v29  ;;  %v2623_v24 = vadd.f32 %v2622_v47, %v2621_v37 }
 0x3b7   : > { %2770 = vst.msk [vmem:[%s5147_s21 + $0xe8] sm:$0xff] %vm1035_vm3, %v2564_v1  ;;  %v2665_v20 = vmul.f32 %v2564_v1, %v2564_v1  ;;  %v2624_v12 = vsel %vm1035_vm3, %v2564_v1, 0.0  ;;  %v2724_v15 = vadd.f32 %v2723_v11, %v2722_v50 }
 0x3b8   : > { %v2625_v34 = vadd.f32 %v2624_v12, %v2623_v24 }
 0x3b9   : > { %v2725_v4 = vsel %vm1035_vm3, %v2665_v20, 0.0 }
 0x3ba   : > { %v2726_v35 = vadd.f32 %v2725_v4, %v2724_v15 }
 0x3c1   : > { %v2387_v38 = vpop.f32.mrf.mxu2 }
 0x3c2   : > { %v2527_v25 = vadd.f32 %v2526_v39, %v2387_v38 }
 0x3c4   : > { %v2565_v40 = vadd.f32 %v5141_v16, %v2527_v25 }
 0x3c6   : > { %2771 = vst.msk [vmem:[%s5147_s21 + $0xf0] sm:$0xff] %vm1035_vm3, %v2565_v40  ;;  %v2666_v31 = vmul.f32 %v2565_v40, %v2565_v40  ;;  %v2626_v58 = vsel %vm1035_vm3, %v2565_v40, 0.0 }
 0x3c7   : > { %v2627_v53 = vadd.f32 %v2626_v58, %v2625_v34 }
 0x3c8   : > { %v2727_v6 = vsel %vm1035_vm3, %v2666_v31, 0.0 }
 0x3c9   : > { %v2389_v57 = vpop.f32.mrf.mxu2  ;;  %v2728_v42 = vadd.f32 %v2727_v6, %v2726_v35 }
 0x3ca   : > { %v2529_v21 = vadd.f32 %v2528_v0, %v2389_v57 }
 0x3cc   : > { %v2566_v17 = vadd.f32 %v5141_v16, %v2529_v21 }
 0x3ce   : > { %v2628_v18 = vsel %vm1035_vm3, %v2566_v17, 0.0  ;;  %v2667_v61 = vmul.f32 %v2566_v17, %v2566_v17  ;;  %2772 = vst.msk [vmem:[%s5147_s21 + $0xf8] sm:$0xff] %vm1035_vm3, %v2566_v17 }
 0x3cf   : > { %v2629_v22 = vadd.f32 %v2628_v18, %v2627_v53 }
 0x3d0   : > { %v2729_v41 = vsel %vm1035_vm3, %v2667_v61, 0.0 }
 0x3d1   : > { %v2630_v28 = vrot.slane %v2629_v22, 4  ;;  %v2730_v51 = vadd.f32 %v2729_v41, %v2728_v42 }
 0x3d3   : > { %v2631_v46 = vadd.f32 %v2630_v28, %v2629_v22  ;;  %v2731_v26 = vrot.slane %v2730_v51, 4 }
 0x3d5   : > { %v2632_v36 = vrot.slane %v2631_v46, 2  ;;  %v2732_v32 = vadd.f32 %v2731_v26, %v2730_v51 }
 0x3d7   : > { %v2633_v16 = vadd.f32 %v2632_v36, %v2631_v46  ;;  %v2733_v23 = vrot.slane %v2732_v32, 2 }
 0x3d9   : > { %v2634_v19 = vrot.slane %v2633_v16, 1  ;;  %v2734_v13 = vadd.f32 %v2733_v23, %v2732_v32 }
 0x3db   : > { %v2735_v27 = vrot.slane %v2734_v13, 1  ;;  %v2635_v9 = vadd.f32 %v2634_v19, %v2633_v16 }
 0x3dd   : > { %v2736_v7 = vadd.f32 %v2735_v27, %v2734_v13 }
 0x3df   : > { %v2738_v48 = vsel %vm2737_vm12, %v2635_v9, %v2736_v7 }
 0x3e0   : > { %2740 = vst.msk [vmem:[%s345_s17] sm:$0x3] %vm2739_vm13, %v2738_v48 }
 0x3e1 PF: > { %s17_s25 = sadd.s32 1, %s3332_s25   ;;  %s5744_s21 = smov %s3324_s23 }
 0x3e2   : > { %p14_p8 = scmp.ge.s32.totalorder %s17_s25, 10   ;;  %s5745_s22 = smov %s3328_s24 }
 0x3e3   : > { %s5746_s23 = smov %s5749_s26  ;;  %s5747_s24 = smov %s5753_s27 }
 0x3e4   :  { %16 = sbr.rel (!%p14_p8) target bundleno = 3 (0x3), region = 85 }

// kernel: up_forward.8
= control target key start
LH: loop header
LB: loop body
LE: loop exit
PB: predicated region body
PF: predicated region fallthrough
CT: control target
= control target key end

     0   :  { %s1988_s15 = smov 0   ;;  %s1990_s16 = smov 0   ;;  %s3056_s0 = inlined_call_operand.vmem [shape: bf16[2,4,10,34,4], index: 0, kind: input, shape index: {}]   ;;  %s3057_s1 = inlined_call_operand.vmem [shape: bf16[36,4], index: 1, kind: input, shape index: {}]   ;;  %s3058_s2 = inlined_call_operand.vmem [shape: f32[1,4], index: 2, kind: input, shape index: {}]   ;;  %s3059_s3 = inlined_call_operand.vmem [shape: f32[2,32,32,4], index: 3, kind: output, shape index: {0}]   ;;  %s3060_s4 = inlined_call_operand.vmem [shape: f32[2,4,2,4], index: 4, kind: output, shape index: {1}]  }
   0x1   :  { %s1992_s17 = smov 0   ;;  %s1994_s18 = smov 0  }
   0x2   :  { %s1996_s19 = smov 0  }
   0x3 LB: > { %s24_s20 = sadd.s32 1, %s1945_s17  ;;  %s27_s21 = sadd.s32 1, %s1949_s18  ;;  %s1953_s19 = sphi %s1996_s19, %s15_s19   ;;  %s1949_s18 = sphi %s1994_s18, %s3072_s18   ;;  %s1945_s17 = sphi %s1992_s17, %s3071_s17   ;;  %s1941_s16 = sphi %s1990_s16, %s3070_s16   ;;  %s1937_s15 = sphi %s1988_s15, %s3069_s15  }
   0x4   : > { %p25_p0 = scmp.ge.s32.totalorder %s24_s20, 4  ;;  %p1717_p1 = scmp.ge.s32.totalorder %s1953_s19, 1 }
   0x5   : > { %p187_p2 = scmp.lt.s32.totalorder %s1953_s19, 9 }
   0x6   : > { %s3074_s20 = smov (%p25_p0, %s24_s20), 0  ;;  %s3076_s21 = smov (!%p25_p0, %s27_s21), %s1949_s18 }
   0x7   : > { %p188_p3 = pnand %p1717_p1, %p187_p2  ;;  %p29_p4 = scmp.ge.s32.totalorder %s3076_s21, 2 }
   0x9   : > { %s3078_s21 = smov (%p29_p4, %s3076_s21), 0  ;;  %191 = sbr.rel (%p188_p3) target bundleno = 648 (0x288), region = 32 }
   0xe   : > { %p230_p5 = scmp.lt.s32.totalorder %s1941_s16, 1  ;;  %p232_p6 = scmp.lt.s32.totalorder %s1937_s15, 3  ;;  %vm413_vm0 = vsmask.f32 7424  ;;  %vm606_vm1 = vcmask 1046528   ;;  %vm980_vm2 = vcmask 64512  }
   0xf   : > { %s1955_s30 = smov 4   ;;  %s1956_s5 = smov 8   ;;  %vm947_vm3 = vcmask 31744   ;;  %vm1268_vm4 = vcmask 1041408   ;;  %vm1013_vm5 = vcmask 97280   ;;  %vm1046_vm6 = vcmask 130048  }
  0x10   : > { %s3080_s16 = smov (!%p230_p5, %s1941_s16), 1  ;;  %s1957_s6 = smov 20   ;;  %vm1079_vm7 = vcmask 162816   ;;  %vm1112_vm8 = vcmask 195584   ;;  %vm1145_vm9 = vcmask 228352   ;;  %vm1178_vm10 = vcmask 261120  }
  0x11   : > { %s2024_s22 = scalar_select %p232_p6, %s1937_s15, 3  ;;  %vm1235_vm11 = vcmask 293888   ;;  %vm1531_vm12 = vcmask 1040384   ;;  %vm1533_vm13 = vcmask 25600  }
  0x12   : > { %s1863_s23 = smul.u32 200, %s3080_s16  ;;  %s1958_s7 = smov 16  }
  0x13   : > { %s1862_s24 = smul.u32 50, %s2024_s22  ;;  %s1959_s8 = smov 12  }
  0x14   : > { %s1960_s9 = smov 32   ;;  %s1961_s10 = smov 28  }
  0x15   : > { %s236_s25 = sadd.s32 %s1863_s23, %s1862_s24  ;;  %s1962_s11 = smov 24  }
  0x16   : > { %s1718_s26 = sshll.u32 %s236_s25, 2  ;;  %s1721_s27 = sshll.u32 %s3080_s16, 7 }
  0x17   : > { %s2031_s29 = scalar_lea.vmem %s3056_s0, %s1718_s26  ;;  %s1719_s26 = sshll.u32 %s1937_s15, 3 }
  0x18   : > { %v2034_v0 = vld [vmem:[%s2031_s29 + $0x28] sm:$0xff]  ;;  %v2037_v1 = vld [vmem:[%s2031_s29 + $0x30] sm:$0xff]  ;;  %v2043_v3 = vld [vmem:[%s2031_s29 + $0x1c] sm:$0xff]  ;;  %p242_p7 = scmp.lt.s32.totalorder %s1719_s26, 31 }
  0x19   : > { %v2040_v2 = vld [vmem:[%s2031_s29 + $0x14] sm:$0xff]  ;;  %v2046_v4 = vld [vmem:[%s2031_s29] sm:$0xff]  ;;  %v2049_v5 = vld [vmem:[%s2031_s29 + $0x8] sm:$0xff]  ;;  %v455_v6 = vshrl.u32 %v2034_v0, 16  ;;  %v457_v7 = vshll.u32 %v2034_v0, 16  ;;  %v462_v8 = vshll.u32 %v2037_v1, 16 }
  0x1a   : > { %v435_v9 = vshrl.u32 %v2040_v2, 16  ;;  %v273_v10 = vld [vmem:[%s2031_s29 + $0x38] sm:$0x1]  ;;  %v437_v11 = vshll.u32 %v2040_v2, 16  ;;  %v442_v12 = vshll.u32 %v2043_v3, 16  ;;  %v415_v13 = vshrl.u32 %v2046_v4, 16 }
  0x1b   : > { %v417_v14 = vshll.u32 %v2046_v4, 16  ;;  %v268_v15 = vld [vmem:[%s2031_s29 + $0x24] sm:$0x1]  ;;  %v459_v16 = vrot.slane %v457_v7, 1  ;;  %v464_v17 = vrot.slane %v462_v8, 1  ;;  %v422_v18 = vshll.u32 %v2049_v5, 16 }
  0x1c   : > { %v399_v19 = vunpack.c.l.b16 %v273_v10  ;;  %v439_v20 = vrot.slane %v437_v11, 1  ;;  %v444_v21 = vrot.slane %v442_v12, 1  ;;  %v466_v23 = vshrl.u32 %v2037_v1, 16  ;;  %v263_v24 = vld [vmem:[%s2031_s29 + $0x10] sm:$0x1]  ;;  %v2077_v37 = vld [vmem:[%s2031_s29 + $0x58] sm:$0xff] }
  0x1d   : > { %v419_v22 = vrot.slane %v417_v14, 1  ;;  %v460_v25 = vor.u32 %v459_v16, %v455_v6  ;;  %v424_v26 = vrot.slane %v422_v18, 1  ;;  %v398_v28 = vunpack.c.l.b16 %v268_v15  ;;  %v2068_v32 = vld [vmem:[%s2031_s29 + $0x50] sm:$0xff]  ;;  %v2080_v38 = vld [vmem:[%s2031_s29 + $0x44] sm:$0xff]  ;;  %v278_v39 = vld [vmem:[%s2031_s29 + $0x4c] sm:$0x1] }
  0x1e   : > { %v2064_v27 = vpack.c.b16 %v399_v19, %v399_v19  ;;  %v440_v29 = vor.u32 %v439_v20, %v435_v9  ;;  %v446_v31 = vshrl.u32 %v2043_v3, 16  ;;  %v397_v36 = vunpack.c.l.b16 %v263_v24  ;;  %v2098_v51 = vld [vmem:[%s2031_s29 + $0x3c] sm:$0xff]  ;;  %v288_v56 = vld [vmem:[%s2031_s29 + $0x74] sm:$0x1]  ;;  %v2111_v61 = vld [vmem:[%s2031_s29 + $0x6c] sm:$0xff]  ;;  %s3082_s26 = smov (!%p242_p7, %s1719_s26), 31 }
  0x1f   : > { %v420_v30 = vor.u32 %v419_v22, %v415_v13  ;;  %v2071_v33 = vsel %vm413_vm0, %v460_v25, %v464_v17  ;;  %v2074_v35 = vpack.c.b16 %v398_v28, %v398_v28  ;;  %v468_v42 = vor.u32 %v466_v23, %v464_v17  ;;  %v2118_v8 = vld [vmem:[%s2031_s29 + $0x64] sm:$0xff]  ;;  %v283_v13 = vld [vmem:[%s2031_s29 + $0x60] sm:$0x1]  ;;  %s1720_s15 = sshll.u32 %s3082_s26, 2 }
  0x20   : > { %v470_v34 = vshll.u32 %v2064_v27, 16  ;;  %582 = vrot.lane.b32.xlu2 %v2071_v33, %s1955_s30  ;;  %v2086_v40 = vsel %vm413_vm0, %v440_v29, %v444_v21  ;;  %v426_v43 = vshrl.u32 %v2049_v5, 16  ;;  %v448_v45 = vor.u32 %v446_v31, %v444_v21  ;;  %v2140_v31 = vld [vmem:[%s2031_s29 + $0x8c] sm:$0xff]  ;;  %s246_s28 = sadd.s32 %s1721_s27, %s1720_s15 }
  0x21   : > { %v425_v41 = vsel %vm413_vm0, %v420_v30, %v424_v26  ;;  %578 = vrot.lane.b32.xlu1 %v2086_v40, %s1955_s30  ;;  %v450_v46 = vshll.u32 %v2074_v35, 16  ;;  %v2094_v47 = vpack.c.b16 %v397_v36, %v397_v36  ;;  %v497_v49 = vshll.u32 %v2068_v32, 16 }
  0x22   : > { %574 = vrot.lane.b32.xlu0 %v425_v41, %s1955_s30  ;;  %v472_v44 = vrot.slane %v470_v34, 1  ;;  %v428_v48 = vor.u32 %v426_v43, %v424_v26  ;;  %v400_v50 = vunpack.c.l.b16 %v278_v39  ;;  %v502_v54 = vshll.u32 %v2077_v37, 16  ;;  %v293_v26 = vld [vmem:[%s2031_s29 + $0x88] sm:$0x1] }
  0x23   : > { %v452_v52 = vrot.slane %v450_v46, 1  ;;  %v430_v53 = vshll.u32 %v2094_v47, 16  ;;  %v482_v55 = vshll.u32 %v2080_v38, 16  ;;  %v495_v58 = vshrl.u32 %v2068_v32, 16 }
  0x24   : > { %v2105_v57 = vsel %vm413_vm0, %v468_v42, %v472_v44  ;;  %v499_v59 = vrot.slane %v497_v49, 1  ;;  %v2108_v60 = vpack.c.b16 %v400_v50, %v400_v50  ;;  %v486_v7 = vshrl.u32 %v2080_v38, 16  ;;  %v2150_v42 = vld [vmem:[%s2031_s29 + $0x80] sm:$0xff] }
  0x25   : > { %v2114_v62 = vsel %vm413_vm0, %v448_v45, %v452_v52  ;;  %v432_v63 = vrot.slane %v430_v53, 1  ;;  %v484_v6 = vrot.slane %v482_v55, 1  ;;  %v475_v10 = vshrl.u32 %v2098_v51, 16  ;;  %v2163_v52 = vld [vmem:[%s2031_s29 + $0x94] sm:$0xff] }
  0x26   : > { %v490_v9 = vshll.u32 %v2108_v60, 16  ;;  %v477_v11 = vshll.u32 %v2098_v51, 16  ;;  %v402_v12 = vunpack.c.l.b16 %v288_v56  ;;  %v504_v15 = vrot.slane %v502_v54, 1 }
  0x27   : > { %v433_v14 = vsel %vm413_vm0, %v428_v48, %v432_v63  ;;  %v500_v16 = vor.u32 %v499_v59, %v495_v58  ;;  %v522_v19 = vshll.u32 %v2111_v61, 16  ;;  %v488_v20 = vor.u32 %v486_v7, %v484_v6  ;;  %v2158_v48 = vld [vmem:[%s2031_s29 + $0x78] sm:$0xff] }
  0x28   : > { %584 = vrot.lane.b32.xlu2 %v2105_v57, %s1955_s30  ;;  %v479_v17 = vrot.slane %v477_v11, 1  ;;  %v2127_v18 = vpack.c.b16 %v402_v12, %v402_v12  ;;  %v492_v21 = vrot.slane %v490_v9, 1  ;;  %v517_v22 = vshll.u32 %v2118_v8, 16 }
  0x29   : > { %580 = vrot.lane.b32.xlu1 %v2114_v62, %s1955_s30  ;;  %v401_v23 = vunpack.c.l.b16 %v283_v13  ;;  %v524_v28 = vrot.slane %v522_v19, 1  ;;  %v526_v29 = vshrl.u32 %v2111_v61, 16  ;;  %v2143_v34 = vsel %vm413_vm0, %v500_v16, %v504_v15 }
  0x2a   : > { %576 = vrot.lane.b32.xlu0 %v433_v14, %s1955_s30  ;;  %v480_v24 = vor.u32 %v479_v17, %v475_v10  ;;  %v530_v30 = vshll.u32 %v2127_v18, 16  ;;  %v2146_v36 = vsel %vm413_vm0, %v488_v20, %v492_v21  ;;  %v515_v39 = vshrl.u32 %v2118_v8, 16 }
  0x2b   : > { %v2134_v25 = vpack.c.b16 %v401_v23, %v401_v23  ;;  %v519_v41 = vrot.slane %v517_v22, 1  ;;  %v506_v44 = vshrl.u32 %v2077_v37, 16  ;;  %v403_v46 = vunpack.c.l.b16 %v293_v26 }
  0x2c   : > { %v2153_v43 = vsel %vm413_vm0, %v480_v24, %v484_v6  ;;  %v528_v49 = vor.u32 %v526_v29, %v524_v28  ;;  %v532_v50 = vrot.slane %v530_v30, 1  ;;  %v557_v53 = vshll.u32 %v2140_v31, 16  ;;  %v298_v6 = vld [vmem:[%s2031_s29 + $0x9c] sm:$0x1] }
  0x2d   : > { %v510_v45 = vshll.u32 %v2134_v25, 16  ;;  %v520_v54 = vor.u32 %v519_v41, %v515_v39  ;;  %v542_v55 = vshll.u32 %v2150_v42, 16  ;;  %v508_v56 = vor.u32 %v506_v44, %v504_v15 }
  0x2e   : > { %v2171_v59 = vpack.c.b16 %v403_v46, %v403_v46  ;;  %v537_v63 = vshll.u32 %v2158_v48, 16  ;;  %v2176_v7 = vsel %vm413_vm0, %v528_v49, %v532_v50  ;;  %v555_v9 = vshrl.u32 %v2140_v31, 16 }
  0x2f   : > { %v512_v58 = vrot.slane %v510_v45, 1  ;;  %v559_v10 = vrot.slane %v557_v53, 1  ;;  %v562_v11 = vshll.u32 %v2163_v52, 16  ;;  %v2181_v12 = vsel %vm413_vm0, %v520_v54, %v524_v28 }
  0x30   : > { %590 = vrot.lane.b32.xlu2 %v2143_v34, %s1955_s30  ;;  %v544_v13 = vrot.slane %v542_v55, 1  ;;  %v546_v14 = vshrl.u32 %v2150_v42, 16  ;;  %v535_v15 = vshrl.u32 %v2158_v48, 16  ;;  %v550_v17 = vshll.u32 %v2171_v59, 16 }
  0x31   : > { %588 = vrot.lane.b32.xlu1 %v2146_v36, %s1955_s30  ;;  %v2186_v16 = vsel %vm413_vm0, %v508_v56, %v512_v58  ;;  %v539_v19 = vrot.slane %v537_v63, 1  ;;  %v404_v20 = vunpack.c.l.b16 %v298_v6  ;;  %v560_v21 = vor.u32 %v559_v10, %v555_v9 }
  0x32   : > { %586 = vrot.lane.b32.xlu0 %v2153_v43, %s1955_s30  ;;  %v564_v22 = vrot.slane %v562_v11, 1  ;;  %v548_v23 = vor.u32 %v546_v14, %v544_v13  ;;  %v552_v24 = vrot.slane %v550_v17, 1  ;;  %v566_v41 = vshrl.u32 %v2163_v52, 16 }
  0x33   : > { %v540_v26 = vor.u32 %v539_v19, %v535_v15  ;;  %v2195_v28 = vpack.c.b16 %v404_v20, %v404_v20  ;;  %v608_v45 = vrot.slane %v2049_v5, 1  ;;  %v610_v46 = vrot.slane %v2094_v47, 1 }
  0x34   : > { %v2198_v29 = vsel %vm413_vm0, %v560_v21, %v564_v22  ;;  %v2201_v30 = vsel %vm413_vm0, %v548_v23, %v552_v24  ;;  %v607_v49 = vrot.slane %v2046_v4, 1  ;;  %v568_v50 = vor.u32 %v566_v41, %v564_v22 }
  0x35   : > { %v2204_v39 = vsel %vm413_vm0, %v540_v26, %v544_v13  ;;  %v570_v44 = vshll.u32 %v2195_v28, 16  ;;  %v611_v54 = vsel %vm606_vm1, %v608_v45, %v610_v46  ;;  %v617_v47 = vrot.slane %v2034_v0, 1 }
  0x36   : > { %v609_v55 = vsel %vm606_vm1, %v607_v49, %v608_v45  ;;  %v618_v58 = vrot.slane %v2037_v1, 1  ;;  %v613_v63 = vrot.slane %v2043_v3, 1  ;;  %v615_v6 = vrot.slane %v2074_v35, 1 }
  0x37   : > { %v572_v53 = vrot.slane %v570_v44, 1  ;;  %v612_v9 = vrot.slane %v2040_v2, 1  ;;  %v623_v14 = vrot.slane %v2080_v38, 1  ;;  %v625_v35 = vrot.slane %v2108_v60, 1 }
  0x38   : > { %596 = vrot.lane.b32.xlu2 %v2176_v7, %s1955_s30  ;;  %v2232_v10 = vsel %vm606_vm1, %v617_v47, %v618_v58  ;;  %v616_v11 = vsel %vm606_vm1, %v613_v63, %v615_v6  ;;  %v622_v15 = vrot.slane %v2098_v51, 1  ;;  %v620_v17 = vrot.slane %v2064_v27, 1 }
  0x39   : > { %594 = vrot.lane.b32.xlu1 %v2181_v12, %s1955_s30  ;;  %v2220_v56 = vsel %vm413_vm0, %v568_v50, %v572_v53  ;;  %v614_v13 = vsel %vm606_vm1, %v612_v9, %v613_v63  ;;  %v2245_v19 = vsel %vm606_vm1, %v623_v14, %v625_v35  ;;  %v632_v27 = vrot.slane %v2118_v8, 1 }
  0x3a   : > { %592 = vrot.lane.b32.xlu0 %v2186_v16, %s1955_s30  ;;  %v2248_v20 = vsel %vm606_vm1, %v622_v15, %v623_v14  ;;  %v2251_v21 = vsel %vm606_vm1, %v618_v58, %v620_v17  ;;  %v633_v60 = vrot.slane %v2111_v61, 1  ;;  %v628_v22 = vrot.slane %v2077_v37, 1 }
  0x3b   : > { %v630_v23 = vrot.slane %v2134_v25, 1  ;;  %v627_v24 = vrot.slane %v2068_v32, 1  ;;  %v638_v25 = vrot.slane %v2150_v42, 1  ;;  %v640_v45 = vrot.slane %v2171_v59, 1 }
  0x3c   : > { %v2265_v26 = vsel %vm606_vm1, %v632_v27, %v633_v60  ;;  %v637_v46 = vrot.slane %v2158_v48, 1  ;;  %v635_v49 = vrot.slane %v2127_v18, 1 }
  0x3d   : > { %v2268_v41 = vsel %vm606_vm1, %v628_v22, %v630_v23  ;;  %v2271_v44 = vsel %vm606_vm1, %v627_v24, %v628_v22  ;;  %v2284_v50 = vsel %vm606_vm1, %v638_v25, %v640_v45 }
  0x3e   : > { %v2287_v53 = vsel %vm606_vm1, %v637_v46, %v638_v25 }
  0x40   : > { %602 = vrot.lane.b32.xlu2 %v2198_v29, %s1955_s30 }
  0x41   : > { %600 = vrot.lane.b32.xlu1 %v2201_v30, %s1955_s30 }
  0x42   : > { %598 = vrot.lane.b32.xlu0 %v2204_v39, %s1955_s30 }
  0x48   : > { %649 = vrot.lane.b32.xlu2 %v611_v54, %s1956_s5  ;;  %v2290_v54 = vsel %vm606_vm1, %v633_v60, %v635_v49 }
  0x49   : > { %647 = vrot.lane.b32.xlu1 %v609_v55, %s1956_s5 }
  0x4a   : > { %604 = vrot.lane.b32.xlu0 %v2220_v56, %s1955_s30  ;;  %s1722_s30 = sshll.u32 %s246_s28, 3 }
  0x50   : > { %655 = vrot.lane.b32.xlu2 %v2232_v10, %s1956_s5 }
  0x51   : > { %653 = vrot.lane.b32.xlu1 %v616_v11, %s1956_s5 }
  0x52   : > { %651 = vrot.lane.b32.xlu0 %v614_v13, %s1956_s5 }
  0x58   : > { %661 = vrot.lane.b32.xlu2 %v2245_v19, %s1956_s5 }
  0x59   : > { %659 = vrot.lane.b32.xlu1 %v2248_v20, %s1956_s5 }
  0x5a   : > { %657 = vrot.lane.b32.xlu0 %v2251_v21, %s1956_s5 }
  0x60   : > { %667 = vrot.lane.b32.xlu2 %v2265_v26, %s1956_s5 }
  0x61   : > { %665 = vrot.lane.b32.xlu1 %v2268_v41, %s1956_s5 }
  0x62   : > { %663 = vrot.lane.b32.xlu0 %v2271_v44, %s1956_s5 }
  0x68   : > { %673 = vrot.lane.b32.xlu2 %v2284_v50, %s1956_s5 }
  0x69   : > { %671 = vrot.lane.b32.xlu1 %v2287_v53, %s1956_s5 }
  0x6a   : > { %669 = vrot.lane.b32.xlu0 %v2290_v54, %s1956_s5 }
  0x70   : > { %781 = vrot.lane.b32.xlu2 %v614_v13, %s1957_s6 }
  0x71   : > { %744 = vrot.lane.b32.xlu1 %v2086_v40, %s1958_s7 }
  0x72   : > { %689 = vrot.lane.b32.xlu0 %v2040_v2, %s1959_s8 }
  0x78   : > { %915 = vrot.lane.b32.xlu2 %v2232_v10, %s1960_s9 }
  0x79   : > { %878 = vrot.lane.b32.xlu1 %v2071_v33, %s1961_s10 }
  0x7a   : > { %823 = vrot.lane.b32.xlu0 %v2034_v0, %s1962_s11  ;;  %v583_v18 = vpop.permute.xlu2 %582 }
  0x7b   : > { %v957_v15 = vsel %vm947_vm3, %v2034_v0, %v583_v18 }
  0x80   : > { %746 = vrot.lane.b32.xlu2 %v2114_v62, %s1958_s7 }
  0x81   : > { %697 = vrot.lane.b32.xlu1 %v2098_v51, %s1959_s8 }
  0x82   : > { %691 = vrot.lane.b32.xlu0 %v2043_v3, %s1959_s8  ;;  %v2315_v40 = vpop.permute.xlu2 %584 }
  0x88   : > { %789 = vrot.lane.b32.xlu2 %v2248_v20, %s1957_s6 }
  0x89   : > { %783 = vrot.lane.b32.xlu1 %v616_v11, %s1957_s6 }
  0x8a   : > { %752 = vrot.lane.b32.xlu0 %v2153_v43, %s1958_s7  ;;  %v2322_v59 = vpop.permute.xlu2 %590 }
  0x90   : > { %880 = vrot.lane.b32.xlu2 %v2105_v57, %s1961_s10 }
  0x91   : > { %831 = vrot.lane.b32.xlu1 %v2068_v32, %s1962_s11 }
  0x92   : > { %825 = vrot.lane.b32.xlu0 %v2037_v1, %s1962_s11  ;;  %v2330_v62 = vpop.permute.xlu2 %596 }
  0x93   : > { %v579_v55 = vpop.permute.xlu1 %578 }
  0x94   : > { %v2332_v47 = vpop.permute.xlu0 %574 }
  0x98   : > { %923 = vrot.lane.b32.xlu2 %v2271_v44, %s1960_s9 }
  0x99   : > { %917 = vrot.lane.b32.xlu1 %v2251_v21, %s1960_s9 }
  0x9a   : > { %886 = vrot.lane.b32.xlu0 %v2143_v34, %s1961_s10  ;;  %v2340_v58 = vpop.permute.xlu2 %602 }
  0x9b   : > { %3062 = vst [vmem:[#allocation2_spill] sm:$0xff] %v2340_v58  ;;  %v581_v63 = vpop.permute.xlu1 %580 }
  0x9c   : > { %v577_v6 = vpop.permute.xlu0 %576 }
  0x9d   : > { %v951_v9 = vsel %vm947_vm3, %v2049_v5, %v577_v6  ;;  %v1215_v6 = vld [vmem:[%s3057_s1 + $0x10] sm:$0x3] }
  0xa0   : > { %797 = vrot.lane.b32.xlu2 %v2265_v26, %s1957_s6 }
  0xa1   : > { %760 = vrot.lane.b32.xlu1 %v2181_v12, %s1958_s7 }
  0xa2   : > { %705 = vrot.lane.b32.xlu0 %v2118_v8, %s1959_s8  ;;  %v650_v11 = vpop.permute.xlu2 %649 }
  0xa3   : > { %v589_v13 = vpop.permute.xlu1 %588  ;;  %v2351_v14 = vsel %vm980_vm2, %v951_v9, %v650_v11  ;;  %v1229_v9 = vunpack.c.l.b16 %v1215_v6 }
  0xa4   : > { %v587_v35 = vpop.permute.xlu0 %586  ;;  %v963_v22 = vsel %vm947_vm3, %v2080_v38, %v589_v13 }
  0xa8   : > { %931 = vrot.lane.b32.xlu2 %v2287_v53, %s1960_s9 }
  0xa9   : > { %894 = vrot.lane.b32.xlu1 %v2204_v39, %s1961_s10 }
  0xaa   : > { %839 = vrot.lane.b32.xlu0 %v2158_v48, %s1962_s11  ;;  %v656_v17 = vpop.permute.xlu2 %655 }
  0xab   : > { %v595_v5 = vpop.permute.xlu1 %594  ;;  %v2362_v27 = vsel %vm980_vm2, %v957_v15, %v656_v17  ;;  %v953_v15 = vsel %vm947_vm3, %v2040_v2, %v579_v55  ;;  %v955_v17 = vsel %vm947_vm3, %v2043_v3, %v581_v63  ;;  %v1852_v2 = vld [vmem:[%s3057_s1 + $0x8] sm:$0xff]  ;;  %v1851_v55 = vld [vmem:[%s3057_s1] sm:$0xff]  ;;  %v959_v63 = vsel %vm947_vm3, %v2037_v1, %v2315_v40 }
  0xac   : > { %v2364_v60 = vpop.permute.xlu0 %592  ;;  %v3061_v40 = vrot.slane %v2163_v52, 1 }
  0xb0   : > { %748 = vrot.lane.b32.xlu2 %v2071_v33, %s1958_s7 }
  0xb1   : > { %699 = vrot.lane.b32.xlu1 %v2080_v38, %s1959_s8 }
  0xb2   : > { %693 = vrot.lane.b32.xlu0 %v2034_v0, %s1959_s8  ;;  %v662_v23 = vpop.permute.xlu2 %661  ;;  %v969_v0 = vsel %vm947_vm3, %v2118_v8, %v595_v5 }
  0xb3   : > { %v601_v24 = vpop.permute.xlu1 %600  ;;  %v2375_v25 = vsel %vm980_vm2, %v963_v22, %v662_v23 }
  0xb4   : > { %v2377_v45 = vpop.permute.xlu0 %598  ;;  %v975_v11 = vsel %vm947_vm3, %v2150_v42, %v601_v24  ;;  %v961_v24 = vsel %vm947_vm3, %v2098_v51, %v587_v35 }
  0xb8   : > { %791 = vrot.lane.b32.xlu2 %v2245_v19, %s1957_s6 }
  0xb9   : > { %785 = vrot.lane.b32.xlu1 %v2232_v10, %s1957_s6  ;;  %v1232_v10 = vpack.c.b16 %v1229_v9, %v1229_v9 }
  0xba   : > { %754 = vrot.lane.b32.xlu0 %v2146_v36, %s1958_s7  ;;  %v668_v33 = vpop.permute.xlu2 %667 }
  0xbb   : > { %v2388_v46 = vsel %vm980_vm2, %v969_v0, %v668_v33  ;;  %v2390_v49 = vpop.permute.xlu1 %647  ;;  %v1270_v23 = vsel %vm1268_vm4, %v1232_v10, 0 }
  0xbc   : > { %v2392_v18 = vpop.permute.xlu0 %604  ;;  %1277 = vmatpush.bf16.msra.mxu0 %v1270_v23  ;;  %1853 = vmatpush.bf16.msra.mxu1 %v1270_v23 }
  0xbd   : > { %3063 = vst [vmem:[#allocation3_spill] sm:$0xff] %v2392_v18  ;;  %1854 = vmatpush.bf16.msra.mxu2 %v1270_v23  ;;  %1855 = vmatpush.bf16.msra.mxu3 %v1270_v23 }
  0xc0   : > { %882 = vrot.lane.b32.xlu2 %v2153_v43, %s1961_s10  ;;  %1278 = vmatpush.bf16.msra.mxu0 %v1852_v2 }
  0xc1   : > { %833 = vrot.lane.b32.xlu1 %v2077_v37, %s1962_s11  ;;  %1856 = vmatpush.bf16.msra.mxu1 %v1852_v2 }
  0xc2   : > { %827 = vrot.lane.b32.xlu0 %v2098_v51, %s1962_s11  ;;  %v674_v13 = vpop.permute.xlu2 %673  ;;  %1857 = vmatpush.bf16.msra.mxu2 %v1852_v2  ;;  %v642_v51 = vrot.slane %v2140_v31, 1 }
  0xc3   : > { %v2410_v43 = vsel %vm980_vm2, %v975_v11, %v674_v13  ;;  %v654_v5 = vpop.permute.xlu1 %653  ;;  %1858 = vmatpush.bf16.msra.mxu3 %v1852_v2  ;;  %v965_v11 = vsel %vm947_vm3, %v2068_v32, %v2322_v59  ;;  %v967_v13 = vsel %vm947_vm3, %v2077_v37, %v2364_v60  ;;  %v2469_v2 = vld [vmem:[%s2031_s29 + $0xa0] sm:$0xff]  ;;  %v2478_v59 = vld [vmem:[%s2031_s29 + $0xa8] sm:$0xff] }
  0xc4   : > { %v652_v22 = vpop.permute.xlu0 %651  ;;  %v2413_v0 = vsel %vm980_vm2, %v955_v17, %v654_v5  ;;  %1279 = vmatpush.bf16.msra.mxu0 %v1851_v55  ;;  %v2466_v23 = vsel %vm606_vm1, %v642_v51, %v3061_v40  ;;  %v727_v60 = vshll.u32 %v2469_v2, 16 }
  0xc5   : > { %v2416_v33 = vsel %vm980_vm2, %v953_v15, %v652_v22  ;;  %1859 = vmatpush.bf16.msra.mxu1 %v1851_v55 }
  0xc6   : > { %1860 = vmatpush.bf16.msra.mxu2 %v1851_v55 }
  0xc7   : > { %1861 = vmatpush.bf16.msra.mxu3 %v1851_v55 }
  0xc8   : > { %925 = vrot.lane.b32.xlu2 %v2268_v41, %s1960_s9 }
  0xc9   : > { %919 = vrot.lane.b32.xlu1 %v2248_v20, %s1960_s9 }
  0xca   : > { %888 = vrot.lane.b32.xlu0 %v2186_v16, %s1961_s10  ;;  %v2427_v3 = vpop.permute.xlu2 %781 }
  0xcb   : > { %v660_v6 = vpop.permute.xlu1 %659 }
  0xcc   : > { %v658_v20 = vpop.permute.xlu0 %657  ;;  %v2438_v9 = vsel %vm980_vm2, %v961_v24, %v660_v6  ;;  %v973_v24 = vsel %vm947_vm3, %v2158_v48, %v2377_v45  ;;  %v777_v45 = vrot.slane %v2478_v59, 1 }
  0xcd   : > { %v2441_v10 = vsel %vm980_vm2, %v959_v63, %v658_v20  ;;  %v971_v63 = vsel %vm947_vm3, %v2111_v61, %v2330_v62  ;;  %v776_v62 = vrot.slane %v2469_v2, 1 }
  0xd0   : > { %762 = vrot.lane.b32.xlu2 %v2176_v7, %s1958_s7 }
  0xd1   : > { %713 = vrot.lane.b32.xlu1 %v2140_v31, %s1959_s8 }
  0xd2   : > { %707 = vrot.lane.b32.xlu0 %v2111_v61, %s1959_s8  ;;  %v916_v35 = vpop.permute.xlu2 %915 }
  0xd3   : > { %v666_v15 = vpop.permute.xlu1 %665 }
  0xd4   : > { %v664_v17 = vpop.permute.xlu0 %663  ;;  %v2458_v5 = vsel %vm980_vm2, %v967_v13, %v666_v15  ;;  %v725_v13 = vshrl.u32 %v2469_v2, 16  ;;  %v729_v15 = vrot.slane %v727_v60, 1 }
  0xd5   : > { %v2461_v22 = vsel %vm980_vm2, %v965_v11, %v664_v17  ;;  %v732_v17 = vshll.u32 %v2478_v59, 16 }
  0xd8   : > { %805 = vrot.lane.b32.xlu2 %v2466_v23, %s1957_s6 }
  0xd9   : > { %799 = vrot.lane.b32.xlu1 %v2290_v54, %s1957_s6 }
  0xda   : > { %768 = vrot.lane.b32.xlu0 %v2198_v29, %s1958_s7  ;;  %v2481_v55 = vpop.permute.xlu2 %746 }
  0xdb   : > { %v672_v6 = vpop.permute.xlu1 %671 }
  0xdc   : > { %v670_v20 = vpop.permute.xlu0 %669  ;;  %v2490_v51 = vsel %vm980_vm2, %v973_v24, %v672_v6  ;;  %v2505_v24 = vrot.slane %v732_v17, 1  ;;  %v949_v6 = vsel %vm947_vm3, %v2046_v4, %v2332_v47 }
  0xdd   : > { %v2493_v11 = vsel %vm980_vm2, %v971_v63, %v670_v20  ;;  %v730_v63 = vor.u32 %v729_v15, %v725_v13  ;;  %v982_v18 = vsel %vm980_vm2, %v949_v6, %v2390_v49 }
  0xde   : > { %3064 = vst [vmem:[#allocation4_spill] sm:$0xff] %v2493_v11  ;;  %v2516_v11 = vsel %vm606_vm1, %v776_v62, %v777_v45 }
  0xdf   : > { %v2520_v13 = vsel %vm413_vm0, %v730_v63, %v2505_v24 }
  0xe0   : > { %896 = vrot.lane.b32.xlu2 %v2201_v30, %s1961_s10 }
  0xe1   : > { %847 = vrot.lane.b32.xlu1 %v2469_v2, %s1962_s11 }
  0xe2   : > { %841 = vrot.lane.b32.xlu0 %v2150_v42, %s1962_s11  ;;  %v790_v60 = vpop.permute.xlu2 %789 }
  0xe3   : > { %v745_v20 = vpop.permute.xlu1 %744 }
  0xe4   : > { %v690_v40 = vpop.permute.xlu0 %689 }
  0xe5   : > { %v1015_v58 = vsel %vm1013_vm5, %v982_v18, %v690_v40 }
  0xe6   : > { %v1048_v4 = vsel %vm1046_vm6, %v1015_v58, %v745_v20 }
  0xe7   : > { %v1081_v49 = vsel %vm1079_vm7, %v1048_v4, %v2427_v3 }
  0xe8   : > { %939 = vrot.lane.b32.xlu2 %v2516_v11, %s1960_s9 }
  0xe9   : > { %933 = vrot.lane.b32.xlu1 %v2284_v50, %s1960_s9 }
  0xea   : > { %902 = vrot.lane.b32.xlu0 %v2520_v13, %s1961_s10  ;;  %v881_v47 = vpop.permute.xlu2 %880 }
  0xeb   : > { %v879_v18 = vpop.permute.xlu1 %878 }
  0xec   : > { %v824_v40 = vpop.permute.xlu0 %823 }
  0xed   : > { %v1114_v58 = vsel %vm1112_vm8, %v1081_v49, %v824_v40 }
  0xee   : > { %v1147_v15 = vsel %vm1145_vm9, %v1114_v58, %v879_v18 }
  0xef   : > { %v1180_v17 = vsel %vm1178_vm10, %v1147_v15, %v916_v35  ;;  %v303_v15 = vld [vmem:[%s2031_s29 + $0xb0] sm:$0x1] }
  0xf0   : > { %1813 = vmatmul.msk.bf16.vlgmr.msra.gmra.mxu0 %vm1235_vm11, %v1180_v17  ;;  %750 = vrot.lane.b32.xlu2 %v2105_v57, %s1958_s7 }
  0xf1   : > { %701 = vrot.lane.b32.xlu1 %v2068_v32, %s1959_s8 }
  0xf2   : > { %695 = vrot.lane.b32.xlu0 %v2037_v1, %s1959_s8  ;;  %v924_v3 = vpop.permute.xlu2 %923 }
  0xf3   : > { %v698_v62 = vpop.permute.xlu1 %697 }
  0xf4   : > { %v692_v63 = vpop.permute.xlu0 %691 }
  0xf5   : > { %v1017_v32 = vsel %vm1013_vm5, %v2351_v14, %v692_v63 }
  0xf6   : > { %v1050_v20 = vsel %vm1046_vm6, %v1017_v32, %v2481_v55 }
  0xf8   : > { %793 = vrot.lane.b32.xlu2 %v2271_v44, %s1957_s6 }
  0xf9   : > { %787 = vrot.lane.b32.xlu1 %v2251_v21, %s1957_s6 }
  0xfa   : > { %756 = vrot.lane.b32.xlu0 %v2143_v34, %s1958_s7  ;;  %v798_v35 = vpop.permute.xlu2 %797  ;;  %v1023_v34 = vsel %vm1013_vm5, %v2362_v27, %v698_v62 }
  0xfb   : > { %v784_v57 = vpop.permute.xlu1 %783 }
  0xfc   : > { %v753_v6 = vpop.permute.xlu0 %752 }
  0xfd   : > { %v1056_v4 = vsel %vm1046_vm6, %v1023_v34, %v753_v6  ;;  %v736_v34 = vshrl.u32 %v2478_v59, 16 }
 0x100   : > { %884 = vrot.lane.b32.xlu2 %v2146_v36, %s1961_s10  ;;  %v1083_v36 = vsel %vm1079_vm7, %v1050_v20, %v784_v57 }
 0x101   : > { %835 = vrot.lane.b32.xlu1 %v2118_v8, %s1962_s11 }
 0x102   : > { %829 = vrot.lane.b32.xlu0 %v2080_v38, %s1962_s11  ;;  %v932_v1 = vpop.permute.xlu2 %931  ;;  %v1089_v38 = vsel %vm1079_vm7, %v1056_v4, %v790_v60 }
 0x103   : > { %v832_v21 = vpop.permute.xlu1 %831 }
 0x104   : > { %v826_v44 = vpop.permute.xlu0 %825  ;;  %v1122_v27 = vsel %vm1112_vm8, %v1089_v38, %v832_v21 }
 0x105   : > { %v1116_v8 = vsel %vm1112_vm8, %v1083_v36, %v826_v44 }
 0x106   : > { %v1149_v55 = vsel %vm1145_vm9, %v1116_v8, %v881_v47 }
 0x108   : > { %927 = vrot.lane.b32.xlu2 %v2265_v26, %s1960_s9 }
 0x109   : > { %921 = vrot.lane.b32.xlu1 %v2245_v19, %s1960_s9 }
 0x10a   : > { %890 = vrot.lane.b32.xlu0 %v2181_v12, %s1961_s10  ;;  %v749_v14 = vpop.permute.xlu2 %748  ;;  %v645_v12 = vrot.slane %v2195_v28, 1 }
 0x10b   : > { %v918_v49 = vpop.permute.xlu1 %917 }
 0x10c   : > { %v887_v18 = vpop.permute.xlu0 %886  ;;  %v1182_v26 = vsel %vm1178_vm10, %v1149_v55, %v918_v49 }
 0x10d   : > { %v1155_v40 = vsel %vm1145_vm9, %v1122_v27, %v887_v18  ;;  %1814 = vmatmul.msk.bf16.gmra.mxu0 %vm1235_vm11, %v1182_v26 }
 0x10e   : > { %v1188_v19 = vsel %vm1178_vm10, %v1155_v40, %v924_v3  ;;  %v3065_v3 = vrot.slane %v2163_v52, 1 }
 0x10f   : > { %1817 = vmatmul.msk.bf16.vlgmr.msra.gmra.mxu1 %vm1235_vm11, %v1188_v19 }
 0x110   : > { %764 = vrot.lane.b32.xlu2 %v2204_v39, %s1958_s7  ;;  %v2589_v62 = vsel %vm606_vm1, %v3065_v3, %v645_v12  ;;  %v722_v39 = vunpack.c.l.b16 %v303_v15 }
 0x111   : > { %715 = vrot.lane.b32.xlu1 %v2163_v52, %s1959_s8 }
 0x112   : > { %709 = vrot.lane.b32.xlu0 %v2158_v48, %s1959_s8  ;;  %v792_v60 = vpop.permute.xlu2 %791  ;;  %v723_v48 = vpack.c.b16 %v722_v39, %v722_v39 }
 0x113   : > { %v761_v47 = vpop.permute.xlu1 %760 }
 0x114   : > { %v706_v58 = vpop.permute.xlu0 %705  ;;  %v740_v20 = vshll.u32 %v723_v48, 16 }
 0x115   : > { %v1031_v17 = vsel %vm1013_vm5, %v2461_v22, %v706_v58 }
 0x116   : > { %v1064_v63 = vsel %vm1046_vm6, %v1031_v17, %v761_v47  ;;  %v742_v36 = vrot.slane %v740_v20, 1  ;;  %v1849_v17 = vld [vmem:[%s2031_s29 + $0xb4] sm:$0xff] }
 0x117   : > { %v1097_v22 = vsel %vm1079_vm7, %v1064_v63, %v798_v35  ;;  %v738_v35 = vor.u32 %v736_v34, %v2505_v24  ;;  %v861_v3 = vshll.u32 %v1849_v17, 16  ;;  %v859_v63 = vshrl.u32 %v1849_v17, 16 }
 0x118   : > { %807 = vrot.lane.b32.xlu2 %v2589_v62, %s1957_s6 }
 0x119   : > { %801 = vrot.lane.b32.xlu1 %v2287_v53, %s1957_s6  ;;  %v779_v53 = vrot.slane %v723_v48, 1  ;;  %v863_v48 = vrot.slane %v861_v3, 1 }
 0x11a   : > { %770 = vrot.lane.b32.xlu0 %v2220_v56, %s1958_s7  ;;  %v883_v28 = vpop.permute.xlu2 %882 }
 0x11b   : > { %v895_v57 = vpop.permute.xlu1 %894  ;;  %v2614_v38 = vsel %vm606_vm1, %v777_v45, %v779_v53 }
 0x11c   : > { %v840_v6 = vpop.permute.xlu0 %839 }
 0x11d   : > { %v1130_v32 = vsel %vm1112_vm8, %v1097_v22, %v840_v6 }
 0x11e   : > { %v1163_v21 = vsel %vm1145_vm9, %v1130_v32, %v895_v57 }
 0x11f   : > { %v1196_v44 = vsel %vm1178_vm10, %v1163_v21, %v932_v1 }
 0x120   : > { %1821 = vmatmul.msk.bf16.vlgmr.msra.gmra.mxu2 %vm1235_vm11, %v1196_v44  ;;  %898 = vrot.lane.b32.xlu2 %v2198_v29, %s1961_s10  ;;  %v2617_v29 = vsel %vm413_vm0, %v738_v35, %v742_v36 }
 0x121   : > { %849 = vrot.lane.b32.xlu1 %v2478_v59, %s1962_s11 }
 0x122   : > { %843 = vrot.lane.b32.xlu0 %v2140_v31, %s1962_s11  ;;  %v926_v4 = vpop.permute.xlu2 %925 }
 0x123   : > { %v700_v1 = vpop.permute.xlu1 %699 }
 0x124   : > { %v694_v8 = vpop.permute.xlu0 %693  ;;  %v1025_v40 = vsel %vm1013_vm5, %v2441_v10, %v700_v1  ;;  %v308_v1 = vld [vmem:[%s2031_s29 + $0xc4] sm:$0x1] }
 0x125   : > { %v1019_v55 = vsel %vm1013_vm5, %v2416_v33, %v694_v8 }
 0x126   : > { %v1052_v26 = vsel %vm1046_vm6, %v1019_v55, %v749_v14 }
 0x128   : > { %941 = vrot.lane.b32.xlu2 %v2614_v38, %s1960_s9 }
 0x129   : > { %935 = vrot.lane.b32.xlu1 %v2466_v23, %s1960_s9 }
 0x12a   : > { %904 = vrot.lane.b32.xlu0 %v2617_v29, %s1961_s10  ;;  %v763_v31 = vpop.permute.xlu2 %762 }
 0x12b   : > { %v786_v24 = vpop.permute.xlu1 %785 }
 0x12c   : > { %v755_v27 = vpop.permute.xlu0 %754  ;;  %v1085_v19 = vsel %vm1079_vm7, %v1052_v26, %v786_v24 }
 0x130   : > { %795 = vrot.lane.b32.xlu2 %v2268_v41, %s1957_s6  ;;  %v1058_v41 = vsel %vm1046_vm6, %v1025_v40, %v755_v27 }
 0x131   : > { %758 = vrot.lane.b32.xlu1 %v2186_v16, %s1958_s7 }
 0x132   : > { %703 = vrot.lane.b32.xlu0 %v2077_v37, %s1959_s8  ;;  %v806_v45 = vpop.permute.xlu2 %805  ;;  %v1091_v37 = vsel %vm1079_vm7, %v1058_v41, %v792_v60 }
 0x133   : > { %v834_v49 = vpop.permute.xlu1 %833 }
 0x134   : > { %v828_v18 = vpop.permute.xlu0 %827  ;;  %v1124_v10 = vsel %vm1112_vm8, %v1091_v37, %v834_v49 }
 0x135   : > { %v1118_v16 = vsel %vm1112_vm8, %v1085_v19, %v828_v18 }
 0x136   : > { %v1151_v14 = vsel %vm1145_vm9, %v1118_v16, %v883_v28 }
 0x138   : > { %929 = vrot.lane.b32.xlu2 %v2290_v54, %s1960_s9 }
 0x139   : > { %892 = vrot.lane.b32.xlu1 %v2176_v7, %s1961_s10 }
 0x13a   : > { %837 = vrot.lane.b32.xlu0 %v2111_v61, %s1962_s11  ;;  %v897_v33 = vpop.permute.xlu2 %896 }
 0x13b   : > { %v920_v12 = vpop.permute.xlu1 %919 }
 0x13c   : > { %v889_v47 = vpop.permute.xlu0 %888  ;;  %v1184_v54 = vsel %vm1178_vm10, %v1151_v14, %v920_v12 }
 0x13d   : > { %v1157_v58 = vsel %vm1145_vm9, %v1124_v10, %v889_v47  ;;  %1815 = vmatmul.msk.bf16.gmra.mxu0 %vm1235_vm11, %v1184_v54 }
 0x13e   : > { %v1190_v7 = vsel %vm1178_vm10, %v1157_v58, %v926_v4 }
 0x13f   : > { %1818 = vmatmul.msk.bf16.gmra.mxu1 %vm1235_vm11, %v1190_v7 }
 0x140   : > { %717 = vrot.lane.b32.xlu2 %v2469_v2, %s1959_s8  ;;  %v2667_v2 = vld [vmem:[%s2031_s29 + $0xbc] sm:$0xff] }
 0x141   : > { %711 = vrot.lane.b32.xlu1 %v2150_v42, %s1959_s8  ;;  %v866_v28 = vshll.u32 %v2667_v2, 16  ;;  %v911_v20 = vrot.slane %v2667_v2, 1  ;;  %v870_v40 = vshrl.u32 %v2667_v2, 16 }
 0x142   : > { %675 = vrot.lane.b32.xlu0 %v2466_v23, %s1956_s5  ;;  %v940_v61 = vpop.permute.xlu2 %939 }
 0x143   : > { %v714_v60 = vpop.permute.xlu1 %713 }
 0x144   : > { %v708_v15 = vpop.permute.xlu0 %707  ;;  %v1039_v32 = vsel %vm1013_vm5, %v2490_v51, %v714_v60  ;;  %v910_v51 = vrot.slane %v1849_v17, 1 }
 0x145   : > { %v1033_v22 = vsel %vm1013_vm5, %v2458_v5, %v708_v15 }
 0x146   : > { %v1066_v21 = vsel %vm1046_vm6, %v1033_v22, %v763_v31  ;;  %v912_v27 = vsel %vm606_vm1, %v910_v51, %v911_v20 }
 0x148   : > { %803 = vrot.lane.b32.xlu2 %v2284_v50, %s1957_s6  ;;  %v868_v50 = vrot.slane %v866_v28, 1 }
 0x149   : > { %772 = vrot.lane.b32.xlu1 %v2520_v13, %s1958_s7 }
 0x14a   : > { %766 = vrot.lane.b32.xlu0 %v2201_v30, %s1958_s7  ;;  %v2669_v42 = vpop.permute.xlu2 %750  ;;  %v864_v30 = vor.u32 %v863_v48, %v859_v63 }
 0x14b   : > { %v800_v39 = vpop.permute.xlu1 %799 }
 0x14c   : > { %v769_v23 = vpop.permute.xlu0 %768  ;;  %v869_v44 = vsel %vm413_vm0, %v864_v30, %v868_v50 }
 0x150   : > { %851 = vrot.lane.b32.xlu2 %v1849_v17, %s1962_s11 }
 0x151   : > { %845 = vrot.lane.b32.xlu1 %v2163_v52, %s1962_s11  ;;  %v1099_v52 = vsel %vm1079_vm7, %v1066_v21, %v800_v39 }
 0x152   : > { %809 = vrot.lane.b32.xlu0 %v2516_v11, %s1957_s6  ;;  %v2677_v13 = vpop.permute.xlu2 %793  ;;  %v1072_v11 = vsel %vm1046_vm6, %v1039_v32, %v769_v23 }
 0x153   : > { %v848_v57 = vpop.permute.xlu1 %847  ;;  %v1105_v5 = vsel %vm1079_vm7, %v1072_v11, %v806_v45  ;;  %v856_v45 = vunpack.c.l.b16 %v308_v1 }
 0x154   : > { %v842_v6 = vpop.permute.xlu0 %841  ;;  %v1138_v53 = vsel %vm1112_vm8, %v1105_v5, %v848_v57 }
 0x155   : > { %v1132_v34 = vsel %vm1112_vm8, %v1099_v52, %v842_v6  ;;  %v857_v55 = vpack.c.b16 %v856_v45, %v856_v45 }
 0x156   : > { %v1165_v35 = vsel %vm1145_vm9, %v1132_v34, %v897_v33 }
 0x157   : > { %v874_v26 = vshll.u32 %v857_v55, 16  ;;  %v913_v16 = vrot.slane %v857_v55, 1 }
 0x158   : > { %937 = vrot.lane.b32.xlu2 %v2589_v62, %s1960_s9 }
 0x159   : > { %906 = vrot.lane.b32.xlu1 %v869_v44, %s1961_s10  ;;  %v876_v41 = vrot.slane %v874_v26, 1  ;;  %v914_v14 = vsel %vm606_vm1, %v911_v20, %v913_v16 }
 0x15a   : > { %900 = vrot.lane.b32.xlu0 %v2220_v56, %s1961_s10  ;;  %v885_v24 = vpop.permute.xlu2 %884 }
 0x15b   : > { %v934_v36 = vpop.permute.xlu1 %933 }
 0x15c   : > { %v903_v4 = vpop.permute.xlu0 %902  ;;  %v1198_v31 = vsel %vm1178_vm10, %v1165_v35, %v934_v36 }
 0x15d   : > { %v1171_v8 = vsel %vm1145_vm9, %v1138_v53, %v903_v4  ;;  %1822 = vmatmul.msk.bf16.gmra.mxu2 %vm1235_vm11, %v1198_v31 }
 0x15e   : > { %v1204_v56 = vsel %vm1178_vm10, %v1171_v8, %v940_v61 }
 0x15f   : > { %1825 = vmatmul.msk.bf16.vlgmr.msra.gmra.mxu3 %vm1235_vm11, %v1204_v56 }
 0x160   : > { %719 = vrot.lane.b32.xlu2 %v2478_v59, %s1959_s8  ;;  %v2721_v59 = vld [vmem:[%s3058_s2] ss:$0 sm:$0xff] }
 0x161   : > { %677 = vrot.lane.b32.xlu1 %v2589_v62, %s1956_s5  ;;  %v872_v62 = vor.u32 %v870_v40, %v868_v50 }
 0x162   : > { %943 = vrot.lane.b32.xlu0 %v912_v27, %s1960_s9  ;;  %v928_v19 = vpop.permute.xlu2 %927 }
 0x163   : > { %v702_v49 = vpop.permute.xlu1 %701  ;;  %v877_v10 = vsel %vm413_vm0, %v872_v62, %v876_v41 }
 0x164   : > { %v696_v18 = vpop.permute.xlu0 %695  ;;  %v1027_v17 = vsel %vm1013_vm5, %v2438_v9, %v702_v49 }
 0x165   : > { %v1021_v47 = vsel %vm1013_vm5, %v2413_v0, %v696_v18 }
 0x166   : > { %v1054_v61 = vsel %vm1046_vm6, %v1021_v47, %v2669_v42 }
 0x168   : > { %853 = vrot.lane.b32.xlu2 %v2667_v2, %s1962_s11  ;;  %s2726_s11 = scalar_lea.vmem %s3059_s3, %s1722_s30 }
 0x169   : > { %811 = vrot.lane.b32.xlu1 %v2614_v38, %s1957_s6 }
 0x16a   : > { %774 = vrot.lane.b32.xlu0 %v2617_v29, %s1958_s7  ;;  %v765_v12 = vpop.permute.xlu2 %764 }
 0x16b   : > { %v788_v37 = vpop.permute.xlu1 %787 }
 0x16c   : > { %v757_v33 = vpop.permute.xlu0 %756  ;;  %v1087_v2 = vsel %vm1079_vm7, %v1054_v61, %v788_v37 }
 0x16d   : > { %v1281_v29 = vpop.f32.mrf.mxu0  ;;  %v1060_v3 = vsel %vm1046_vm6, %v1027_v17, %v757_v33 }
 0x16e   : > { %v1282_v38 = vadd.f32 %v2721_v59, %v1281_v29  ;;  %v1093_v9 = vsel %vm1079_vm7, %v1060_v3, %v2677_v13 }
 0x170   : > { %1535 = vst.msk [vmem:[%s2726_s11] sm:$0xff] %vm947_vm3, %v1282_v38  ;;  %v1430_v60 = vmul.f32 %v1282_v38, %v1282_v38  ;;  %v1361_v39 = vsel %vm947_vm3, %v1282_v38, 0.0 }
 0x171   : > { %945 = vrot.lane.b32.xlu1 %v914_v14, %s1960_s9 }
 0x172   : > { %908 = vrot.lane.b32.xlu0 %v877_v10, %s1961_s10  ;;  %v1462_v48 = vsel %vm947_vm3, %v1430_v60, 0.0  ;;  %v808_v50 = vpop.permute.xlu2 %807 }
 0x173   : > { %v836_v58 = vpop.permute.xlu1 %835 }
 0x174   : > { %v830_v54 = vpop.permute.xlu0 %829  ;;  %v1126_v22 = vsel %vm1112_vm8, %v1093_v9, %v836_v58 }
 0x175   : > { %v1283_v7 = vpop.f32.mrf.mxu0  ;;  %v1120_v63 = vsel %vm1112_vm8, %v1087_v2, %v830_v54 }
 0x176   : > { %v1284_v15 = vadd.f32 %v2721_v59, %v1283_v7  ;;  %v1153_v57 = vsel %vm1145_vm9, %v1120_v63, %v885_v24 }
 0x178   : > { %v1362_v0 = vsel %vm947_vm3, %v1284_v15, 0.0  ;;  %v1431_v23 = vmul.f32 %v1284_v15, %v1284_v15  ;;  %1536 = vst.msk [vmem:[%s2726_s11 + $0x8] sm:$0xff] %vm947_vm3, %v1284_v15 }
 0x179   : > { %v1363_v42 = vadd.f32 %v1362_v0, %v1361_v39 }
 0x17a   : > { %v1463_v28 = vsel %vm947_vm3, %v1431_v23, 0.0  ;;  %v899_v34 = vpop.permute.xlu2 %898 }
 0x17b   : > { %v1464_v30 = vadd.f32 %v1463_v28, %v1462_v48  ;;  %v922_v6 = vpop.permute.xlu1 %921 }
 0x17c   : > { %v891_v32 = vpop.permute.xlu0 %890  ;;  %v1186_v44 = vsel %vm1178_vm10, %v1153_v57, %v922_v6 }
 0x17d   : > { %v1159_v21 = vsel %vm1145_vm9, %v1126_v22, %v891_v32  ;;  %1816 = vmatmul.msk.bf16.gmra.mxu0 %vm1235_vm11, %v1186_v44 }
 0x17e   : > { %v1192_v52 = vsel %vm1178_vm10, %v1159_v21, %v928_v19 }
 0x17f   : > { %1819 = vmatmul.msk.bf16.gmra.mxu1 %vm1235_vm11, %v1192_v52 }
 0x182   : > { %v942_v24 = vpop.permute.xlu2 %941 }
 0x183   : > { %v716_v13 = vpop.permute.xlu1 %715 }
 0x184   : > { %v710_v11 = vpop.permute.xlu0 %709 }
 0x185   : > { %v1035_v45 = vsel %vm1013_vm5, %v2388_v46, %v710_v11  ;;  %v1041_v46 = vsel %vm1013_vm5, %v2410_v43, %v716_v13 }
 0x186   : > { %v1068_v41 = vsel %vm1046_vm6, %v1035_v45, %v765_v12 }
 0x18a   : > { %v1286_v5 = vpop.f32.mrf.mxu0  ;;  %v796_v14 = vpop.permute.xlu2 %795 }
 0x18b   : > { %v1287_v51 = vadd.f32 %v2721_v59, %v1286_v5  ;;  %v802_v20 = vpop.permute.xlu1 %801 }
 0x18c   : > { %v1301_v53 = vpop.f32.mrf.mxu1  ;;  %v771_v36 = vpop.permute.xlu0 %770  ;;  %v1101_v37 = vsel %vm1079_vm7, %v1068_v41, %v802_v20 }
 0x18d   : > { %v2762_v35 = vadd.f32 %v2721_v59, %v1301_v53  ;;  %v1364_v4 = vsel %vm947_vm3, %v1287_v51, 0.0  ;;  %v1432_v1 = vmul.f32 %v1287_v51, %v1287_v51  ;;  %1537 = vst.msk [vmem:[%s2726_s11 + $0x10] sm:$0xff] %vm947_vm3, %v1287_v51  ;;  %v1074_v29 = vsel %vm1046_vm6, %v1041_v46, %v771_v36  ;;  %v3067_v46 = vld [vmem:[#allocation2_spill] sm:$0xff] }
 0x18e   : > { %v1365_v8 = vadd.f32 %v1364_v4, %v1363_v42  ;;  %v1107_v12 = vsel %vm1079_vm7, %v1074_v29, %v808_v50 }
 0x18f   : > { %1543 = vst.msk [vmem:[%s2726_s11 + $0x40] sm:$0xff] %vm947_vm3, %v2762_v35  ;;  %v1465_v31 = vsel %vm947_vm3, %v1432_v1, 0.0 }
 0x190   : > { %v1466_v56 = vadd.f32 %v1465_v31, %v1464_v30 }
 0x192   : > { %v1288_v27 = vpop.f32.mrf.mxu0  ;;  %v930_v3 = vpop.permute.xlu2 %929 }
 0x193   : > { %v1289_v55 = vadd.f32 %v2721_v59, %v1288_v27  ;;  %v850_v49 = vpop.permute.xlu1 %849 }
 0x194   : > { %v1303_v18 = vpop.f32.mrf.mxu1  ;;  %v844_v26 = vpop.permute.xlu0 %843  ;;  %v1140_v54 = vsel %vm1112_vm8, %v1107_v12, %v850_v49 }
 0x195   : > { %v2775_v40 = vadd.f32 %v2721_v59, %v1303_v18  ;;  %v1366_v19 = vsel %vm947_vm3, %v1289_v55, 0.0  ;;  %v1433_v62 = vmul.f32 %v1289_v55, %v1289_v55  ;;  %1538 = vst.msk [vmem:[%s2726_s11 + $0x18] sm:$0xff] %vm947_vm3, %v1289_v55  ;;  %v1134_v10 = vsel %vm1112_vm8, %v1101_v37, %v844_v26  ;;  %v3066_v18 = vld [vmem:[#allocation4_spill] sm:$0xff] }
 0x196   : > { %v1367_v16 = vadd.f32 %v1366_v19, %v1365_v8  ;;  %v1167_v47 = vsel %vm1145_vm9, %v1134_v10, %v899_v34 }
 0x197   : > { %1544 = vst.msk [vmem:[%s2726_s11 + $0x48] sm:$0xff] %vm947_vm3, %v2775_v40  ;;  %v1467_v33 = vsel %vm947_vm3, %v1433_v62, 0.0 }
 0x198   : > { %v1468_v38 = vadd.f32 %v1467_v33, %v1466_v56 }
 0x19a   : > { %v718_v50 = vpop.permute.xlu2 %717 }
 0x19b   : > { %v936_v58 = vpop.permute.xlu1 %935 }
 0x19c   : > { %v905_v7 = vpop.permute.xlu0 %904  ;;  %v1200_v43 = vsel %vm1178_vm10, %v1167_v47, %v936_v58 }
 0x19d   : > { %v1173_v61 = vsel %vm1145_vm9, %v1140_v54, %v905_v7  ;;  %1823 = vmatmul.msk.bf16.gmra.mxu2 %vm1235_vm11, %v1200_v43 }
 0x19e   : > { %v1206_v60 = vsel %vm1178_vm10, %v1173_v61, %v942_v24 }
 0x19f   : > { %1826 = vmatmul.msk.bf16.gmra.mxu3 %vm1235_vm11, %v1206_v60 }
 0x1a2   : > { %v804_v32 = vpop.permute.xlu2 %803 }
 0x1a3   : > { %v1321_v15 = vpop.f32.mrf.mxu2  ;;  %v759_v2 = vpop.permute.xlu1 %758 }
 0x1a4   : > { %v2799_v17 = vadd.f32 %v2721_v59, %v1321_v15  ;;  %v704_v39 = vpop.permute.xlu0 %703 }
 0x1a5   : > { %v1029_v0 = vsel %vm1013_vm5, %v2375_v25, %v704_v39 }
 0x1a6   : > { %1551 = vst.msk [vmem:[%s2726_s11 + $0x80] sm:$0xff] %vm947_vm3, %v2799_v17  ;;  %v1062_v23 = vsel %vm1046_vm6, %v1029_v0, %v759_v2  ;;  %v1914_v0 = vld [vmem:[%s2031_s29 + $0x94] sm:$0xff] }
 0x1a7   : > { %v1095_v28 = vsel %vm1079_vm7, %v1062_v23, %v796_v14  ;;  %v3068_v23 = vld [vmem:[#allocation3_spill] sm:$0xff] }
 0x1aa   : > { %v852_v4 = vpop.permute.xlu2 %851 }
 0x1ab   : > { %v1323_v63 = vpop.f32.mrf.mxu2  ;;  %v893_v48 = vpop.permute.xlu1 %892 }
 0x1ac   : > { %v2808_v42 = vadd.f32 %v2721_v59, %v1323_v63  ;;  %v838_v9 = vpop.permute.xlu0 %837  ;;  %v979_v63 = vsel %vm947_vm3, %v1914_v0, %v3068_v23 }
 0x1ad   : > { %v1128_v30 = vsel %vm1112_vm8, %v1095_v28, %v838_v9 }
 0x1ae   : > { %1552 = vst.msk [vmem:[%s2726_s11 + $0x88] sm:$0xff] %vm947_vm3, %v2808_v42  ;;  %v1161_v22 = vsel %vm1145_vm9, %v1128_v30, %v893_v48 }
 0x1af   : > { %v1194_v25 = vsel %vm1178_vm10, %v1161_v22, %v930_v3 }
 0x1b0   : > { %1820 = vmatmul.msk.bf16.gmra.mxu1 %vm1235_vm11, %v1194_v25 }
 0x1b2   : > { %v938_v10 = vpop.permute.xlu2 %937 }
 0x1b3   : > { %v712_v57 = vpop.permute.xlu1 %711 }
 0x1b4   : > { %v676_v6 = vpop.permute.xlu0 %675  ;;  %v1037_v26 = vsel %vm1013_vm5, %v3066_v18, %v712_v57 }
 0x1ba   : > { %v1291_v21 = vpop.f32.mrf.mxu0  ;;  %v720_v39 = vpop.permute.xlu2 %719 }
 0x1bb   : > { %v1292_v44 = vadd.f32 %v2721_v59, %v1291_v21  ;;  %v773_v52 = vpop.permute.xlu1 %772 }
 0x1bc   : > { %v1306_v13 = vpop.f32.mrf.mxu1  ;;  %v767_v34 = vpop.permute.xlu0 %766 }
 0x1bd   : > { %v2820_v11 = vadd.f32 %v2721_v59, %v1306_v13  ;;  %v1368_v5 = vsel %vm947_vm3, %v1292_v44, 0.0  ;;  %v1434_v51 = vmul.f32 %v1292_v44, %v1292_v44  ;;  %1539 = vst.msk [vmem:[%s2726_s11 + $0x20] sm:$0xff] %vm947_vm3, %v1292_v44  ;;  %v1070_v62 = vsel %vm1046_vm6, %v1037_v26, %v767_v34 }
 0x1be   : > { %v1369_v20 = vadd.f32 %v1368_v5, %v1367_v16  ;;  %v1913_v16 = vld [vmem:[%s2031_s29 + $0x8c] sm:$0xff]  ;;  %v1103_v29 = vsel %vm1079_vm7, %v1070_v62, %v804_v32  ;;  %s1723_s29 = sshll.u32 %s3080_s16, 2 }
 0x1bf   : > { %1545 = vst.msk [vmem:[%s2726_s11 + $0x50] sm:$0xff] %vm947_vm3, %v2820_v11  ;;  %v1469_v53 = vsel %vm947_vm3, %v1434_v51, 0.0  ;;  %v977_v37 = vsel %vm947_vm3, %v1913_v16, %v3067_v46  ;;  %v1438_v46 = vmul.f32 %v2762_v35, %v2762_v35  ;;  %s255_s6 = sadd.s32 %s1723_s29, %s2024_s22 }
 0x1c0   : > { %v1470_v36 = vadd.f32 %v1469_v53, %v1468_v38  ;;  %v1010_v33 = vsel %vm980_vm2, %v977_v37, %v676_v6  ;;  %s1724_s7 = sshll.u32 %s255_s6, 1 }
 0x1c1   : > { %v1043_v58 = vsel %vm1013_vm5, %v1010_v33, %v718_v50  ;;  %s257_s14 = scalar_lea.vmem %s3060_s4, %s1724_s7 }
 0x1c2   : > { %v1293_v1 = vpop.f32.mrf.mxu0  ;;  %v1076_v7 = vsel %vm1046_vm6, %v1043_v58, %v773_v52  ;;  %v854_v57 = vpop.permute.xlu2 %853  ;;  %v1440_v58 = vmul.f32 %v2820_v11, %v2820_v11 }
 0x1c3   : > { %v1294_v8 = vadd.f32 %v2721_v59, %v1293_v1  ;;  %v846_v31 = vpop.permute.xlu1 %845 }
 0x1c4   : > { %v1308_v24 = vpop.f32.mrf.mxu1  ;;  %v810_v27 = vpop.permute.xlu0 %809  ;;  %v1136_v14 = vsel %vm1112_vm8, %v1103_v29, %v846_v31  ;;  %v1439_v29 = vmul.f32 %v2775_v40, %v2775_v40 }
 0x1c5   : > { %v2831_v56 = vadd.f32 %v2721_v59, %v1308_v24  ;;  %v1370_v45 = vsel %vm947_vm3, %v1294_v8, 0.0  ;;  %v1435_v55 = vmul.f32 %v1294_v8, %v1294_v8  ;;  %1540 = vst.msk [vmem:[%s2726_s11 + $0x28] sm:$0xff] %vm947_vm3, %v1294_v8  ;;  %v1109_v43 = vsel %vm1079_vm7, %v1076_v7, %v810_v27 }
 0x1c6   : > { %v1371_v49 = vadd.f32 %v1370_v45, %v1369_v20  ;;  %v1142_v61 = vsel %vm1112_vm8, %v1109_v43, %v852_v4  ;;  %v1479_v43 = vsel %vm947_vm3, %v1439_v29, 0.0  ;;  %v1394_v29 = vsel %vm947_vm3, %v2808_v42, 0.0 }
 0x1c7   : > { %1546 = vst.msk [vmem:[%s2726_s11 + $0x58] sm:$0xff] %vm947_vm3, %v2831_v56  ;;  %v1471_v19 = vsel %vm947_vm3, %v1435_v55, 0.0 }
 0x1c8   : > { %v1472_v41 = vadd.f32 %v1471_v19, %v1470_v36 }
 0x1cb   : > { %v907_v38 = vpop.permute.xlu1 %906 }
 0x1cc   : > { %v901_v12 = vpop.permute.xlu0 %900  ;;  %v1175_v15 = vsel %vm1145_vm9, %v1142_v61, %v907_v38  ;;  %v1441_v61 = vmul.f32 %v2831_v56, %v2831_v56 }
 0x1cd   : > { %v1169_v47 = vsel %vm1145_vm9, %v1136_v14, %v901_v12  ;;  %v1477_v12 = vsel %vm947_vm3, %v1438_v46, 0.0  ;;  %v1447_v46 = vmul.f32 %v2808_v42, %v2808_v42 }
 0x1ce   : > { %v1202_v54 = vsel %vm1178_vm10, %v1169_v47, %v938_v10  ;;  %v1378_v47 = vsel %vm947_vm3, %v2775_v40, 0.0  ;;  %v1382_v40 = vsel %vm947_vm3, %v2831_v56, 0.0  ;;  %v1483_v23 = vsel %vm947_vm3, %v1441_v61, 0.0 }
 0x1cf   : > { %1824 = vmatmul.msk.bf16.gmra.mxu2 %vm1235_vm11, %v1202_v54 }
 0x1d3   : > { %v678_v60 = vpop.permute.xlu1 %677 }
 0x1d4   : > { %v944_v2 = vpop.permute.xlu0 %943  ;;  %v1012_v48 = vsel %vm980_vm2, %v979_v63, %v678_v60 }
 0x1d5   : > { %v1208_v3 = vsel %vm1178_vm10, %v1175_v15, %v944_v2  ;;  %v1045_v30 = vsel %vm1013_vm5, %v1012_v48, %v720_v39  ;;  %v1481_v2 = vsel %vm947_vm3, %v1440_v58, 0.0 }
 0x1d6   : > { %1827 = vmatmul.msk.bf16.gmra.mxu3 %vm1235_vm11, %v1208_v3 }
 0x1db   : > { %v812_v28 = vpop.permute.xlu1 %811 }
 0x1dc   : > { %v775_v9 = vpop.permute.xlu0 %774 }
 0x1dd   : > { %v1078_v50 = vsel %vm1046_vm6, %v1045_v30, %v775_v9 }
 0x1de   : > { %v1111_v25 = vsel %vm1079_vm7, %v1078_v50, %v812_v28 }
 0x1df   : > { %v1144_v52 = vsel %vm1112_vm8, %v1111_v25, %v854_v57 }
 0x1e0   : > { %v1326_v22 = vpop.f32.mrf.mxu2 }
 0x1e1   : > { %v2867_v6 = vadd.f32 %v2721_v59, %v1326_v22 }
 0x1e2   : > { %v1341_v32 = vpop.f32.mrf.mxu3 }
 0x1e3   : > { %v2870_v21 = vadd.f32 %v2721_v59, %v1341_v32  ;;  %1553 = vst.msk [vmem:[%s2726_s11 + $0x90] sm:$0xff] %vm947_vm3, %v2867_v6  ;;  %v946_v44 = vpop.permute.xlu1 %945 }
 0x1e4   : > { %v909_v13 = vpop.permute.xlu0 %908 }
 0x1e5   : > { %1559 = vst.msk [vmem:[%s2726_s11 + $0xc0] sm:$0xff] %vm947_vm3, %v2870_v21  ;;  %v1177_v34 = vsel %vm1145_vm9, %v1144_v52, %v909_v13 }
 0x1e6   : > { %v1210_v5 = vsel %vm1178_vm10, %v1177_v34, %v946_v44 }
 0x1e7   : > { %1828 = vmatmul.msk.bf16.gmra.mxu3 %vm1235_vm11, %v1210_v5 }
 0x1e8   : > { %v1328_v51 = vpop.f32.mrf.mxu2 }
 0x1e9   : > { %v2883_v20 = vadd.f32 %v2721_v59, %v1328_v51 }
 0x1ea   : > { %v1343_v53 = vpop.f32.mrf.mxu3 }
 0x1eb   : > { %v2886_v36 = vadd.f32 %v2721_v59, %v1343_v53  ;;  %1554 = vst.msk [vmem:[%s2726_s11 + $0x98] sm:$0xff] %vm947_vm3, %v2883_v20  ;;  %v1398_v42 = vsel %vm947_vm3, %v2883_v20, 0.0 }
 0x1ed   : > { %1560 = vst.msk [vmem:[%s2726_s11 + $0xc8] sm:$0xff] %vm947_vm3, %v2886_v36 }
 0x1fa   : > { %v1296_v4 = vpop.f32.mrf.mxu0 }
 0x1fb   : > { %v1297_v1 = vadd.f32 %v2721_v59, %v1296_v4 }
 0x1fc   : > { %v1311_v8 = vpop.f32.mrf.mxu1 }
 0x1fd   : > { %v1312_v31 = vadd.f32 %v2721_v59, %v1311_v8  ;;  %v1372_v24 = vsel %vm947_vm3, %v1297_v1, 0.0  ;;  %v1436_v27 = vmul.f32 %v1297_v1, %v1297_v1  ;;  %1541 = vst.msk [vmem:[%s2726_s11 + $0x30] sm:$0xff] %vm947_vm3, %v1297_v1 }
 0x1fe   : > { %v1373_v45 = vadd.f32 %v1372_v24, %v1371_v49 }
 0x1ff   : > { %1547 = vst.msk [vmem:[%s2726_s11 + $0x60] sm:$0xff] %vm947_vm3, %v1312_v31  ;;  %v1473_v55 = vsel %vm947_vm3, %v1436_v27, 0.0  ;;  %v1442_v3 = vmul.f32 %v1312_v31, %v1312_v31  ;;  %v1384_v63 = vsel %vm947_vm3, %v1312_v31, 0.0 }
 0x200   : > { %v1474_v18 = vadd.f32 %v1473_v55, %v1472_v41  ;;  %v1376_v41 = vsel %vm947_vm3, %v2762_v35, 0.0  ;;  %v1380_v35 = vsel %vm947_vm3, %v2820_v11, 0.0  ;;  %v1446_v55 = vmul.f32 %v2799_v17, %v2799_v17 }
 0x201   : > { %v1485_v9 = vsel %vm947_vm3, %v1442_v3, 0.0 }
 0x202   : > { %v1298_v26 = vpop.f32.mrf.mxu0 }
 0x203   : > { %v1299_v19 = vadd.f32 %v2721_v59, %v1298_v26 }
 0x204   : > { %v1313_v62 = vpop.f32.mrf.mxu1 }
 0x205   : > { %v1314_v16 = vadd.f32 %v2721_v59, %v1313_v62  ;;  %v1374_v37 = vsel %vm947_vm3, %v1299_v19, 0.0  ;;  %v1437_v33 = vmul.f32 %v1299_v19, %v1299_v19  ;;  %1542 = vst.msk [vmem:[%s2726_s11 + $0x38] sm:$0xff] %vm947_vm3, %v1299_v19 }
 0x206   : > { %v1375_v49 = vadd.f32 %v1374_v37, %v1373_v45 }
 0x207   : > { %1548 = vst.msk [vmem:[%s2726_s11 + $0x68] sm:$0xff] %vm947_vm3, %v1314_v16  ;;  %v1475_v38 = vsel %vm947_vm3, %v1437_v33, 0.0  ;;  %v1443_v11 = vmul.f32 %v1314_v16, %v1314_v16  ;;  %v1386_v30 = vsel %vm947_vm3, %v1314_v16, 0.0  ;;  %v1392_v16 = vsel %vm947_vm3, %v2799_v17, 0.0 }
 0x208   : > { %v1377_v10 = vadd.f32 %v1376_v41, %v1375_v49  ;;  %v1476_v14 = vadd.f32 %v1475_v38, %v1474_v18  ;;  %v1493_v41 = vsel %vm947_vm3, %v1446_v55, 0.0  ;;  %v1448_v38 = vmul.f32 %v2867_v6, %v2867_v6 }
 0x209   : > { %v1487_v22 = vsel %vm947_vm3, %v1443_v11, 0.0  ;;  %v1495_v17 = vsel %vm947_vm3, %v1447_v46, 0.0 }
 0x20a   : > { %v1379_v54 = vadd.f32 %v1378_v47, %v1377_v10  ;;  %v1478_v7 = vadd.f32 %v1477_v12, %v1476_v14  ;;  %v1396_v12 = vsel %vm947_vm3, %v2867_v6, 0.0  ;;  %v1449_v47 = vmul.f32 %v2883_v20, %v2883_v20 }
 0x20c   : > { %v1480_v60 = vadd.f32 %v1479_v43, %v1478_v7  ;;  %v1381_v15 = vadd.f32 %v1380_v35, %v1379_v54  ;;  %v1497_v7 = vsel %vm947_vm3, %v1448_v38, 0.0  ;;  %v1499_v61 = vsel %vm947_vm3, %v1449_v47, 0.0 }
 0x20e   : > { %v1383_v39 = vadd.f32 %v1382_v40, %v1381_v15  ;;  %v1482_v0 = vadd.f32 %v1481_v2, %v1480_v60 }
 0x210   : > { %v1385_v48 = vadd.f32 %v1384_v63, %v1383_v39  ;;  %v1484_v28 = vadd.f32 %v1483_v23, %v1482_v0 }
 0x212   : > { %v1387_v50 = vadd.f32 %v1386_v30, %v1385_v48  ;;  %v1486_v56 = vadd.f32 %v1485_v9, %v1484_v28 }
 0x214   : > { %v1488_v25 = vadd.f32 %v1487_v22, %v1486_v56 }
 0x220   : > { %v1331_v57 = vpop.f32.mrf.mxu2 }
 0x221   : > { %v1332_v32 = vadd.f32 %v2721_v59, %v1331_v57 }
 0x222   : > { %v1346_v44 = vpop.f32.mrf.mxu3 }
 0x223   : > { %1555 = vst.msk [vmem:[%s2726_s11 + $0xa0] sm:$0xff] %vm947_vm3, %v1332_v32  ;;  %v2938_v52 = vadd.f32 %v2721_v59, %v1346_v44  ;;  %v1450_v2 = vmul.f32 %v1332_v32, %v1332_v32  ;;  %v1400_v6 = vsel %vm947_vm3, %v1332_v32, 0.0  ;;  %v1454_v32 = vmul.f32 %v2870_v21, %v2870_v21 }
 0x225   : > { %1561 = vst.msk [vmem:[%s2726_s11 + $0xd0] sm:$0xff] %vm947_vm3, %v2938_v52  ;;  %v1501_v39 = vsel %vm947_vm3, %v1450_v2, 0.0 }
 0x228   : > { %v1333_v13 = vpop.f32.mrf.mxu2 }
 0x229   : > { %v1334_v34 = vadd.f32 %v2721_v59, %v1333_v13 }
 0x22a   : > { %v1348_v5 = vpop.f32.mrf.mxu3 }
 0x22b   : > { %1556 = vst.msk [vmem:[%s2726_s11 + $0xa8] sm:$0xff] %vm947_vm3, %v1334_v34  ;;  %v2947_v51 = vadd.f32 %v2721_v59, %v1348_v5  ;;  %v1451_v0 = vmul.f32 %v1334_v34, %v1334_v34  ;;  %v1402_v63 = vsel %vm947_vm3, %v1334_v34, 0.0 }
 0x22d   : > { %1562 = vst.msk [vmem:[%s2726_s11 + $0xd8] sm:$0xff] %vm947_vm3, %v2947_v51  ;;  %v1316_v53 = vpop.f32.mrf.mxu1 }
 0x22e   : > { %v1317_v4 = vadd.f32 %v2721_v59, %v1316_v53  ;;  %v1408_v53 = vsel %vm947_vm3, %v2870_v21, 0.0 }
 0x230   : > { %1549 = vst.msk [vmem:[%s2726_s11 + $0x70] sm:$0xff] %vm947_vm3, %v1317_v4  ;;  %v1444_v1 = vmul.f32 %v1317_v4, %v1317_v4  ;;  %v1388_v8 = vsel %vm947_vm3, %v1317_v4, 0.0  ;;  %v1455_v4 = vmul.f32 %v2886_v36, %v2886_v36 }
 0x231   : > { %v1389_v45 = vadd.f32 %v1388_v8, %v1387_v50  ;;  %v1503_v50 = vsel %vm947_vm3, %v1451_v0, 0.0 }
 0x232   : > { %v1489_v24 = vsel %vm947_vm3, %v1444_v1, 0.0 }
 0x233   : > { %v1490_v19 = vadd.f32 %v1489_v24, %v1488_v25  ;;  %v1509_v24 = vsel %vm947_vm3, %v1454_v32, 0.0 }
 0x235   : > { %v1318_v31 = vpop.f32.mrf.mxu1 }
 0x236   : > { %v1319_v27 = vadd.f32 %v2721_v59, %v1318_v31 }
 0x238   : > { %v1390_v18 = vsel %vm947_vm3, %v1319_v27, 0.0  ;;  %v1445_v26 = vmul.f32 %v1319_v27, %v1319_v27  ;;  %1550 = vst.msk [vmem:[%s2726_s11 + $0x78] sm:$0xff] %vm947_vm3, %v1319_v27  ;;  %v1410_v27 = vsel %vm947_vm3, %v2886_v36, 0.0 }
 0x239   : > { %v1391_v62 = vadd.f32 %v1390_v18, %v1389_v45  ;;  %v1456_v45 = vmul.f32 %v2938_v52, %v2938_v52 }
 0x23a   : > { %v1491_v37 = vsel %vm947_vm3, %v1445_v26, 0.0 }
 0x23b   : > { %v1393_v33 = vadd.f32 %v1392_v16, %v1391_v62  ;;  %v1492_v49 = vadd.f32 %v1491_v37, %v1490_v19  ;;  %v1511_v19 = vsel %vm947_vm3, %v1455_v4, 0.0  ;;  %v1412_v62 = vsel %vm947_vm3, %v2938_v52, 0.0 }
 0x23c   : > { %v1457_v16 = vmul.f32 %v2947_v51, %v2947_v51  ;;  %v1513_v36 = vsel %vm947_vm3, %v1456_v45, 0.0 }
 0x23d   : > { %v1395_v10 = vadd.f32 %v1394_v29, %v1393_v33  ;;  %v1494_v14 = vadd.f32 %v1493_v41, %v1492_v49  ;;  %v1414_v33 = vsel %vm947_vm3, %v2947_v51, 0.0 }
 0x23e   : > { %v1515_v29 = vsel %vm947_vm3, %v1457_v16, 0.0 }
 0x23f   : > { %v1397_v58 = vadd.f32 %v1396_v12, %v1395_v10  ;;  %v1496_v54 = vadd.f32 %v1495_v17, %v1494_v14 }
 0x241   : > { %v1498_v43 = vadd.f32 %v1497_v7, %v1496_v54  ;;  %v1399_v35 = vadd.f32 %v1398_v42, %v1397_v58 }
 0x243   : > { %v1500_v60 = vadd.f32 %v1499_v61, %v1498_v43  ;;  %v1401_v3 = vadd.f32 %v1400_v6, %v1399_v35 }
 0x245   : > { %v1502_v20 = vadd.f32 %v1501_v39, %v1500_v60  ;;  %v1403_v28 = vadd.f32 %v1402_v63, %v1401_v3 }
 0x247   : > { %v1504_v57 = vadd.f32 %v1503_v50, %v1502_v20 }
 0x252   : > { %v1336_v15 = vpop.f32.mrf.mxu2 }
 0x253   : > { %v1337_v40 = vadd.f32 %v2721_v59, %v1336_v15 }
 0x255   : > { %1557 = vst.msk [vmem:[%s2726_s11 + $0xb0] sm:$0xff] %vm947_vm3, %v1337_v40  ;;  %v1452_v23 = vmul.f32 %v1337_v40, %v1337_v40  ;;  %v1404_v11 = vsel %vm947_vm3, %v1337_v40, 0.0 }
 0x256   : > { %v1405_v25 = vadd.f32 %v1404_v11, %v1403_v28 }
 0x257   : > { %v1505_v56 = vsel %vm947_vm3, %v1452_v23, 0.0 }
 0x258   : > { %v1506_v34 = vadd.f32 %v1505_v56, %v1504_v57 }
 0x259   : > { %v1351_v48 = vpop.f32.mrf.mxu3 }
 0x25a   : > { %v1352_v9 = vadd.f32 %v2721_v59, %v1351_v48  ;;  %v1338_v30 = vpop.f32.mrf.mxu2 }
 0x25b   : > { %v1339_v22 = vadd.f32 %v2721_v59, %v1338_v30 }
 0x25c   : > { %1563 = vst.msk [vmem:[%s2726_s11 + $0xe0] sm:$0xff] %vm947_vm3, %v1352_v9  ;;  %v1458_v14 = vmul.f32 %v1352_v9, %v1352_v9  ;;  %v1416_v17 = vsel %vm947_vm3, %v1352_v9, 0.0 }
 0x25d   : > { %v1406_v44 = vsel %vm947_vm3, %v1339_v22, 0.0  ;;  %v1453_v13 = vmul.f32 %v1339_v22, %v1339_v22  ;;  %1558 = vst.msk [vmem:[%s2726_s11 + $0xb8] sm:$0xff] %vm947_vm3, %v1339_v22 }
 0x25e   : > { %v1407_v5 = vadd.f32 %v1406_v44, %v1405_v25  ;;  %v1517_v47 = vsel %vm947_vm3, %v1458_v14, 0.0 }
 0x25f   : > { %v1507_v1 = vsel %vm947_vm3, %v1453_v13, 0.0 }
 0x260   : > { %v1409_v8 = vadd.f32 %v1408_v53, %v1407_v5  ;;  %v1508_v31 = vadd.f32 %v1507_v1, %v1506_v34 }
 0x261   : > { %v1353_v55 = vpop.f32.mrf.mxu3 }
 0x262   : > { %v1411_v18 = vadd.f32 %v1410_v27, %v1409_v8  ;;  %v1510_v26 = vadd.f32 %v1509_v24, %v1508_v31  ;;  %v1354_v21 = vadd.f32 %v2721_v59, %v1353_v55 }
 0x264   : > { %v1512_v46 = vadd.f32 %v1511_v19, %v1510_v26  ;;  %v1413_v37 = vadd.f32 %v1412_v62, %v1411_v18  ;;  %1564 = vst.msk [vmem:[%s2726_s11 + $0xe8] sm:$0xff] %vm947_vm3, %v1354_v21  ;;  %v1459_v58 = vmul.f32 %v1354_v21, %v1354_v21  ;;  %v1418_v7 = vsel %vm947_vm3, %v1354_v21, 0.0 }
 0x266   : > { %v1415_v49 = vadd.f32 %v1414_v33, %v1413_v37  ;;  %v1514_v41 = vadd.f32 %v1513_v36, %v1512_v46  ;;  %v1519_v61 = vsel %vm947_vm3, %v1459_v58, 0.0 }
 0x268   : > { %v1516_v38 = vadd.f32 %v1515_v29, %v1514_v41  ;;  %v1417_v12 = vadd.f32 %v1416_v17, %v1415_v49 }
 0x26a   : > { %v1356_v10 = vpop.f32.mrf.mxu3  ;;  %v1518_v51 = vadd.f32 %v1517_v47, %v1516_v38  ;;  %v1419_v43 = vadd.f32 %v1418_v7, %v1417_v12 }
 0x26b   : > { %v1357_v52 = vadd.f32 %v2721_v59, %v1356_v10 }
 0x26c   : > { %v1520_v2 = vadd.f32 %v1519_v61, %v1518_v51 }
 0x26d   : > { %1565 = vst.msk [vmem:[%s2726_s11 + $0xf0] sm:$0xff] %vm947_vm3, %v1357_v52  ;;  %v1460_v54 = vmul.f32 %v1357_v52, %v1357_v52  ;;  %v1420_v42 = vsel %vm947_vm3, %v1357_v52, 0.0 }
 0x26e   : > { %v1421_v40 = vadd.f32 %v1420_v42, %v1419_v43 }
 0x26f   : > { %v1521_v60 = vsel %vm947_vm3, %v1460_v54, 0.0 }
 0x270   : > { %v1522_v39 = vadd.f32 %v1521_v60, %v1520_v2 }
 0x272   : > { %v1358_v35 = vpop.f32.mrf.mxu3 }
 0x273   : > { %v1359_v15 = vadd.f32 %v2721_v59, %v1358_v35 }
 0x275   : > { %v1422_v6 = vsel %vm947_vm3, %v1359_v15, 0.0  ;;  %v1461_v3 = vmul.f32 %v1359_v15, %v1359_v15  ;;  %1566 = vst.msk [vmem:[%s2726_s11 + $0xf8] sm:$0xff] %vm947_vm3, %v1359_v15 }
 0x276   : > { %v1423_v0 = vadd.f32 %v1422_v6, %v1421_v40 }
 0x277   : > { %v1523_v23 = vsel %vm947_vm3, %v1461_v3, 0.0 }
 0x278   : > { %v1424_v20 = vrot.slane %v1423_v0, 4  ;;  %v1524_v63 = vadd.f32 %v1523_v23, %v1522_v39 }
 0x27a   : > { %v1425_v11 = vadd.f32 %v1424_v20, %v1423_v0  ;;  %v1525_v48 = vrot.slane %v1524_v63, 4 }
 0x27c   : > { %v1426_v28 = vrot.slane %v1425_v11, 2  ;;  %v1526_v9 = vadd.f32 %v1525_v48, %v1524_v63 }
 0x27e   : > { %v1427_v59 = vadd.f32 %v1426_v28, %v1425_v11  ;;  %v1527_v30 = vrot.slane %v1526_v9, 2 }
 0x280   : > { %v1428_v50 = vrot.slane %v1427_v59, 1  ;;  %v1528_v56 = vadd.f32 %v1527_v30, %v1526_v9 }
 0x282   : > { %v1529_v22 = vrot.slane %v1528_v56, 1  ;;  %v1429_v25 = vadd.f32 %v1428_v50, %v1427_v59 }
 0x284   : > { %v1530_v57 = vadd.f32 %v1529_v22, %v1528_v56 }
 0x286   : > { %v1532_v32 = vsel %vm1531_vm12, %v1429_v25, %v1530_v57 }
 0x287   : > { %1534 = vst.msk [vmem:[%s257_s14] sm:$0x3] %vm1533_vm13, %v1532_v32 }
 0x288 PF: > { %s15_s19 = sadd.s32 1, %s1953_s19   ;;  %s3069_s15 = smov %s1945_s17 }
 0x289   : > { %p12_p8 = scmp.ge.s32.totalorder %s15_s19, 10   ;;  %s3070_s16 = smov %s1949_s18 }
 0x28a   : > { %s3071_s17 = smov %s3074_s20  ;;  %s3072_s18 = smov %s3078_s21 }
 0x28b   :  { %14 = sbr.rel (!%p12_p8) target bundleno = 3 (0x3), region = 74 }

</bundles_post_ra>
